<compile_context>
chip_gen: v7x
topology: tpu7x:2x2x1
jax: 0.10.0
libtpu: 0.0.40
codegen_flags: <defaults>
</compile_context>

<pallas_src>
import jax
import jax.numpy as jnp
from jax.experimental import pallas as pl
from jax.experimental.pallas import tpu as pltpu


def _lstm_classifier_kernel(
    x_ref,                               # (S, Bb, F)   time-major batch block
    w_ih0_ref, w_hh0_ref, b0_ref,        # (F,4H), (H,4H), (1,4H)
    w_ih1_ref, w_hh1_ref, b1_ref,        # (H,4H), (H,4H), (1,4H)
    wa1_ref, ba1_ref, wa2_ref, ba2_ref,  # (H,64),(1,64),(1,64),(1,1)
    wfc1_ref, bfc1_ref,                  # (H,128),(1,128)  (BatchNorm folded)
    wfc2_ref, bfc2_ref,                  # (128,C),(1,C)
    out_ref,                             # (Bb, C)
    x0_scr,                              # (S*Bb, 4H) VMEM scratch
    h2_scr,                              # (S*Bb, H)  VMEM scratch
):
    f32 = jnp.float32
    S, Bb, F = x_ref.shape
    H = w_hh0_ref.shape[0]

    # ---- layer-0 input projection: one big MXU matmul, staged in VMEM -------
    # (keeps the 16-vreg x0 slab out of the register file during the unroll)
    x2d = x_ref[...].reshape(S * Bb, F)
    x0_scr[...] = (jnp.dot(x2d, w_ih0_ref[...], preferred_element_type=f32)
                   + b0_ref[...])

    # Recurrent weights stay live in vregs across the unrolled loop.
    w_hh0 = w_hh0_ref[...]
    w_ih1 = w_ih1_ref[...]
    w_hh1 = w_hh1_ref[...]
    b1 = jnp.broadcast_to(b1_ref[...], (Bb, 4 * H))        # hoisted broadcast

    def cell(gates, c):
        # Activations on the full 4H-lane gate slab (2 EUP passes), then the
        # i,f,g,o lane slices (PyTorch gate order).
        sg = jax.nn.sigmoid(gates)
        th = jnp.tanh(gates)
        i = sg[:, 0 * H:1 * H]
        f = sg[:, 1 * H:2 * H]
        g = th[:, 2 * H:3 * H]
        o = sg[:, 3 * H:4 * H]
        c_new = f * c + i * g
        return o * jnp.tanh(c_new), c_new

    h1 = jnp.zeros((Bb, H), f32); c1 = jnp.zeros((Bb, H), f32)
    h2 = jnp.zeros((Bb, H), f32); c2 = jnp.zeros((Bb, H), f32)

    # Static unroll (S is small); inter-layer dropout is identity in eval mode.
    for t in range(S):
        row = t * Bb                                        # static, 8-aligned
        # Layer-1 partial that only needs h2_{t-1}: independent of this step's
        # layer-0 cell, so it overlaps with the h1 chain (wavefront).
        g1_part = jnp.dot(h2, w_hh1, preferred_element_type=f32) + b1
        # Layer 0: only the recurrent half is on the chain.
        g0 = (x0_scr[pl.ds(row, Bb), :]
              + jnp.dot(h1, w_hh0, preferred_element_type=f32))
        h1, c1 = cell(g0, c1)
        # Layer 1: second partial matmul as soon as h1_t exists (no concat).
        g1 = g1_part + jnp.dot(h1, w_ih1, preferred_element_type=f32)
        h2, c2 = cell(g1, c2)
        h2_scr[pl.ds(row, Bb), :] = h2                      # off the chain

    # ---- attention + classification head (vectorized tail) ------------------
    h2_all = h2_scr[...]                                    # (S*Bb, H)
    a = jnp.tanh(jnp.dot(h2_all, wa1_ref[...], preferred_element_type=f32)
                 + ba1_ref[...])                            # (S*Bb, 64)
    # (64 -> 1) projection as VPU multiply + lane reduce (exact f32, no
    # 1-lane-wide matmul).
    scores = (jnp.sum(a * wa2_ref[...], axis=-1, keepdims=True)
              + ba2_ref[...])                               # (S*Bb, 1)

    # Softmax over time as leading-dim reductions (no lane relayout).
    scores = scores.reshape(S, Bb, 1)
    m = jnp.max(scores, axis=0, keepdims=True)
    e = jnp.exp(scores - m)
    attn = e / jnp.sum(e, axis=0, keepdims=True)            # (S, Bb, 1)

    # context_vector = sum_t attn[t] * lstm_out[t]
    ctx = jnp.sum(attn * h2_all.reshape(S, Bb, H), axis=0)  # (Bb, H)

    # fc1 (BatchNorm folded) -> ReLU -> fc2
    o1 = (jnp.dot(ctx, wfc1_ref[...], preferred_element_type=f32)
          + bfc1_ref[...])
    o1 = jnp.maximum(o1, 0.0)
    out_ref[...] = (jnp.dot(o1, wfc2_ref[...], preferred_element_type=f32)
                    + bfc2_ref[...])


def lstm_workout_classifier(x, params, *, block_b=None):
    B, S, F = x.shape
    H = params["w_hh0"].shape[0]
    C = params["wfc2"].shape[1]

    # Batch block: largest multiple-of-8 divisor of B (bounds per-step vreg
    # pressure; with >1 block the "parallel" grid axis shards across the two
    # TensorCores on v7x).  Tiny test batches (B<=8) run as one block.
    if block_b is None:
        block_b = B
        for cand in (128, 64, 32, 16, 8):
            if B % cand == 0:
                block_b = cand
                break
    assert B % block_b == 0
    n_blocks = B // block_b

    # Layout plumbing + parameter folding (cheap XLA ops outside the kernel).
    x_tm = jnp.transpose(x, (1, 0, 2))                      # (S, B, F) time-major
    scale = params["bn_g"] * jax.lax.rsqrt(params["bn_v"] + 1e-5)
    wfc1 = params["wfc1"] * scale
    bfc1 = (params["bfc1"] - params["bn_m"]) * scale + params["bn_b"]
    wa2_row = params["wa2"].T                               # (1, 64)

    weights = (params["w_ih0"], params["w_hh0"], params["b0"],
               params["w_ih1"], params["w_hh1"], params["b1"],
               params["wa1"], params["ba1"], wa2_row, params["ba2"],
               wfc1, bfc1, params["wfc2"], params["bfc2"])

    def w_spec(a):                                          # full-array, resident
        return pl.BlockSpec(a.shape, lambda i: (0, 0))

    grid_spec = pltpu.PrefetchScalarGridSpec(
        num_scalar_prefetch=0,
        grid=(n_blocks,),
        in_specs=[pl.BlockSpec((S, block_b, F), lambda i: (0, i, 0))]
                 + [w_spec(w) for w in weights],
        out_specs=pl.BlockSpec((block_b, C), lambda i: (i, 0)),
        scratch_shapes=[pltpu.VMEM((S * block_b, 4 * H), jnp.float32),
                        pltpu.VMEM((S * block_b, H), jnp.float32)],
    )
    return pl.pallas_call(
        _lstm_classifier_kernel,
        out_shape=jax.ShapeDtypeStruct((B, C), jnp.float32),
        grid_spec=grid_spec,
        compiler_params=pltpu.CompilerParams(
            dimension_semantics=("parallel",)),
    )(x_tm, *weights)


def init_params(key, input_size, hidden_size, num_classes):
    H = hidden_size
    kH = 1.0 / (H ** 0.5)
    k64 = 1.0 / (64.0 ** 0.5)
    k128 = 1.0 / (128.0 ** 0.5)
    keys = jax.random.split(key, 16)

    def u(k, shape, bound):
        return jax.random.uniform(k, shape, jnp.float32, -bound, bound)

    p = {}
    # LSTM layer 0 (PyTorch shapes transposed to (in, out)); gate order i,f,g,o.
    p["w_ih0"] = u(keys[0], (input_size, 4 * H), kH)
    p["w_hh0"] = u(keys[1], (H, 4 * H), kH)
    p["b0"] = u(keys[2], (1, 4 * H), kH) + u(keys[3], (1, 4 * H), kH)   # b_ih + b_hh
    # LSTM layer 1
    p["w_ih1"] = u(keys[4], (H, 4 * H), kH)
    p["w_hh1"] = u(keys[5], (H, 4 * H), kH)
    p["b1"] = u(keys[6], (1, 4 * H), kH) + u(keys[7], (1, 4 * H), kH)
    # attention: Linear(H, 64) -> Tanh -> Linear(64, 1) -> Softmax(dim=1)
    p["wa1"] = u(keys[8], (H, 64), kH)
    p["ba1"] = u(keys[9], (1, 64), kH)
    p["wa2"] = u(keys[10], (64, 1), k64)
    p["ba2"] = u(keys[11], (1, 1), k64)
    # fc1: Linear(H, 128)
    p["wfc1"] = u(keys[12], (H, 128), kH)
    p["bfc1"] = u(keys[13], (1, 128), kH)
    # BatchNorm1d(128): default init + running stats (eval mode)
    p["bn_g"] = jnp.ones((1, 128), jnp.float32)
    p["bn_b"] = jnp.zeros((1, 128), jnp.float32)
    p["bn_m"] = jnp.zeros((1, 128), jnp.float32)
    p["bn_v"] = jnp.ones((1, 128), jnp.float32)
    # fc2: Linear(128, num_classes)
    p["wfc2"] = u(keys[14], (128, num_classes), k128)
    p["bfc2"] = u(keys[15], (1, num_classes), k128)
    return p


def reference_forward(x, p):
    B, S, F = x.shape
    H = p["w_hh0"].shape[0]

    def run(inp, w_ih, w_hh, b):
        h = jnp.zeros((B, H), jnp.float32)
        c = jnp.zeros((B, H), jnp.float32)
        outs = []
        for t in range(S):
            g = inp[:, t, :] @ w_ih + h @ w_hh + b
            i = jax.nn.sigmoid(g[:, :H])
            f = jax.nn.sigmoid(g[:, H:2 * H])
            gg = jnp.tanh(g[:, 2 * H:3 * H])
            o = jax.nn.sigmoid(g[:, 3 * H:])
            c = f * c + i * gg
            h = o * jnp.tanh(c)
            outs.append(h)
        return jnp.stack(outs, axis=1)

    l1 = run(x, p["w_ih0"], p["w_hh0"], p["b0"])
    l2 = run(l1, p["w_ih1"], p["w_hh1"], p["b1"])
    a = jnp.tanh(l2 @ p["wa1"] + p["ba1"])                        # (B, S, 64)
    # Linear(64, 1) written as an explicit dot product (same math as a matmul).
    s = jnp.sum(a * p["wa2"][:, 0], axis=-1, keepdims=True) + p["ba2"]   # (B, S, 1)
    attn = jax.nn.softmax(s, axis=1)
    ctx = jnp.sum(attn * l2, axis=1)
    o = ctx @ p["wfc1"] + p["bfc1"]
    o = (o - p["bn_m"]) * jax.lax.rsqrt(p["bn_v"] + 1e-5) * p["bn_g"] + p["bn_b"]
    o = jnp.maximum(o, 0.0)
    return o @ p["wfc2"] + p["bfc2"]


if __name__ == "__main__":
    B, S, F = 8, 16, 9       # batch, seq_len, input_size
    H, C = 32, 5             # hidden_size, num_classes

    key = jax.random.PRNGKey(0)
    kx, kp = jax.random.split(key)
    x = jax.random.normal(kx, (B, S, F), jnp.float32)
    params = init_params(kp, F, H, C)

    out = jax.jit(lstm_workout_classifier)(x, params)
    out = jax.block_until_ready(out)

    ref = reference_forward(x, params)
    assert out.shape == (B, C)
    max_err = float(jnp.max(jnp.abs(out - ref)))
    assert max_err < 1e-4, f"mismatch vs reference: {max_err}"
    print("KERNEL_OK")
</pallas_src>

<mosaic_0001>
module attributes {stable_mosaic.version = 11 : i64} {
  func.func @_lstm_classifier_kernel(%arg0: i32, %arg1: memref<16x8x9xf32, #tpu.memory_space<vmem>>, %arg2: memref<9x128xf32, #tpu.memory_space<vmem>>, %arg3: memref<32x128xf32, #tpu.memory_space<vmem>>, %arg4: memref<1x128xf32, #tpu.memory_space<vmem>>, %arg5: memref<32x128xf32, #tpu.memory_space<vmem>>, %arg6: memref<32x128xf32, #tpu.memory_space<vmem>>, %arg7: memref<1x128xf32, #tpu.memory_space<vmem>>, %arg8: memref<32x64xf32, #tpu.memory_space<vmem>>, %arg9: memref<1x64xf32, #tpu.memory_space<vmem>>, %arg10: memref<1x64xf32, #tpu.memory_space<vmem>>, %arg11: memref<1x1xf32, #tpu.memory_space<vmem>>, %arg12: memref<32x128xf32, #tpu.memory_space<vmem>>, %arg13: memref<1x128xf32, #tpu.memory_space<vmem>>, %arg14: memref<128x5xf32, #tpu.memory_space<vmem>>, %arg15: memref<1x5xf32, #tpu.memory_space<vmem>>, %arg16: memref<8x5xf32, #tpu.memory_space<vmem>>, %arg17: memref<128x128xf32, #tpu.memory_space<vmem>>, %arg18: memref<128x32xf32, #tpu.memory_space<vmem>>) attributes {dimension_semantics = [#tpu.dimension_semantics<parallel>], iteration_bounds = array<i64: 1>, scalar_prefetch = 0 : i64, scratch_operands = 2 : i64, tpu.core_type = #tpu.core_type<tc>, window_params = [{transform_indices = @transform_0, window_bounds = array<i64: 16, 8, 9>}, {pipeline_mode = #tpu.pipeline_mode<synchronous>, transform_indices = @transform_1, window_bounds = array<i64: 9, 128>}, {pipeline_mode = #tpu.pipeline_mode<synchronous>, transform_indices = @transform_2, window_bounds = array<i64: 32, 128>}, {pipeline_mode = #tpu.pipeline_mode<synchronous>, transform_indices = @transform_3, window_bounds = array<i64: 1, 128>}, {pipeline_mode = #tpu.pipeline_mode<synchronous>, transform_indices = @transform_4, window_bounds = array<i64: 32, 128>}, {pipeline_mode = #tpu.pipeline_mode<synchronous>, transform_indices = @transform_5, window_bounds = array<i64: 32, 128>}, {pipeline_mode = #tpu.pipeline_mode<synchronous>, transform_indices = @transform_6, window_bounds = array<i64: 1, 128>}, {pipeline_mode = #tpu.pipeline_mode<synchronous>, transform_indices = @transform_7, window_bounds = array<i64: 32, 64>}, {pipeline_mode = #tpu.pipeline_mode<synchronous>, transform_indices = @transform_8, window_bounds = array<i64: 1, 64>}, {pipeline_mode = #tpu.pipeline_mode<synchronous>, transform_indices = @transform_9, window_bounds = array<i64: 1, 64>}, {pipeline_mode = #tpu.pipeline_mode<synchronous>, transform_indices = @transform_10, window_bounds = array<i64: 1, 1>}, {pipeline_mode = #tpu.pipeline_mode<synchronous>, transform_indices = @transform_11, window_bounds = array<i64: 32, 128>}, {pipeline_mode = #tpu.pipeline_mode<synchronous>, transform_indices = @transform_12, window_bounds = array<i64: 1, 128>}, {pipeline_mode = #tpu.pipeline_mode<synchronous>, transform_indices = @transform_13, window_bounds = array<i64: 128, 5>}, {pipeline_mode = #tpu.pipeline_mode<synchronous>, transform_indices = @transform_14, window_bounds = array<i64: 1, 5>}, {transform_indices = @transform_15, window_bounds = array<i64: 8, 5>}]} {
    %c0 = arith.constant 0 : index
    %c0_0 = arith.constant 0 : index
    %c0_1 = arith.constant 0 : index
    %0 = vector.load %arg1[%c0, %c0_0, %c0_1] : memref<16x8x9xf32, #tpu.memory_space<vmem>>, vector<16x8x9xf32>
    %1 = vector.shape_cast %0 : vector<16x8x9xf32> to vector<128x9xf32>
    %c0_2 = arith.constant 0 : index
    %c0_3 = arith.constant 0 : index
    %2 = vector.load %arg2[%c0_2, %c0_3] : memref<9x128xf32, #tpu.memory_space<vmem>>, vector<9x128xf32>
    %cst = arith.constant dense<0.000000e+00> : vector<128x128xf32>
    %3 = tpu.matmul %1, %2, %cst {dimension_numbers = #tpu.dot_dimension_numbers<[1], [0], [0], [1], [0, 0, 1, 1], [], []>} : vector<128x9xf32>, vector<9x128xf32>, vector<128x128xf32> -> vector<128x128xf32>
    %c0_4 = arith.constant 0 : index
    %c0_5 = arith.constant 0 : index
    %4 = vector.load %arg4[%c0_4, %c0_5] : memref<1x128xf32, #tpu.memory_space<vmem>>, vector<1x128xf32>
    %5 = vector.broadcast %4 : vector<1x128xf32> to vector<128x128xf32>
    %6 = arith.addf %3, %5 : vector<128x128xf32>
    %c0_6 = arith.constant 0 : index
    %c0_7 = arith.constant 0 : index
    %7 = vector.load %arg17[%c0_6, %c0_7] : memref<128x128xf32, #tpu.memory_space<vmem>>, vector<128x128xf32>
    tpu.vector_store %arg17[%c0_6, %c0_7], %6 {strides = array<i32>} : memref<128x128xf32, #tpu.memory_space<vmem>>, vector<128x128xf32>,
    %c0_8 = arith.constant 0 : index
    %c0_9 = arith.constant 0 : index
    %8 = vector.load %arg3[%c0_8, %c0_9] : memref<32x128xf32, #tpu.memory_space<vmem>>, vector<32x128xf32>
    %c0_10 = arith.constant 0 : index
    %c0_11 = arith.constant 0 : index
    %9 = vector.load %arg5[%c0_10, %c0_11] : memref<32x128xf32, #tpu.memory_space<vmem>>, vector<32x128xf32>
    %c0_12 = arith.constant 0 : index
    %c0_13 = arith.constant 0 : index
    %10 = vector.load %arg6[%c0_12, %c0_13] : memref<32x128xf32, #tpu.memory_space<vmem>>, vector<32x128xf32>
    %c0_14 = arith.constant 0 : index
    %c0_15 = arith.constant 0 : index
    %11 = vector.load %arg7[%c0_14, %c0_15] : memref<1x128xf32, #tpu.memory_space<vmem>>, vector<1x128xf32>
    %12 = vector.shape_cast %11 : vector<1x128xf32> to vector<1x128xf32>
    %13 = vector.broadcast %12 : vector<1x128xf32> to vector<8x128xf32>
    %cst_16 = arith.constant 0.000000e+00 : f32
    %14 = vector.broadcast %cst_16 : f32 to vector<8x32xf32>
    %cst_17 = arith.constant 0.000000e+00 : f32
    %15 = vector.broadcast %cst_17 : f32 to vector<8x32xf32>
    %cst_18 = arith.constant 0.000000e+00 : f32
    %16 = vector.broadcast %cst_18 : f32 to vector<8x32xf32>
    %cst_19 = arith.constant 0.000000e+00 : f32
    %17 = vector.broadcast %cst_19 : f32 to vector<8x32xf32>
    %cst_20 = arith.constant dense<0.000000e+00> : vector<8x128xf32>
    %18 = tpu.matmul %16, %10, %cst_20 {dimension_numbers = #tpu.dot_dimension_numbers<[1], [0], [0], [1], [0, 0, 1, 1], [], []>} : vector<8x32xf32>, vector<32x128xf32>, vector<8x128xf32> -> vector<8x128xf32>
    %19 = arith.addf %18, %13 : vector<8x128xf32>
    %c0_21 = arith.constant 0 : index
    %c0_22 = arith.constant 0 : index
    %20 = vector.load %arg17[%c0_21, %c0_22] : memref<128x128xf32, #tpu.memory_space<vmem>>, vector<8x128xf32>
    %cst_23 = arith.constant dense<0.000000e+00> : vector<8x128xf32>
    %21 = tpu.matmul %14, %8, %cst_23 {dimension_numbers = #tpu.dot_dimension_numbers<[1], [0], [0], [1], [0, 0, 1, 1], [], []>} : vector<8x32xf32>, vector<32x128xf32>, vector<8x128xf32> -> vector<8x128xf32>
    %22 = arith.addf %20, %21 : vector<8x128xf32>
    %23 = arith.negf %22 : vector<8x128xf32>
    %24 = math.exp %23 : vector<8x128xf32>
    %cst_24 = arith.constant 1.000000e+00 : f32
    %25 = vector.broadcast %cst_24 : f32 to vector<8x128xf32>
    %26 = arith.addf %25, %24 : vector<8x128xf32>
    %27 = arith.divf %25, %26 : vector<8x128xf32>
    %28 = math.tanh %22 : vector<8x128xf32>
    %29 = vector.extract_strided_slice %27 {offsets = [0, 0], sizes = [8, 32], strides = [1, 1]} : vector<8x128xf32> to vector<8x32xf32>
    %30 = vector.extract_strided_slice %27 {offsets = [0, 32], sizes = [8, 32], strides = [1, 1]} : vector<8x128xf32> to vector<8x32xf32>
    %31 = vector.extract_strided_slice %28 {offsets = [0, 64], sizes = [8, 32], strides = [1, 1]} : vector<8x128xf32> to vector<8x32xf32>
    %32 = vector.extract_strided_slice %27 {offsets = [0, 96], sizes = [8, 32], strides = [1, 1]} : vector<8x128xf32> to vector<8x32xf32>
    %33 = arith.mulf %30, %15 : vector<8x32xf32>
    %34 = arith.mulf %29, %31 : vector<8x32xf32>
    %35 = arith.addf %33, %34 : vector<8x32xf32>
    %36 = math.tanh %35 : vector<8x32xf32>
    %37 = arith.mulf %32, %36 : vector<8x32xf32>
    %cst_25 = arith.constant dense<0.000000e+00> : vector<8x128xf32>
    %38 = tpu.matmul %37, %9, %cst_25 {dimension_numbers = #tpu.dot_dimension_numbers<[1], [0], [0], [1], [0, 0, 1, 1], [], []>} : vector<8x32xf32>, vector<32x128xf32>, vector<8x128xf32> -> vector<8x128xf32>
    %39 = arith.addf %19, %38 : vector<8x128xf32>
    %40 = arith.negf %39 : vector<8x128xf32>
    %41 = math.exp %40 : vector<8x128xf32>
    %cst_26 = arith.constant 1.000000e+00 : f32
    %42 = vector.broadcast %cst_26 : f32 to vector<8x128xf32>
    %43 = arith.addf %42, %41 : vector<8x128xf32>
    %44 = arith.divf %42, %43 : vector<8x128xf32>
    %45 = math.tanh %39 : vector<8x128xf32>
    %46 = vector.extract_strided_slice %44 {offsets = [0, 0], sizes = [8, 32], strides = [1, 1]} : vector<8x128xf32> to vector<8x32xf32>
    %47 = vector.extract_strided_slice %44 {offsets = [0, 32], sizes = [8, 32], strides = [1, 1]} : vector<8x128xf32> to vector<8x32xf32>
    %48 = vector.extract_strided_slice %45 {offsets = [0, 64], sizes = [8, 32], strides = [1, 1]} : vector<8x128xf32> to vector<8x32xf32>
    %49 = vector.extract_strided_slice %44 {offsets = [0, 96], sizes = [8, 32], strides = [1, 1]} : vector<8x128xf32> to vector<8x32xf32>
    %50 = arith.mulf %47, %17 : vector<8x32xf32>
    %51 = arith.mulf %46, %48 : vector<8x32xf32>
    %52 = arith.addf %50, %51 : vector<8x32xf32>
    %53 = math.tanh %52 : vector<8x32xf32>
    %54 = arith.mulf %49, %53 : vector<8x32xf32>
    %c0_27 = arith.constant 0 : index
    %c0_28 = arith.constant 0 : index
    %55 = vector.load %arg18[%c0_27, %c0_28] : memref<128x32xf32, #tpu.memory_space<vmem>>, vector<8x32xf32>
    tpu.vector_store %arg18[%c0_27, %c0_28], %54 {strides = array<i32>} : memref<128x32xf32, #tpu.memory_space<vmem>>, vector<8x32xf32>,
    %cst_29 = arith.constant dense<0.000000e+00> : vector<8x128xf32>
    %56 = tpu.matmul %54, %10, %cst_29 {dimension_numbers = #tpu.dot_dimension_numbers<[1], [0], [0], [1], [0, 0, 1, 1], [], []>} : vector<8x32xf32>, vector<32x128xf32>, vector<8x128xf32> -> vector<8x128xf32>
    %57 = arith.addf %56, %13 : vector<8x128xf32>
    %c8 = arith.constant 8 : index
    %c0_30 = arith.constant 0 : index
    %58 = vector.load %arg17[%c8, %c0_30] : memref<128x128xf32, #tpu.memory_space<vmem>>, vector<8x128xf32>
    %cst_31 = arith.constant dense<0.000000e+00> : vector<8x128xf32>
    %59 = tpu.matmul %37, %8, %cst_31 {dimension_numbers = #tpu.dot_dimension_numbers<[1], [0], [0], [1], [0, 0, 1, 1], [], []>} : vector<8x32xf32>, vector<32x128xf32>, vector<8x128xf32> -> vector<8x128xf32>
    %60 = arith.addf %58, %59 : vector<8x128xf32>
    %61 = arith.negf %60 : vector<8x128xf32>
    %62 = math.exp %61 : vector<8x128xf32>
    %cst_32 = arith.constant 1.000000e+00 : f32
    %63 = vector.broadcast %cst_32 : f32 to vector<8x128xf32>
    %64 = arith.addf %63, %62 : vector<8x128xf32>
    %65 = arith.divf %63, %64 : vector<8x128xf32>
    %66 = math.tanh %60 : vector<8x128xf32>
    %67 = vector.extract_strided_slice %65 {offsets = [0, 0], sizes = [8, 32], strides = [1, 1]} : vector<8x128xf32> to vector<8x32xf32>
    %68 = vector.extract_strided_slice %65 {offsets = [0, 32], sizes = [8, 32], strides = [1, 1]} : vector<8x128xf32> to vector<8x32xf32>
    %69 = vector.extract_strided_slice %66 {offsets = [0, 64], sizes = [8, 32], strides = [1, 1]} : vector<8x128xf32> to vector<8x32xf32>
    %70 = vector.extract_strided_slice %65 {offsets = [0, 96], sizes = [8, 32], strides = [1, 1]} : vector<8x128xf32> to vector<8x32xf32>
    %71 = arith.mulf %68, %35 : vector<8x32xf32>
    %72 = arith.mulf %67, %69 : vector<8x32xf32>
    %73 = arith.addf %71, %72 : vector<8x32xf32>
    %74 = math.tanh %73 : vector<8x32xf32>
    %75 = arith.mulf %70, %74 : vector<8x32xf32>
    %cst_33 = arith.constant dense<0.000000e+00> : vector<8x128xf32>
    %76 = tpu.matmul %75, %9, %cst_33 {dimension_numbers = #tpu.dot_dimension_numbers<[1], [0], [0], [1], [0, 0, 1, 1], [], []>} : vector<8x32xf32>, vector<32x128xf32>, vector<8x128xf32> -> vector<8x128xf32>
    %77 = arith.addf %57, %76 : vector<8x128xf32>
    %78 = arith.negf %77 : vector<8x128xf32>
    %79 = math.exp %78 : vector<8x128xf32>
    %cst_34 = arith.constant 1.000000e+00 : f32
    %80 = vector.broadcast %cst_34 : f32 to vector<8x128xf32>
    %81 = arith.addf %80, %79 : vector<8x128xf32>
    %82 = arith.divf %80, %81 : vector<8x128xf32>
    %83 = math.tanh %77 : vector<8x128xf32>
    %84 = vector.extract_strided_slice %82 {offsets = [0, 0], sizes = [8, 32], strides = [1, 1]} : vector<8x128xf32> to vector<8x32xf32>
    %85 = vector.extract_strided_slice %82 {offsets = [0, 32], sizes = [8, 32], strides = [1, 1]} : vector<8x128xf32> to vector<8x32xf32>
    %86 = vector.extract_strided_slice %83 {offsets = [0, 64], sizes = [8, 32], strides = [1, 1]} : vector<8x128xf32> to vector<8x32xf32>
    %87 = vector.extract_strided_slice %82 {offsets = [0, 96], sizes = [8, 32], strides = [1, 1]} : vector<8x128xf32> to vector<8x32xf32>
    %88 = arith.mulf %85, %52 : vector<8x32xf32>
    %89 = arith.mulf %84, %86 : vector<8x32xf32>
    %90 = arith.addf %88, %89 : vector<8x32xf32>
    %91 = math.tanh %90 : vector<8x32xf32>
    %92 = arith.mulf %87, %91 : vector<8x32xf32>
    %c8_35 = arith.constant 8 : index
    %c0_36 = arith.constant 0 : index
    %93 = vector.load %arg18[%c8_35, %c0_36] : memref<128x32xf32, #tpu.memory_space<vmem>>, vector<8x32xf32>
    tpu.vector_store %arg18[%c8_35, %c0_36], %92 {strides = array<i32>} : memref<128x32xf32, #tpu.memory_space<vmem>>, vector<8x32xf32>,
    %cst_37 = arith.constant dense<0.000000e+00> : vector<8x128xf32>
    %94 = tpu.matmul %92, %10, %cst_37 {dimension_numbers = #tpu.dot_dimension_numbers<[1], [0], [0], [1], [0, 0, 1, 1], [], []>} : vector<8x32xf32>, vector<32x128xf32>, vector<8x128xf32> -> vector<8x128xf32>
    %95 = arith.addf %94, %13 : vector<8x128xf32>
    %c16 = arith.constant 16 : index
    %c0_38 = arith.constant 0 : index
    %96 = vector.load %arg17[%c16, %c0_38] : memref<128x128xf32, #tpu.memory_space<vmem>>, vector<8x128xf32>
    %cst_39 = arith.constant dense<0.000000e+00> : vector<8x128xf32>
    %97 = tpu.matmul %75, %8, %cst_39 {dimension_numbers = #tpu.dot_dimension_numbers<[1], [0], [0], [1], [0, 0, 1, 1], [], []>} : vector<8x32xf32>, vector<32x128xf32>, vector<8x128xf32> -> vector<8x128xf32>
    %98 = arith.addf %96, %97 : vector<8x128xf32>
    %99 = arith.negf %98 : vector<8x128xf32>
    %100 = math.exp %99 : vector<8x128xf32>
    %cst_40 = arith.constant 1.000000e+00 : f32
    %101 = vector.broadcast %cst_40 : f32 to vector<8x128xf32>
    %102 = arith.addf %101, %100 : vector<8x128xf32>
    %103 = arith.divf %101, %102 : vector<8x128xf32>
    %104 = math.tanh %98 : vector<8x128xf32>
    %105 = vector.extract_strided_slice %103 {offsets = [0, 0], sizes = [8, 32], strides = [1, 1]} : vector<8x128xf32> to vector<8x32xf32>
    %106 = vector.extract_strided_slice %103 {offsets = [0, 32], sizes = [8, 32], strides = [1, 1]} : vector<8x128xf32> to vector<8x32xf32>
    %107 = vector.extract_strided_slice %104 {offsets = [0, 64], sizes = [8, 32], strides = [1, 1]} : vector<8x128xf32> to vector<8x32xf32>
    %108 = vector.extract_strided_slice %103 {offsets = [0, 96], sizes = [8, 32], strides = [1, 1]} : vector<8x128xf32> to vector<8x32xf32>
    %109 = arith.mulf %106, %73 : vector<8x32xf32>
    %110 = arith.mulf %105, %107 : vector<8x32xf32>
    %111 = arith.addf %109, %110 : vector<8x32xf32>
    %112 = math.tanh %111 : vector<8x32xf32>
    %113 = arith.mulf %108, %112 : vector<8x32xf32>
    %cst_41 = arith.constant dense<0.000000e+00> : vector<8x128xf32>
    %114 = tpu.matmul %113, %9, %cst_41 {dimension_numbers = #tpu.dot_dimension_numbers<[1], [0], [0], [1], [0, 0, 1, 1], [], []>} : vector<8x32xf32>, vector<32x128xf32>, vector<8x128xf32> -> vector<8x128xf32>
    %115 = arith.addf %95, %114 : vector<8x128xf32>
    %116 = arith.negf %115 : vector<8x128xf32>
    %117 = math.exp %116 : vector<8x128xf32>
    %cst_42 = arith.constant 1.000000e+00 : f32
    %118 = vector.broadcast %cst_42 : f32 to vector<8x128xf32>
    %119 = arith.addf %118, %117 : vector<8x128xf32>
    %120 = arith.divf %118, %119 : vector<8x128xf32>
    %121 = math.tanh %115 : vector<8x128xf32>
    %122 = vector.extract_strided_slice %120 {offsets = [0, 0], sizes = [8, 32], strides = [1, 1]} : vector<8x128xf32> to vector<8x32xf32>
    %123 = vector.extract_strided_slice %120 {offsets = [0, 32], sizes = [8, 32], strides = [1, 1]} : vector<8x128xf32> to vector<8x32xf32>
    %124 = vector.extract_strided_slice %121 {offsets = [0, 64], sizes = [8, 32], strides = [1, 1]} : vector<8x128xf32> to vector<8x32xf32>
    %125 = vector.extract_strided_slice %120 {offsets = [0, 96], sizes = [8, 32], strides = [1, 1]} : vector<8x128xf32> to vector<8x32xf32>
    %126 = arith.mulf %123, %90 : vector<8x32xf32>
    %127 = arith.mulf %122, %124 : vector<8x32xf32>
    %128 = arith.addf %126, %127 : vector<8x32xf32>
    %129 = math.tanh %128 : vector<8x32xf32>
    %130 = arith.mulf %125, %129 : vector<8x32xf32>
    %c16_43 = arith.constant 16 : index
    %c0_44 = arith.constant 0 : index
    %131 = vector.load %arg18[%c16_43, %c0_44] : memref<128x32xf32, #tpu.memory_space<vmem>>, vector<8x32xf32>
    tpu.vector_store %arg18[%c16_43, %c0_44], %130 {strides = array<i32>} : memref<128x32xf32, #tpu.memory_space<vmem>>, vector<8x32xf32>,
    %cst_45 = arith.constant dense<0.000000e+00> : vector<8x128xf32>
    %132 = tpu.matmul %130, %10, %cst_45 {dimension_numbers = #tpu.dot_dimension_numbers<[1], [0], [0], [1], [0, 0, 1, 1], [], []>} : vector<8x32xf32>, vector<32x128xf32>, vector<8x128xf32> -> vector<8x128xf32>
    %133 = arith.addf %132, %13 : vector<8x128xf32>
    %c24 = arith.constant 24 : index
    %c0_46 = arith.constant 0 : index
    %134 = vector.load %arg17[%c24, %c0_46] : memref<128x128xf32, #tpu.memory_space<vmem>>, vector<8x128xf32>
    %cst_47 = arith.constant dense<0.000000e+00> : vector<8x128xf32>
    %135 = tpu.matmul %113, %8, %cst_47 {dimension_numbers = #tpu.dot_dimension_numbers<[1], [0], [0], [1], [0, 0, 1, 1], [], []>} : vector<8x32xf32>, vector<32x128xf32>, vector<8x128xf32> -> vector<8x128xf32>
    %136 = arith.addf %134, %135 : vector<8x128xf32>
    %137 = arith.negf %136 : vector<8x128xf32>
    %138 = math.exp %137 : vector<8x128xf32>
    %cst_48 = arith.constant 1.000000e+00 : f32
    %139 = vector.broadcast %cst_48 : f32 to vector<8x128xf32>
    %140 = arith.addf %139, %138 : vector<8x128xf32>
    %141 = arith.divf %139, %140 : vector<8x128xf32>
    %142 = math.tanh %136 : vector<8x128xf32>
    %143 = vector.extract_strided_slice %141 {offsets = [0, 0], sizes = [8, 32], strides = [1, 1]} : vector<8x128xf32> to vector<8x32xf32>
    %144 = vector.extract_strided_slice %141 {offsets = [0, 32], sizes = [8, 32], strides = [1, 1]} : vector<8x128xf32> to vector<8x32xf32>
    %145 = vector.extract_strided_slice %142 {offsets = [0, 64], sizes = [8, 32], strides = [1, 1]} : vector<8x128xf32> to vector<8x32xf32>
    %146 = vector.extract_strided_slice %141 {offsets = [0, 96], sizes = [8, 32], strides = [1, 1]} : vector<8x128xf32> to vector<8x32xf32>
    %147 = arith.mulf %144, %111 : vector<8x32xf32>
    %148 = arith.mulf %143, %145 : vector<8x32xf32>
    %149 = arith.addf %147, %148 : vector<8x32xf32>
    %150 = math.tanh %149 : vector<8x32xf32>
    %151 = arith.mulf %146, %150 : vector<8x32xf32>
    %cst_49 = arith.constant dense<0.000000e+00> : vector<8x128xf32>
    %152 = tpu.matmul %151, %9, %cst_49 {dimension_numbers = #tpu.dot_dimension_numbers<[1], [0], [0], [1], [0, 0, 1, 1], [], []>} : vector<8x32xf32>, vector<32x128xf32>, vector<8x128xf32> -> vector<8x128xf32>
    %153 = arith.addf %133, %152 : vector<8x128xf32>
    %154 = arith.negf %153 : vector<8x128xf32>
    %155 = math.exp %154 : vector<8x128xf32>
    %cst_50 = arith.constant 1.000000e+00 : f32
    %156 = vector.broadcast %cst_50 : f32 to vector<8x128xf32>
    %157 = arith.addf %156, %155 : vector<8x128xf32>
    %158 = arith.divf %156, %157 : vector<8x128xf32>
    %159 = math.tanh %153 : vector<8x128xf32>
    %160 = vector.extract_strided_slice %158 {offsets = [0, 0], sizes = [8, 32], strides = [1, 1]} : vector<8x128xf32> to vector<8x32xf32>
    %161 = vector.extract_strided_slice %158 {offsets = [0, 32], sizes = [8, 32], strides = [1, 1]} : vector<8x128xf32> to vector<8x32xf32>
    %162 = vector.extract_strided_slice %159 {offsets = [0, 64], sizes = [8, 32], strides = [1, 1]} : vector<8x128xf32> to vector<8x32xf32>
    %163 = vector.extract_strided_slice %158 {offsets = [0, 96], sizes = [8, 32], strides = [1, 1]} : vector<8x128xf32> to vector<8x32xf32>
    %164 = arith.mulf %161, %128 : vector<8x32xf32>
    %165 = arith.mulf %160, %162 : vector<8x32xf32>
    %166 = arith.addf %164, %165 : vector<8x32xf32>
    %167 = math.tanh %166 : vector<8x32xf32>
    %168 = arith.mulf %163, %167 : vector<8x32xf32>
    %c24_51 = arith.constant 24 : index
    %c0_52 = arith.constant 0 : index
    %169 = vector.load %arg18[%c24_51, %c0_52] : memref<128x32xf32, #tpu.memory_space<vmem>>, vector<8x32xf32>
    tpu.vector_store %arg18[%c24_51, %c0_52], %168 {strides = array<i32>} : memref<128x32xf32, #tpu.memory_space<vmem>>, vector<8x32xf32>,
    %cst_53 = arith.constant dense<0.000000e+00> : vector<8x128xf32>
    %170 = tpu.matmul %168, %10, %cst_53 {dimension_numbers = #tpu.dot_dimension_numbers<[1], [0], [0], [1], [0, 0, 1, 1], [], []>} : vector<8x32xf32>, vector<32x128xf32>, vector<8x128xf32> -> vector<8x128xf32>
    %171 = arith.addf %170, %13 : vector<8x128xf32>
    %c32 = arith.constant 32 : index
    %c0_54 = arith.constant 0 : index
    %172 = vector.load %arg17[%c32, %c0_54] : memref<128x128xf32, #tpu.memory_space<vmem>>, vector<8x128xf32>
    %cst_55 = arith.constant dense<0.000000e+00> : vector<8x128xf32>
    %173 = tpu.matmul %151, %8, %cst_55 {dimension_numbers = #tpu.dot_dimension_numbers<[1], [0], [0], [1], [0, 0, 1, 1], [], []>} : vector<8x32xf32>, vector<32x128xf32>, vector<8x128xf32> -> vector<8x128xf32>
    %174 = arith.addf %172, %173 : vector<8x128xf32>
    %175 = arith.negf %174 : vector<8x128xf32>
    %176 = math.exp %175 : vector<8x128xf32>
    %cst_56 = arith.constant 1.000000e+00 : f32
    %177 = vector.broadcast %cst_56 : f32 to vector<8x128xf32>
    %178 = arith.addf %177, %176 : vector<8x128xf32>
    %179 = arith.divf %177, %178 : vector<8x128xf32>
    %180 = math.tanh %174 : vector<8x128xf32>
    %181 = vector.extract_strided_slice %179 {offsets = [0, 0], sizes = [8, 32], strides = [1, 1]} : vector<8x128xf32> to vector<8x32xf32>
    %182 = vector.extract_strided_slice %179 {offsets = [0, 32], sizes = [8, 32], strides = [1, 1]} : vector<8x128xf32> to vector<8x32xf32>
    %183 = vector.extract_strided_slice %180 {offsets = [0, 64], sizes = [8, 32], strides = [1, 1]} : vector<8x128xf32> to vector<8x32xf32>
    %184 = vector.extract_strided_slice %179 {offsets = [0, 96], sizes = [8, 32], strides = [1, 1]} : vector<8x128xf32> to vector<8x32xf32>
    %185 = arith.mulf %182, %149 : vector<8x32xf32>
    %186 = arith.mulf %181, %183 : vector<8x32xf32>
    %187 = arith.addf %185, %186 : vector<8x32xf32>
    %188 = math.tanh %187 : vector<8x32xf32>
    %189 = arith.mulf %184, %188 : vector<8x32xf32>
    %cst_57 = arith.constant dense<0.000000e+00> : vector<8x128xf32>
    %190 = tpu.matmul %189, %9, %cst_57 {dimension_numbers = #tpu.dot_dimension_numbers<[1], [0], [0], [1], [0, 0, 1, 1], [], []>} : vector<8x32xf32>, vector<32x128xf32>, vector<8x128xf32> -> vector<8x128xf32>
    %191 = arith.addf %171, %190 : vector<8x128xf32>
    %192 = arith.negf %191 : vector<8x128xf32>
    %193 = math.exp %192 : vector<8x128xf32>
    %cst_58 = arith.constant 1.000000e+00 : f32
    %194 = vector.broadcast %cst_58 : f32 to vector<8x128xf32>
    %195 = arith.addf %194, %193 : vector<8x128xf32>
    %196 = arith.divf %194, %195 : vector<8x128xf32>
    %197 = math.tanh %191 : vector<8x128xf32>
    %198 = vector.extract_strided_slice %196 {offsets = [0, 0], sizes = [8, 32], strides = [1, 1]} : vector<8x128xf32> to vector<8x32xf32>
    %199 = vector.extract_strided_slice %196 {offsets = [0, 32], sizes = [8, 32], strides = [1, 1]} : vector<8x128xf32> to vector<8x32xf32>
    %200 = vector.extract_strided_slice %197 {offsets = [0, 64], sizes = [8, 32], strides = [1, 1]} : vector<8x128xf32> to vector<8x32xf32>
    %201 = vector.extract_strided_slice %196 {offsets = [0, 96], sizes = [8, 32], strides = [1, 1]} : vector<8x128xf32> to vector<8x32xf32>
    %202 = arith.mulf %199, %166 : vector<8x32xf32>
    %203 = arith.mulf %198, %200 : vector<8x32xf32>
    %204 = arith.addf %202, %203 : vector<8x32xf32>
    %205 = math.tanh %204 : vector<8x32xf32>
    %206 = arith.mulf %201, %205 : vector<8x32xf32>
    %c32_59 = arith.constant 32 : index
    %c0_60 = arith.constant 0 : index
    %207 = vector.load %arg18[%c32_59, %c0_60] : memref<128x32xf32, #tpu.memory_space<vmem>>, vector<8x32xf32>
    tpu.vector_store %arg18[%c32_59, %c0_60], %206 {strides = array<i32>} : memref<128x32xf32, #tpu.memory_space<vmem>>, vector<8x32xf32>,
    %cst_61 = arith.constant dense<0.000000e+00> : vector<8x128xf32>
    %208 = tpu.matmul %206, %10, %cst_61 {dimension_numbers = #tpu.dot_dimension_numbers<[1], [0], [0], [1], [0, 0, 1, 1], [], []>} : vector<8x32xf32>, vector<32x128xf32>, vector<8x128xf32> -> vector<8x128xf32>
    %209 = arith.addf %208, %13 : vector<8x128xf32>
    %c40 = arith.constant 40 : index
    %c0_62 = arith.constant 0 : index
    %210 = vector.load %arg17[%c40, %c0_62] : memref<128x128xf32, #tpu.memory_space<vmem>>, vector<8x128xf32>
    %cst_63 = arith.constant dense<0.000000e+00> : vector<8x128xf32>
    %211 = tpu.matmul %189, %8, %cst_63 {dimension_numbers = #tpu.dot_dimension_numbers<[1], [0], [0], [1], [0, 0, 1, 1], [], []>} : vector<8x32xf32>, vector<32x128xf32>, vector<8x128xf32> -> vector<8x128xf32>
    %212 = arith.addf %210, %211 : vector<8x128xf32>
    %213 = arith.negf %212 : vector<8x128xf32>
    %214 = math.exp %213 : vector<8x128xf32>
    %cst_64 = arith.constant 1.000000e+00 : f32
    %215 = vector.broadcast %cst_64 : f32 to vector<8x128xf32>
    %216 = arith.addf %215, %214 : vector<8x128xf32>
    %217 = arith.divf %215, %216 : vector<8x128xf32>
    %218 = math.tanh %212 : vector<8x128xf32>
    %219 = vector.extract_strided_slice %217 {offsets = [0, 0], sizes = [8, 32], strides = [1, 1]} : vector<8x128xf32> to vector<8x32xf32>
    %220 = vector.extract_strided_slice %217 {offsets = [0, 32], sizes = [8, 32], strides = [1, 1]} : vector<8x128xf32> to vector<8x32xf32>
    %221 = vector.extract_strided_slice %218 {offsets = [0, 64], sizes = [8, 32], strides = [1, 1]} : vector<8x128xf32> to vector<8x32xf32>
    %222 = vector.extract_strided_slice %217 {offsets = [0, 96], sizes = [8, 32], strides = [1, 1]} : vector<8x128xf32> to vector<8x32xf32>
    %223 = arith.mulf %220, %187 : vector<8x32xf32>
    %224 = arith.mulf %219, %221 : vector<8x32xf32>
    %225 = arith.addf %223, %224 : vector<8x32xf32>
    %226 = math.tanh %225 : vector<8x32xf32>
    %227 = arith.mulf %222, %226 : vector<8x32xf32>
    %cst_65 = arith.constant dense<0.000000e+00> : vector<8x128xf32>
    %228 = tpu.matmul %227, %9, %cst_65 {dimension_numbers = #tpu.dot_dimension_numbers<[1], [0], [0], [1], [0, 0, 1, 1], [], []>} : vector<8x32xf32>, vector<32x128xf32>, vector<8x128xf32> -> vector<8x128xf32>
    %229 = arith.addf %209, %228 : vector<8x128xf32>
    %230 = arith.negf %229 : vector<8x128xf32>
    %231 = math.exp %230 : vector<8x128xf32>
    %cst_66 = arith.constant 1.000000e+00 : f32
    %232 = vector.broadcast %cst_66 : f32 to vector<8x128xf32>
    %233 = arith.addf %232, %231 : vector<8x128xf32>
    %234 = arith.divf %232, %233 : vector<8x128xf32>
    %235 = math.tanh %229 : vector<8x128xf32>
    %236 = vector.extract_strided_slice %234 {offsets = [0, 0], sizes = [8, 32], strides = [1, 1]} : vector<8x128xf32> to vector<8x32xf32>
    %237 = vector.extract_strided_slice %234 {offsets = [0, 32], sizes = [8, 32], strides = [1, 1]} : vector<8x128xf32> to vector<8x32xf32>
    %238 = vector.extract_strided_slice %235 {offsets = [0, 64], sizes = [8, 32], strides = [1, 1]} : vector<8x128xf32> to vector<8x32xf32>
    %239 = vector.extract_strided_slice %234 {offsets = [0, 96], sizes = [8, 32], strides = [1, 1]} : vector<8x128xf32> to vector<8x32xf32>
    %240 = arith.mulf %237, %204 : vector<8x32xf32>
    %241 = arith.mulf %236, %238 : vector<8x32xf32>
    %242 = arith.addf %240, %241 : vector<8x32xf32>
    %243 = math.tanh %242 : vector<8x32xf32>
    %244 = arith.mulf %239, %243 : vector<8x32xf32>
    %c40_67 = arith.constant 40 : index
    %c0_68 = arith.constant 0 : index
    %245 = vector.load %arg18[%c40_67, %c0_68] : memref<128x32xf32, #tpu.memory_space<vmem>>, vector<8x32xf32>
    tpu.vector_store %arg18[%c40_67, %c0_68], %244 {strides = array<i32>} : memref<128x32xf32, #tpu.memory_space<vmem>>, vector<8x32xf32>,
    %cst_69 = arith.constant dense<0.000000e+00> : vector<8x128xf32>
    %246 = tpu.matmul %244, %10, %cst_69 {dimension_numbers = #tpu.dot_dimension_numbers<[1], [0], [0], [1], [0, 0, 1, 1], [], []>} : vector<8x32xf32>, vector<32x128xf32>, vector<8x128xf32> -> vector<8x128xf32>
    %247 = arith.addf %246, %13 : vector<8x128xf32>
    %c48 = arith.constant 48 : index
    %c0_70 = arith.constant 0 : index
    %248 = vector.load %arg17[%c48, %c0_70] : memref<128x128xf32, #tpu.memory_space<vmem>>, vector<8x128xf32>
    %cst_71 = arith.constant dense<0.000000e+00> : vector<8x128xf32>
    %249 = tpu.matmul %227, %8, %cst_71 {dimension_numbers = #tpu.dot_dimension_numbers<[1], [0], [0], [1], [0, 0, 1, 1], [], []>} : vector<8x32xf32>, vector<32x128xf32>, vector<8x128xf32> -> vector<8x128xf32>
    %250 = arith.addf %248, %249 : vector<8x128xf32>
    %251 = arith.negf %250 : vector<8x128xf32>
    %252 = math.exp %251 : vector<8x128xf32>
    %cst_72 = arith.constant 1.000000e+00 : f32
    %253 = vector.broadcast %cst_72 : f32 to vector<8x128xf32>
    %254 = arith.addf %253, %252 : vector<8x128xf32>
    %255 = arith.divf %253, %254 : vector<8x128xf32>
    %256 = math.tanh %250 : vector<8x128xf32>
    %257 = vector.extract_strided_slice %255 {offsets = [0, 0], sizes = [8, 32], strides = [1, 1]} : vector<8x128xf32> to vector<8x32xf32>
    %258 = vector.extract_strided_slice %255 {offsets = [0, 32], sizes = [8, 32], strides = [1, 1]} : vector<8x128xf32> to vector<8x32xf32>
    %259 = vector.extract_strided_slice %256 {offsets = [0, 64], sizes = [8, 32], strides = [1, 1]} : vector<8x128xf32> to vector<8x32xf32>
    %260 = vector.extract_strided_slice %255 {offsets = [0, 96], sizes = [8, 32], strides = [1, 1]} : vector<8x128xf32> to vector<8x32xf32>
    %261 = arith.mulf %258, %225 : vector<8x32xf32>
    %262 = arith.mulf %257, %259 : vector<8x32xf32>
    %263 = arith.addf %261, %262 : vector<8x32xf32>
    %264 = math.tanh %263 : vector<8x32xf32>
    %265 = arith.mulf %260, %264 : vector<8x32xf32>
    %cst_73 = arith.constant dense<0.000000e+00> : vector<8x128xf32>
    %266 = tpu.matmul %265, %9, %cst_73 {dimension_numbers = #tpu.dot_dimension_numbers<[1], [0], [0], [1], [0, 0, 1, 1], [], []>} : vector<8x32xf32>, vector<32x128xf32>, vector<8x128xf32> -> vector<8x128xf32>
    %267 = arith.addf %247, %266 : vector<8x128xf32>
    %268 = arith.negf %267 : vector<8x128xf32>
    %269 = math.exp %268 : vector<8x128xf32>
    %cst_74 = arith.constant 1.000000e+00 : f32
    %270 = vector.broadcast %cst_74 : f32 to vector<8x128xf32>
    %271 = arith.addf %270, %269 : vector<8x128xf32>
    %272 = arith.divf %270, %271 : vector<8x128xf32>
    %273 = math.tanh %267 : vector<8x128xf32>
    %274 = vector.extract_strided_slice %272 {offsets = [0, 0], sizes = [8, 32], strides = [1, 1]} : vector<8x128xf32> to vector<8x32xf32>
    %275 = vector.extract_strided_slice %272 {offsets = [0, 32], sizes = [8, 32], strides = [1, 1]} : vector<8x128xf32> to vector<8x32xf32>
    %276 = vector.extract_strided_slice %273 {offsets = [0, 64], sizes = [8, 32], strides = [1, 1]} : vector<8x128xf32> to vector<8x32xf32>
    %277 = vector.extract_strided_slice %272 {offsets = [0, 96], sizes = [8, 32], strides = [1, 1]} : vector<8x128xf32> to vector<8x32xf32>
    %278 = arith.mulf %275, %242 : vector<8x32xf32>
    %279 = arith.mulf %274, %276 : vector<8x32xf32>
    %280 = arith.addf %278, %279 : vector<8x32xf32>
    %281 = math.tanh %280 : vector<8x32xf32>
    %282 = arith.mulf %277, %281 : vector<8x32xf32>
    %c48_75 = arith.constant 48 : index
    %c0_76 = arith.constant 0 : index
    %283 = vector.load %arg18[%c48_75, %c0_76] : memref<128x32xf32, #tpu.memory_space<vmem>>, vector<8x32xf32>
    tpu.vector_store %arg18[%c48_75, %c0_76], %282 {strides = array<i32>} : memref<128x32xf32, #tpu.memory_space<vmem>>, vector<8x32xf32>,
    %cst_77 = arith.constant dense<0.000000e+00> : vector<8x128xf32>
    %284 = tpu.matmul %282, %10, %cst_77 {dimension_numbers = #tpu.dot_dimension_numbers<[1], [0], [0], [1], [0, 0, 1, 1], [], []>} : vector<8x32xf32>, vector<32x128xf32>, vector<8x128xf32> -> vector<8x128xf32>
    %285 = arith.addf %284, %13 : vector<8x128xf32>
    %c56 = arith.constant 56 : index
    %c0_78 = arith.constant 0 : index
    %286 = vector.load %arg17[%c56, %c0_78] : memref<128x128xf32, #tpu.memory_space<vmem>>, vector<8x128xf32>
    %cst_79 = arith.constant dense<0.000000e+00> : vector<8x128xf32>
    %287 = tpu.matmul %265, %8, %cst_79 {dimension_numbers = #tpu.dot_dimension_numbers<[1], [0], [0], [1], [0, 0, 1, 1], [], []>} : vector<8x32xf32>, vector<32x128xf32>, vector<8x128xf32> -> vector<8x128xf32>
    %288 = arith.addf %286, %287 : vector<8x128xf32>
    %289 = arith.negf %288 : vector<8x128xf32>
    %290 = math.exp %289 : vector<8x128xf32>
    %cst_80 = arith.constant 1.000000e+00 : f32
    %291 = vector.broadcast %cst_80 : f32 to vector<8x128xf32>
    %292 = arith.addf %291, %290 : vector<8x128xf32>
    %293 = arith.divf %291, %292 : vector<8x128xf32>
    %294 = math.tanh %288 : vector<8x128xf32>
    %295 = vector.extract_strided_slice %293 {offsets = [0, 0], sizes = [8, 32], strides = [1, 1]} : vector<8x128xf32> to vector<8x32xf32>
    %296 = vector.extract_strided_slice %293 {offsets = [0, 32], sizes = [8, 32], strides = [1, 1]} : vector<8x128xf32> to vector<8x32xf32>
    %297 = vector.extract_strided_slice %294 {offsets = [0, 64], sizes = [8, 32], strides = [1, 1]} : vector<8x128xf32> to vector<8x32xf32>
    %298 = vector.extract_strided_slice %293 {offsets = [0, 96], sizes = [8, 32], strides = [1, 1]} : vector<8x128xf32> to vector<8x32xf32>
    %299 = arith.mulf %296, %263 : vector<8x32xf32>
    %300 = arith.mulf %295, %297 : vector<8x32xf32>
    %301 = arith.addf %299, %300 : vector<8x32xf32>
    %302 = math.tanh %301 : vector<8x32xf32>
    %303 = arith.mulf %298, %302 : vector<8x32xf32>
    %cst_81 = arith.constant dense<0.000000e+00> : vector<8x128xf32>
    %304 = tpu.matmul %303, %9, %cst_81 {dimension_numbers = #tpu.dot_dimension_numbers<[1], [0], [0], [1], [0, 0, 1, 1], [], []>} : vector<8x32xf32>, vector<32x128xf32>, vector<8x128xf32> -> vector<8x128xf32>
    %305 = arith.addf %285, %304 : vector<8x128xf32>
    %306 = arith.negf %305 : vector<8x128xf32>
    %307 = math.exp %306 : vector<8x128xf32>
    %cst_82 = arith.constant 1.000000e+00 : f32
    %308 = vector.broadcast %cst_82 : f32 to vector<8x128xf32>
    %309 = arith.addf %308, %307 : vector<8x128xf32>
    %310 = arith.divf %308, %309 : vector<8x128xf32>
    %311 = math.tanh %305 : vector<8x128xf32>
    %312 = vector.extract_strided_slice %310 {offsets = [0, 0], sizes = [8, 32], strides = [1, 1]} : vector<8x128xf32> to vector<8x32xf32>
    %313 = vector.extract_strided_slice %310 {offsets = [0, 32], sizes = [8, 32], strides = [1, 1]} : vector<8x128xf32> to vector<8x32xf32>
    %314 = vector.extract_strided_slice %311 {offsets = [0, 64], sizes = [8, 32], strides = [1, 1]} : vector<8x128xf32> to vector<8x32xf32>
    %315 = vector.extract_strided_slice %310 {offsets = [0, 96], sizes = [8, 32], strides = [1, 1]} : vector<8x128xf32> to vector<8x32xf32>
    %316 = arith.mulf %313, %280 : vector<8x32xf32>
    %317 = arith.mulf %312, %314 : vector<8x32xf32>
    %318 = arith.addf %316, %317 : vector<8x32xf32>
    %319 = math.tanh %318 : vector<8x32xf32>
    %320 = arith.mulf %315, %319 : vector<8x32xf32>
    %c56_83 = arith.constant 56 : index
    %c0_84 = arith.constant 0 : index
    %321 = vector.load %arg18[%c56_83, %c0_84] : memref<128x32xf32, #tpu.memory_space<vmem>>, vector<8x32xf32>
    tpu.vector_store %arg18[%c56_83, %c0_84], %320 {strides = array<i32>} : memref<128x32xf32, #tpu.memory_space<vmem>>, vector<8x32xf32>,
    %cst_85 = arith.constant dense<0.000000e+00> : vector<8x128xf32>
    %322 = tpu.matmul %320, %10, %cst_85 {dimension_numbers = #tpu.dot_dimension_numbers<[1], [0], [0], [1], [0, 0, 1, 1], [], []>} : vector<8x32xf32>, vector<32x128xf32>, vector<8x128xf32> -> vector<8x128xf32>
    %323 = arith.addf %322, %13 : vector<8x128xf32>
    %c64 = arith.constant 64 : index
    %c0_86 = arith.constant 0 : index
    %324 = vector.load %arg17[%c64, %c0_86] : memref<128x128xf32, #tpu.memory_space<vmem>>, vector<8x128xf32>
    %cst_87 = arith.constant dense<0.000000e+00> : vector<8x128xf32>
    %325 = tpu.matmul %303, %8, %cst_87 {dimension_numbers = #tpu.dot_dimension_numbers<[1], [0], [0], [1], [0, 0, 1, 1], [], []>} : vector<8x32xf32>, vector<32x128xf32>, vector<8x128xf32> -> vector<8x128xf32>
    %326 = arith.addf %324, %325 : vector<8x128xf32>
    %327 = arith.negf %326 : vector<8x128xf32>
    %328 = math.exp %327 : vector<8x128xf32>
    %cst_88 = arith.constant 1.000000e+00 : f32
    %329 = vector.broadcast %cst_88 : f32 to vector<8x128xf32>
    %330 = arith.addf %329, %328 : vector<8x128xf32>
    %331 = arith.divf %329, %330 : vector<8x128xf32>
    %332 = math.tanh %326 : vector<8x128xf32>
    %333 = vector.extract_strided_slice %331 {offsets = [0, 0], sizes = [8, 32], strides = [1, 1]} : vector<8x128xf32> to vector<8x32xf32>
    %334 = vector.extract_strided_slice %331 {offsets = [0, 32], sizes = [8, 32], strides = [1, 1]} : vector<8x128xf32> to vector<8x32xf32>
    %335 = vector.extract_strided_slice %332 {offsets = [0, 64], sizes = [8, 32], strides = [1, 1]} : vector<8x128xf32> to vector<8x32xf32>
    %336 = vector.extract_strided_slice %331 {offsets = [0, 96], sizes = [8, 32], strides = [1, 1]} : vector<8x128xf32> to vector<8x32xf32>
    %337 = arith.mulf %334, %301 : vector<8x32xf32>
    %338 = arith.mulf %333, %335 : vector<8x32xf32>
    %339 = arith.addf %337, %338 : vector<8x32xf32>
    %340 = math.tanh %339 : vector<8x32xf32>
    %341 = arith.mulf %336, %340 : vector<8x32xf32>
    %cst_89 = arith.constant dense<0.000000e+00> : vector<8x128xf32>
    %342 = tpu.matmul %341, %9, %cst_89 {dimension_numbers = #tpu.dot_dimension_numbers<[1], [0], [0], [1], [0, 0, 1, 1], [], []>} : vector<8x32xf32>, vector<32x128xf32>, vector<8x128xf32> -> vector<8x128xf32>
    %343 = arith.addf %323, %342 : vector<8x128xf32>
    %344 = arith.negf %343 : vector<8x128xf32>
    %345 = math.exp %344 : vector<8x128xf32>
    %cst_90 = arith.constant 1.000000e+00 : f32
    %346 = vector.broadcast %cst_90 : f32 to vector<8x128xf32>
    %347 = arith.addf %346, %345 : vector<8x128xf32>
    %348 = arith.divf %346, %347 : vector<8x128xf32>
    %349 = math.tanh %343 : vector<8x128xf32>
    %350 = vector.extract_strided_slice %348 {offsets = [0, 0], sizes = [8, 32], strides = [1, 1]} : vector<8x128xf32> to vector<8x32xf32>
    %351 = vector.extract_strided_slice %348 {offsets = [0, 32], sizes = [8, 32], strides = [1, 1]} : vector<8x128xf32> to vector<8x32xf32>
    %352 = vector.extract_strided_slice %349 {offsets = [0, 64], sizes = [8, 32], strides = [1, 1]} : vector<8x128xf32> to vector<8x32xf32>
    %353 = vector.extract_strided_slice %348 {offsets = [0, 96], sizes = [8, 32], strides = [1, 1]} : vector<8x128xf32> to vector<8x32xf32>
    %354 = arith.mulf %351, %318 : vector<8x32xf32>
    %355 = arith.mulf %350, %352 : vector<8x32xf32>
    %356 = arith.addf %354, %355 : vector<8x32xf32>
    %357 = math.tanh %356 : vector<8x32xf32>
    %358 = arith.mulf %353, %357 : vector<8x32xf32>
    %c64_91 = arith.constant 64 : index
    %c0_92 = arith.constant 0 : index
    %359 = vector.load %arg18[%c64_91, %c0_92] : memref<128x32xf32, #tpu.memory_space<vmem>>, vector<8x32xf32>
    tpu.vector_store %arg18[%c64_91, %c0_92], %358 {strides = array<i32>} : memref<128x32xf32, #tpu.memory_space<vmem>>, vector<8x32xf32>,
    %cst_93 = arith.constant dense<0.000000e+00> : vector<8x128xf32>
    %360 = tpu.matmul %358, %10, %cst_93 {dimension_numbers = #tpu.dot_dimension_numbers<[1], [0], [0], [1], [0, 0, 1, 1], [], []>} : vector<8x32xf32>, vector<32x128xf32>, vector<8x128xf32> -> vector<8x128xf32>
    %361 = arith.addf %360, %13 : vector<8x128xf32>
    %c72 = arith.constant 72 : index
    %c0_94 = arith.constant 0 : index
    %362 = vector.load %arg17[%c72, %c0_94] : memref<128x128xf32, #tpu.memory_space<vmem>>, vector<8x128xf32>
    %cst_95 = arith.constant dense<0.000000e+00> : vector<8x128xf32>
    %363 = tpu.matmul %341, %8, %cst_95 {dimension_numbers = #tpu.dot_dimension_numbers<[1], [0], [0], [1], [0, 0, 1, 1], [], []>} : vector<8x32xf32>, vector<32x128xf32>, vector<8x128xf32> -> vector<8x128xf32>
    %364 = arith.addf %362, %363 : vector<8x128xf32>
    %365 = arith.negf %364 : vector<8x128xf32>
    %366 = math.exp %365 : vector<8x128xf32>
    %cst_96 = arith.constant 1.000000e+00 : f32
    %367 = vector.broadcast %cst_96 : f32 to vector<8x128xf32>
    %368 = arith.addf %367, %366 : vector<8x128xf32>
    %369 = arith.divf %367, %368 : vector<8x128xf32>
    %370 = math.tanh %364 : vector<8x128xf32>
    %371 = vector.extract_strided_slice %369 {offsets = [0, 0], sizes = [8, 32], strides = [1, 1]} : vector<8x128xf32> to vector<8x32xf32>
    %372 = vector.extract_strided_slice %369 {offsets = [0, 32], sizes = [8, 32], strides = [1, 1]} : vector<8x128xf32> to vector<8x32xf32>
    %373 = vector.extract_strided_slice %370 {offsets = [0, 64], sizes = [8, 32], strides = [1, 1]} : vector<8x128xf32> to vector<8x32xf32>
    %374 = vector.extract_strided_slice %369 {offsets = [0, 96], sizes = [8, 32], strides = [1, 1]} : vector<8x128xf32> to vector<8x32xf32>
    %375 = arith.mulf %372, %339 : vector<8x32xf32>
    %376 = arith.mulf %371, %373 : vector<8x32xf32>
    %377 = arith.addf %375, %376 : vector<8x32xf32>
    %378 = math.tanh %377 : vector<8x32xf32>
    %379 = arith.mulf %374, %378 : vector<8x32xf32>
    %cst_97 = arith.constant dense<0.000000e+00> : vector<8x128xf32>
    %380 = tpu.matmul %379, %9, %cst_97 {dimension_numbers = #tpu.dot_dimension_numbers<[1], [0], [0], [1], [0, 0, 1, 1], [], []>} : vector<8x32xf32>, vector<32x128xf32>, vector<8x128xf32> -> vector<8x128xf32>
    %381 = arith.addf %361, %380 : vector<8x128xf32>
    %382 = arith.negf %381 : vector<8x128xf32>
    %383 = math.exp %382 : vector<8x128xf32>
    %cst_98 = arith.constant 1.000000e+00 : f32
    %384 = vector.broadcast %cst_98 : f32 to vector<8x128xf32>
    %385 = arith.addf %384, %383 : vector<8x128xf32>
    %386 = arith.divf %384, %385 : vector<8x128xf32>
    %387 = math.tanh %381 : vector<8x128xf32>
    %388 = vector.extract_strided_slice %386 {offsets = [0, 0], sizes = [8, 32], strides = [1, 1]} : vector<8x128xf32> to vector<8x32xf32>
    %389 = vector.extract_strided_slice %386 {offsets = [0, 32], sizes = [8, 32], strides = [1, 1]} : vector<8x128xf32> to vector<8x32xf32>
    %390 = vector.extract_strided_slice %387 {offsets = [0, 64], sizes = [8, 32], strides = [1, 1]} : vector<8x128xf32> to vector<8x32xf32>
    %391 = vector.extract_strided_slice %386 {offsets = [0, 96], sizes = [8, 32], strides = [1, 1]} : vector<8x128xf32> to vector<8x32xf32>
    %392 = arith.mulf %389, %356 : vector<8x32xf32>
    %393 = arith.mulf %388, %390 : vector<8x32xf32>
    %394 = arith.addf %392, %393 : vector<8x32xf32>
    %395 = math.tanh %394 : vector<8x32xf32>
    %396 = arith.mulf %391, %395 : vector<8x32xf32>
    %c72_99 = arith.constant 72 : index
    %c0_100 = arith.constant 0 : index
    %397 = vector.load %arg18[%c72_99, %c0_100] : memref<128x32xf32, #tpu.memory_space<vmem>>, vector<8x32xf32>
    tpu.vector_store %arg18[%c72_99, %c0_100], %396 {strides = array<i32>} : memref<128x32xf32, #tpu.memory_space<vmem>>, vector<8x32xf32>,
    %cst_101 = arith.constant dense<0.000000e+00> : vector<8x128xf32>
    %398 = tpu.matmul %396, %10, %cst_101 {dimension_numbers = #tpu.dot_dimension_numbers<[1], [0], [0], [1], [0, 0, 1, 1], [], []>} : vector<8x32xf32>, vector<32x128xf32>, vector<8x128xf32> -> vector<8x128xf32>
    %399 = arith.addf %398, %13 : vector<8x128xf32>
    %c80 = arith.constant 80 : index
    %c0_102 = arith.constant 0 : index
    %400 = vector.load %arg17[%c80, %c0_102] : memref<128x128xf32, #tpu.memory_space<vmem>>, vector<8x128xf32>
    %cst_103 = arith.constant dense<0.000000e+00> : vector<8x128xf32>
    %401 = tpu.matmul %379, %8, %cst_103 {dimension_numbers = #tpu.dot_dimension_numbers<[1], [0], [0], [1], [0, 0, 1, 1], [], []>} : vector<8x32xf32>, vector<32x128xf32>, vector<8x128xf32> -> vector<8x128xf32>
    %402 = arith.addf %400, %401 : vector<8x128xf32>
    %403 = arith.negf %402 : vector<8x128xf32>
    %404 = math.exp %403 : vector<8x128xf32>
    %cst_104 = arith.constant 1.000000e+00 : f32
    %405 = vector.broadcast %cst_104 : f32 to vector<8x128xf32>
    %406 = arith.addf %405, %404 : vector<8x128xf32>
    %407 = arith.divf %405, %406 : vector<8x128xf32>
    %408 = math.tanh %402 : vector<8x128xf32>
    %409 = vector.extract_strided_slice %407 {offsets = [0, 0], sizes = [8, 32], strides = [1, 1]} : vector<8x128xf32> to vector<8x32xf32>
    %410 = vector.extract_strided_slice %407 {offsets = [0, 32], sizes = [8, 32], strides = [1, 1]} : vector<8x128xf32> to vector<8x32xf32>
    %411 = vector.extract_strided_slice %408 {offsets = [0, 64], sizes = [8, 32], strides = [1, 1]} : vector<8x128xf32> to vector<8x32xf32>
    %412 = vector.extract_strided_slice %407 {offsets = [0, 96], sizes = [8, 32], strides = [1, 1]} : vector<8x128xf32> to vector<8x32xf32>
    %413 = arith.mulf %410, %377 : vector<8x32xf32>
    %414 = arith.mulf %409, %411 : vector<8x32xf32>
    %415 = arith.addf %413, %414 : vector<8x32xf32>
    %416 = math.tanh %415 : vector<8x32xf32>
    %417 = arith.mulf %412, %416 : vector<8x32xf32>
    %cst_105 = arith.constant dense<0.000000e+00> : vector<8x128xf32>
    %418 = tpu.matmul %417, %9, %cst_105 {dimension_numbers = #tpu.dot_dimension_numbers<[1], [0], [0], [1], [0, 0, 1, 1], [], []>} : vector<8x32xf32>, vector<32x128xf32>, vector<8x128xf32> -> vector<8x128xf32>
    %419 = arith.addf %399, %418 : vector<8x128xf32>
    %420 = arith.negf %419 : vector<8x128xf32>
    %421 = math.exp %420 : vector<8x128xf32>
    %cst_106 = arith.constant 1.000000e+00 : f32
    %422 = vector.broadcast %cst_106 : f32 to vector<8x128xf32>
    %423 = arith.addf %422, %421 : vector<8x128xf32>
    %424 = arith.divf %422, %423 : vector<8x128xf32>
    %425 = math.tanh %419 : vector<8x128xf32>
    %426 = vector.extract_strided_slice %424 {offsets = [0, 0], sizes = [8, 32], strides = [1, 1]} : vector<8x128xf32> to vector<8x32xf32>
    %427 = vector.extract_strided_slice %424 {offsets = [0, 32], sizes = [8, 32], strides = [1, 1]} : vector<8x128xf32> to vector<8x32xf32>
    %428 = vector.extract_strided_slice %425 {offsets = [0, 64], sizes = [8, 32], strides = [1, 1]} : vector<8x128xf32> to vector<8x32xf32>
    %429 = vector.extract_strided_slice %424 {offsets = [0, 96], sizes = [8, 32], strides = [1, 1]} : vector<8x128xf32> to vector<8x32xf32>
    %430 = arith.mulf %427, %394 : vector<8x32xf32>
    %431 = arith.mulf %426, %428 : vector<8x32xf32>
    %432 = arith.addf %430, %431 : vector<8x32xf32>
    %433 = math.tanh %432 : vector<8x32xf32>
    %434 = arith.mulf %429, %433 : vector<8x32xf32>
    %c80_107 = arith.constant 80 : index
    %c0_108 = arith.constant 0 : index
    %435 = vector.load %arg18[%c80_107, %c0_108] : memref<128x32xf32, #tpu.memory_space<vmem>>, vector<8x32xf32>
    tpu.vector_store %arg18[%c80_107, %c0_108], %434 {strides = array<i32>} : memref<128x32xf32, #tpu.memory_space<vmem>>, vector<8x32xf32>,
    %cst_109 = arith.constant dense<0.000000e+00> : vector<8x128xf32>
    %436 = tpu.matmul %434, %10, %cst_109 {dimension_numbers = #tpu.dot_dimension_numbers<[1], [0], [0], [1], [0, 0, 1, 1], [], []>} : vector<8x32xf32>, vector<32x128xf32>, vector<8x128xf32> -> vector<8x128xf32>
    %437 = arith.addf %436, %13 : vector<8x128xf32>
    %c88 = arith.constant 88 : index
    %c0_110 = arith.constant 0 : index
    %438 = vector.load %arg17[%c88, %c0_110] : memref<128x128xf32, #tpu.memory_space<vmem>>, vector<8x128xf32>
    %cst_111 = arith.constant dense<0.000000e+00> : vector<8x128xf32>
    %439 = tpu.matmul %417, %8, %cst_111 {dimension_numbers = #tpu.dot_dimension_numbers<[1], [0], [0], [1], [0, 0, 1, 1], [], []>} : vector<8x32xf32>, vector<32x128xf32>, vector<8x128xf32> -> vector<8x128xf32>
    %440 = arith.addf %438, %439 : vector<8x128xf32>
    %441 = arith.negf %440 : vector<8x128xf32>
    %442 = math.exp %441 : vector<8x128xf32>
    %cst_112 = arith.constant 1.000000e+00 : f32
    %443 = vector.broadcast %cst_112 : f32 to vector<8x128xf32>
    %444 = arith.addf %443, %442 : vector<8x128xf32>
    %445 = arith.divf %443, %444 : vector<8x128xf32>
    %446 = math.tanh %440 : vector<8x128xf32>
    %447 = vector.extract_strided_slice %445 {offsets = [0, 0], sizes = [8, 32], strides = [1, 1]} : vector<8x128xf32> to vector<8x32xf32>
    %448 = vector.extract_strided_slice %445 {offsets = [0, 32], sizes = [8, 32], strides = [1, 1]} : vector<8x128xf32> to vector<8x32xf32>
    %449 = vector.extract_strided_slice %446 {offsets = [0, 64], sizes = [8, 32], strides = [1, 1]} : vector<8x128xf32> to vector<8x32xf32>
    %450 = vector.extract_strided_slice %445 {offsets = [0, 96], sizes = [8, 32], strides = [1, 1]} : vector<8x128xf32> to vector<8x32xf32>
    %451 = arith.mulf %448, %415 : vector<8x32xf32>
    %452 = arith.mulf %447, %449 : vector<8x32xf32>
    %453 = arith.addf %451, %452 : vector<8x32xf32>
    %454 = math.tanh %453 : vector<8x32xf32>
    %455 = arith.mulf %450, %454 : vector<8x32xf32>
    %cst_113 = arith.constant dense<0.000000e+00> : vector<8x128xf32>
    %456 = tpu.matmul %455, %9, %cst_113 {dimension_numbers = #tpu.dot_dimension_numbers<[1], [0], [0], [1], [0, 0, 1, 1], [], []>} : vector<8x32xf32>, vector<32x128xf32>, vector<8x128xf32> -> vector<8x128xf32>
    %457 = arith.addf %437, %456 : vector<8x128xf32>
    %458 = arith.negf %457 : vector<8x128xf32>
    %459 = math.exp %458 : vector<8x128xf32>
    %cst_114 = arith.constant 1.000000e+00 : f32
    %460 = vector.broadcast %cst_114 : f32 to vector<8x128xf32>
    %461 = arith.addf %460, %459 : vector<8x128xf32>
    %462 = arith.divf %460, %461 : vector<8x128xf32>
    %463 = math.tanh %457 : vector<8x128xf32>
    %464 = vector.extract_strided_slice %462 {offsets = [0, 0], sizes = [8, 32], strides = [1, 1]} : vector<8x128xf32> to vector<8x32xf32>
    %465 = vector.extract_strided_slice %462 {offsets = [0, 32], sizes = [8, 32], strides = [1, 1]} : vector<8x128xf32> to vector<8x32xf32>
    %466 = vector.extract_strided_slice %463 {offsets = [0, 64], sizes = [8, 32], strides = [1, 1]} : vector<8x128xf32> to vector<8x32xf32>
    %467 = vector.extract_strided_slice %462 {offsets = [0, 96], sizes = [8, 32], strides = [1, 1]} : vector<8x128xf32> to vector<8x32xf32>
    %468 = arith.mulf %465, %432 : vector<8x32xf32>
    %469 = arith.mulf %464, %466 : vector<8x32xf32>
    %470 = arith.addf %468, %469 : vector<8x32xf32>
    %471 = math.tanh %470 : vector<8x32xf32>
    %472 = arith.mulf %467, %471 : vector<8x32xf32>
    %c88_115 = arith.constant 88 : index
    %c0_116 = arith.constant 0 : index
    %473 = vector.load %arg18[%c88_115, %c0_116] : memref<128x32xf32, #tpu.memory_space<vmem>>, vector<8x32xf32>
    tpu.vector_store %arg18[%c88_115, %c0_116], %472 {strides = array<i32>} : memref<128x32xf32, #tpu.memory_space<vmem>>, vector<8x32xf32>,
    %cst_117 = arith.constant dense<0.000000e+00> : vector<8x128xf32>
    %474 = tpu.matmul %472, %10, %cst_117 {dimension_numbers = #tpu.dot_dimension_numbers<[1], [0], [0], [1], [0, 0, 1, 1], [], []>} : vector<8x32xf32>, vector<32x128xf32>, vector<8x128xf32> -> vector<8x128xf32>
    %475 = arith.addf %474, %13 : vector<8x128xf32>
    %c96 = arith.constant 96 : index
    %c0_118 = arith.constant 0 : index
    %476 = vector.load %arg17[%c96, %c0_118] : memref<128x128xf32, #tpu.memory_space<vmem>>, vector<8x128xf32>
    %cst_119 = arith.constant dense<0.000000e+00> : vector<8x128xf32>
    %477 = tpu.matmul %455, %8, %cst_119 {dimension_numbers = #tpu.dot_dimension_numbers<[1], [0], [0], [1], [0, 0, 1, 1], [], []>} : vector<8x32xf32>, vector<32x128xf32>, vector<8x128xf32> -> vector<8x128xf32>
    %478 = arith.addf %476, %477 : vector<8x128xf32>
    %479 = arith.negf %478 : vector<8x128xf32>
    %480 = math.exp %479 : vector<8x128xf32>
    %cst_120 = arith.constant 1.000000e+00 : f32
    %481 = vector.broadcast %cst_120 : f32 to vector<8x128xf32>
    %482 = arith.addf %481, %480 : vector<8x128xf32>
    %483 = arith.divf %481, %482 : vector<8x128xf32>
    %484 = math.tanh %478 : vector<8x128xf32>
    %485 = vector.extract_strided_slice %483 {offsets = [0, 0], sizes = [8, 32], strides = [1, 1]} : vector<8x128xf32> to vector<8x32xf32>
    %486 = vector.extract_strided_slice %483 {offsets = [0, 32], sizes = [8, 32], strides = [1, 1]} : vector<8x128xf32> to vector<8x32xf32>
    %487 = vector.extract_strided_slice %484 {offsets = [0, 64], sizes = [8, 32], strides = [1, 1]} : vector<8x128xf32> to vector<8x32xf32>
    %488 = vector.extract_strided_slice %483 {offsets = [0, 96], sizes = [8, 32], strides = [1, 1]} : vector<8x128xf32> to vector<8x32xf32>
    %489 = arith.mulf %486, %453 : vector<8x32xf32>
    %490 = arith.mulf %485, %487 : vector<8x32xf32>
    %491 = arith.addf %489, %490 : vector<8x32xf32>
    %492 = math.tanh %491 : vector<8x32xf32>
    %493 = arith.mulf %488, %492 : vector<8x32xf32>
    %cst_121 = arith.constant dense<0.000000e+00> : vector<8x128xf32>
    %494 = tpu.matmul %493, %9, %cst_121 {dimension_numbers = #tpu.dot_dimension_numbers<[1], [0], [0], [1], [0, 0, 1, 1], [], []>} : vector<8x32xf32>, vector<32x128xf32>, vector<8x128xf32> -> vector<8x128xf32>
    %495 = arith.addf %475, %494 : vector<8x128xf32>
    %496 = arith.negf %495 : vector<8x128xf32>
    %497 = math.exp %496 : vector<8x128xf32>
    %cst_122 = arith.constant 1.000000e+00 : f32
    %498 = vector.broadcast %cst_122 : f32 to vector<8x128xf32>
    %499 = arith.addf %498, %497 : vector<8x128xf32>
    %500 = arith.divf %498, %499 : vector<8x128xf32>
    %501 = math.tanh %495 : vector<8x128xf32>
    %502 = vector.extract_strided_slice %500 {offsets = [0, 0], sizes = [8, 32], strides = [1, 1]} : vector<8x128xf32> to vector<8x32xf32>
    %503 = vector.extract_strided_slice %500 {offsets = [0, 32], sizes = [8, 32], strides = [1, 1]} : vector<8x128xf32> to vector<8x32xf32>
    %504 = vector.extract_strided_slice %501 {offsets = [0, 64], sizes = [8, 32], strides = [1, 1]} : vector<8x128xf32> to vector<8x32xf32>
    %505 = vector.extract_strided_slice %500 {offsets = [0, 96], sizes = [8, 32], strides = [1, 1]} : vector<8x128xf32> to vector<8x32xf32>
    %506 = arith.mulf %503, %470 : vector<8x32xf32>
    %507 = arith.mulf %502, %504 : vector<8x32xf32>
    %508 = arith.addf %506, %507 : vector<8x32xf32>
    %509 = math.tanh %508 : vector<8x32xf32>
    %510 = arith.mulf %505, %509 : vector<8x32xf32>
    %c96_123 = arith.constant 96 : index
    %c0_124 = arith.constant 0 : index
    %511 = vector.load %arg18[%c96_123, %c0_124] : memref<128x32xf32, #tpu.memory_space<vmem>>, vector<8x32xf32>
    tpu.vector_store %arg18[%c96_123, %c0_124], %510 {strides = array<i32>} : memref<128x32xf32, #tpu.memory_space<vmem>>, vector<8x32xf32>,
    %cst_125 = arith.constant dense<0.000000e+00> : vector<8x128xf32>
    %512 = tpu.matmul %510, %10, %cst_125 {dimension_numbers = #tpu.dot_dimension_numbers<[1], [0], [0], [1], [0, 0, 1, 1], [], []>} : vector<8x32xf32>, vector<32x128xf32>, vector<8x128xf32> -> vector<8x128xf32>
    %513 = arith.addf %512, %13 : vector<8x128xf32>
    %c104 = arith.constant 104 : index
    %c0_126 = arith.constant 0 : index
    %514 = vector.load %arg17[%c104, %c0_126] : memref<128x128xf32, #tpu.memory_space<vmem>>, vector<8x128xf32>
    %cst_127 = arith.constant dense<0.000000e+00> : vector<8x128xf32>
    %515 = tpu.matmul %493, %8, %cst_127 {dimension_numbers = #tpu.dot_dimension_numbers<[1], [0], [0], [1], [0, 0, 1, 1], [], []>} : vector<8x32xf32>, vector<32x128xf32>, vector<8x128xf32> -> vector<8x128xf32>
    %516 = arith.addf %514, %515 : vector<8x128xf32>
    %517 = arith.negf %516 : vector<8x128xf32>
    %518 = math.exp %517 : vector<8x128xf32>
    %cst_128 = arith.constant 1.000000e+00 : f32
    %519 = vector.broadcast %cst_128 : f32 to vector<8x128xf32>
    %520 = arith.addf %519, %518 : vector<8x128xf32>
    %521 = arith.divf %519, %520 : vector<8x128xf32>
    %522 = math.tanh %516 : vector<8x128xf32>
    %523 = vector.extract_strided_slice %521 {offsets = [0, 0], sizes = [8, 32], strides = [1, 1]} : vector<8x128xf32> to vector<8x32xf32>
    %524 = vector.extract_strided_slice %521 {offsets = [0, 32], sizes = [8, 32], strides = [1, 1]} : vector<8x128xf32> to vector<8x32xf32>
    %525 = vector.extract_strided_slice %522 {offsets = [0, 64], sizes = [8, 32], strides = [1, 1]} : vector<8x128xf32> to vector<8x32xf32>
    %526 = vector.extract_strided_slice %521 {offsets = [0, 96], sizes = [8, 32], strides = [1, 1]} : vector<8x128xf32> to vector<8x32xf32>
    %527 = arith.mulf %524, %491 : vector<8x32xf32>
    %528 = arith.mulf %523, %525 : vector<8x32xf32>
    %529 = arith.addf %527, %528 : vector<8x32xf32>
    %530 = math.tanh %529 : vector<8x32xf32>
    %531 = arith.mulf %526, %530 : vector<8x32xf32>
    %cst_129 = arith.constant dense<0.000000e+00> : vector<8x128xf32>
    %532 = tpu.matmul %531, %9, %cst_129 {dimension_numbers = #tpu.dot_dimension_numbers<[1], [0], [0], [1], [0, 0, 1, 1], [], []>} : vector<8x32xf32>, vector<32x128xf32>, vector<8x128xf32> -> vector<8x128xf32>
    %533 = arith.addf %513, %532 : vector<8x128xf32>
    %534 = arith.negf %533 : vector<8x128xf32>
    %535 = math.exp %534 : vector<8x128xf32>
    %cst_130 = arith.constant 1.000000e+00 : f32
    %536 = vector.broadcast %cst_130 : f32 to vector<8x128xf32>
    %537 = arith.addf %536, %535 : vector<8x128xf32>
    %538 = arith.divf %536, %537 : vector<8x128xf32>
    %539 = math.tanh %533 : vector<8x128xf32>
    %540 = vector.extract_strided_slice %538 {offsets = [0, 0], sizes = [8, 32], strides = [1, 1]} : vector<8x128xf32> to vector<8x32xf32>
    %541 = vector.extract_strided_slice %538 {offsets = [0, 32], sizes = [8, 32], strides = [1, 1]} : vector<8x128xf32> to vector<8x32xf32>
    %542 = vector.extract_strided_slice %539 {offsets = [0, 64], sizes = [8, 32], strides = [1, 1]} : vector<8x128xf32> to vector<8x32xf32>
    %543 = vector.extract_strided_slice %538 {offsets = [0, 96], sizes = [8, 32], strides = [1, 1]} : vector<8x128xf32> to vector<8x32xf32>
    %544 = arith.mulf %541, %508 : vector<8x32xf32>
    %545 = arith.mulf %540, %542 : vector<8x32xf32>
    %546 = arith.addf %544, %545 : vector<8x32xf32>
    %547 = math.tanh %546 : vector<8x32xf32>
    %548 = arith.mulf %543, %547 : vector<8x32xf32>
    %c104_131 = arith.constant 104 : index
    %c0_132 = arith.constant 0 : index
    %549 = vector.load %arg18[%c104_131, %c0_132] : memref<128x32xf32, #tpu.memory_space<vmem>>, vector<8x32xf32>
    tpu.vector_store %arg18[%c104_131, %c0_132], %548 {strides = array<i32>} : memref<128x32xf32, #tpu.memory_space<vmem>>, vector<8x32xf32>,
    %cst_133 = arith.constant dense<0.000000e+00> : vector<8x128xf32>
    %550 = tpu.matmul %548, %10, %cst_133 {dimension_numbers = #tpu.dot_dimension_numbers<[1], [0], [0], [1], [0, 0, 1, 1], [], []>} : vector<8x32xf32>, vector<32x128xf32>, vector<8x128xf32> -> vector<8x128xf32>
    %551 = arith.addf %550, %13 : vector<8x128xf32>
    %c112 = arith.constant 112 : index
    %c0_134 = arith.constant 0 : index
    %552 = vector.load %arg17[%c112, %c0_134] : memref<128x128xf32, #tpu.memory_space<vmem>>, vector<8x128xf32>
    %cst_135 = arith.constant dense<0.000000e+00> : vector<8x128xf32>
    %553 = tpu.matmul %531, %8, %cst_135 {dimension_numbers = #tpu.dot_dimension_numbers<[1], [0], [0], [1], [0, 0, 1, 1], [], []>} : vector<8x32xf32>, vector<32x128xf32>, vector<8x128xf32> -> vector<8x128xf32>
    %554 = arith.addf %552, %553 : vector<8x128xf32>
    %555 = arith.negf %554 : vector<8x128xf32>
    %556 = math.exp %555 : vector<8x128xf32>
    %cst_136 = arith.constant 1.000000e+00 : f32
    %557 = vector.broadcast %cst_136 : f32 to vector<8x128xf32>
    %558 = arith.addf %557, %556 : vector<8x128xf32>
    %559 = arith.divf %557, %558 : vector<8x128xf32>
    %560 = math.tanh %554 : vector<8x128xf32>
    %561 = vector.extract_strided_slice %559 {offsets = [0, 0], sizes = [8, 32], strides = [1, 1]} : vector<8x128xf32> to vector<8x32xf32>
    %562 = vector.extract_strided_slice %559 {offsets = [0, 32], sizes = [8, 32], strides = [1, 1]} : vector<8x128xf32> to vector<8x32xf32>
    %563 = vector.extract_strided_slice %560 {offsets = [0, 64], sizes = [8, 32], strides = [1, 1]} : vector<8x128xf32> to vector<8x32xf32>
    %564 = vector.extract_strided_slice %559 {offsets = [0, 96], sizes = [8, 32], strides = [1, 1]} : vector<8x128xf32> to vector<8x32xf32>
    %565 = arith.mulf %562, %529 : vector<8x32xf32>
    %566 = arith.mulf %561, %563 : vector<8x32xf32>
    %567 = arith.addf %565, %566 : vector<8x32xf32>
    %568 = math.tanh %567 : vector<8x32xf32>
    %569 = arith.mulf %564, %568 : vector<8x32xf32>
    %cst_137 = arith.constant dense<0.000000e+00> : vector<8x128xf32>
    %570 = tpu.matmul %569, %9, %cst_137 {dimension_numbers = #tpu.dot_dimension_numbers<[1], [0], [0], [1], [0, 0, 1, 1], [], []>} : vector<8x32xf32>, vector<32x128xf32>, vector<8x128xf32> -> vector<8x128xf32>
    %571 = arith.addf %551, %570 : vector<8x128xf32>
    %572 = arith.negf %571 : vector<8x128xf32>
    %573 = math.exp %572 : vector<8x128xf32>
    %cst_138 = arith.constant 1.000000e+00 : f32
    %574 = vector.broadcast %cst_138 : f32 to vector<8x128xf32>
    %575 = arith.addf %574, %573 : vector<8x128xf32>
    %576 = arith.divf %574, %575 : vector<8x128xf32>
    %577 = math.tanh %571 : vector<8x128xf32>
    %578 = vector.extract_strided_slice %576 {offsets = [0, 0], sizes = [8, 32], strides = [1, 1]} : vector<8x128xf32> to vector<8x32xf32>
    %579 = vector.extract_strided_slice %576 {offsets = [0, 32], sizes = [8, 32], strides = [1, 1]} : vector<8x128xf32> to vector<8x32xf32>
    %580 = vector.extract_strided_slice %577 {offsets = [0, 64], sizes = [8, 32], strides = [1, 1]} : vector<8x128xf32> to vector<8x32xf32>
    %581 = vector.extract_strided_slice %576 {offsets = [0, 96], sizes = [8, 32], strides = [1, 1]} : vector<8x128xf32> to vector<8x32xf32>
    %582 = arith.mulf %579, %546 : vector<8x32xf32>
    %583 = arith.mulf %578, %580 : vector<8x32xf32>
    %584 = arith.addf %582, %583 : vector<8x32xf32>
    %585 = math.tanh %584 : vector<8x32xf32>
    %586 = arith.mulf %581, %585 : vector<8x32xf32>
    %c112_139 = arith.constant 112 : index
    %c0_140 = arith.constant 0 : index
    %587 = vector.load %arg18[%c112_139, %c0_140] : memref<128x32xf32, #tpu.memory_space<vmem>>, vector<8x32xf32>
    tpu.vector_store %arg18[%c112_139, %c0_140], %586 {strides = array<i32>} : memref<128x32xf32, #tpu.memory_space<vmem>>, vector<8x32xf32>,
    %cst_141 = arith.constant dense<0.000000e+00> : vector<8x128xf32>
    %588 = tpu.matmul %586, %10, %cst_141 {dimension_numbers = #tpu.dot_dimension_numbers<[1], [0], [0], [1], [0, 0, 1, 1], [], []>} : vector<8x32xf32>, vector<32x128xf32>, vector<8x128xf32> -> vector<8x128xf32>
    %589 = arith.addf %588, %13 : vector<8x128xf32>
    %c120 = arith.constant 120 : index
    %c0_142 = arith.constant 0 : index
    %590 = vector.load %arg17[%c120, %c0_142] : memref<128x128xf32, #tpu.memory_space<vmem>>, vector<8x128xf32>
    %cst_143 = arith.constant dense<0.000000e+00> : vector<8x128xf32>
    %591 = tpu.matmul %569, %8, %cst_143 {dimension_numbers = #tpu.dot_dimension_numbers<[1], [0], [0], [1], [0, 0, 1, 1], [], []>} : vector<8x32xf32>, vector<32x128xf32>, vector<8x128xf32> -> vector<8x128xf32>
    %592 = arith.addf %590, %591 : vector<8x128xf32>
    %593 = arith.negf %592 : vector<8x128xf32>
    %594 = math.exp %593 : vector<8x128xf32>
    %cst_144 = arith.constant 1.000000e+00 : f32
    %595 = vector.broadcast %cst_144 : f32 to vector<8x128xf32>
    %596 = arith.addf %595, %594 : vector<8x128xf32>
    %597 = arith.divf %595, %596 : vector<8x128xf32>
    %598 = math.tanh %592 : vector<8x128xf32>
    %599 = vector.extract_strided_slice %597 {offsets = [0, 0], sizes = [8, 32], strides = [1, 1]} : vector<8x128xf32> to vector<8x32xf32>
    %600 = vector.extract_strided_slice %597 {offsets = [0, 32], sizes = [8, 32], strides = [1, 1]} : vector<8x128xf32> to vector<8x32xf32>
    %601 = vector.extract_strided_slice %598 {offsets = [0, 64], sizes = [8, 32], strides = [1, 1]} : vector<8x128xf32> to vector<8x32xf32>
    %602 = vector.extract_strided_slice %597 {offsets = [0, 96], sizes = [8, 32], strides = [1, 1]} : vector<8x128xf32> to vector<8x32xf32>
    %603 = arith.mulf %600, %567 : vector<8x32xf32>
    %604 = arith.mulf %599, %601 : vector<8x32xf32>
    %605 = arith.addf %603, %604 : vector<8x32xf32>
    %606 = math.tanh %605 : vector<8x32xf32>
    %607 = arith.mulf %602, %606 : vector<8x32xf32>
    %cst_145 = arith.constant dense<0.000000e+00> : vector<8x128xf32>
    %608 = tpu.matmul %607, %9, %cst_145 {dimension_numbers = #tpu.dot_dimension_numbers<[1], [0], [0], [1], [0, 0, 1, 1], [], []>} : vector<8x32xf32>, vector<32x128xf32>, vector<8x128xf32> -> vector<8x128xf32>
    %609 = arith.addf %589, %608 : vector<8x128xf32>
    %610 = arith.negf %609 : vector<8x128xf32>
    %611 = math.exp %610 : vector<8x128xf32>
    %cst_146 = arith.constant 1.000000e+00 : f32
    %612 = vector.broadcast %cst_146 : f32 to vector<8x128xf32>
    %613 = arith.addf %612, %611 : vector<8x128xf32>
    %614 = arith.divf %612, %613 : vector<8x128xf32>
    %615 = math.tanh %609 : vector<8x128xf32>
    %616 = vector.extract_strided_slice %614 {offsets = [0, 0], sizes = [8, 32], strides = [1, 1]} : vector<8x128xf32> to vector<8x32xf32>
    %617 = vector.extract_strided_slice %614 {offsets = [0, 32], sizes = [8, 32], strides = [1, 1]} : vector<8x128xf32> to vector<8x32xf32>
    %618 = vector.extract_strided_slice %615 {offsets = [0, 64], sizes = [8, 32], strides = [1, 1]} : vector<8x128xf32> to vector<8x32xf32>
    %619 = vector.extract_strided_slice %614 {offsets = [0, 96], sizes = [8, 32], strides = [1, 1]} : vector<8x128xf32> to vector<8x32xf32>
    %620 = arith.mulf %617, %584 : vector<8x32xf32>
    %621 = arith.mulf %616, %618 : vector<8x32xf32>
    %622 = arith.addf %620, %621 : vector<8x32xf32>
    %623 = math.tanh %622 : vector<8x32xf32>
    %624 = arith.mulf %619, %623 : vector<8x32xf32>
    %c120_147 = arith.constant 120 : index
    %c0_148 = arith.constant 0 : index
    %625 = vector.load %arg18[%c120_147, %c0_148] : memref<128x32xf32, #tpu.memory_space<vmem>>, vector<8x32xf32>
    tpu.vector_store %arg18[%c120_147, %c0_148], %624 {strides = array<i32>} : memref<128x32xf32, #tpu.memory_space<vmem>>, vector<8x32xf32>,
    %c0_149 = arith.constant 0 : index
    %c0_150 = arith.constant 0 : index
    %626 = vector.load %arg18[%c0_149, %c0_150] : memref<128x32xf32, #tpu.memory_space<vmem>>, vector<128x32xf32>
    %c0_151 = arith.constant 0 : index
    %c0_152 = arith.constant 0 : index
    %627 = vector.load %arg8[%c0_151, %c0_152] : memref<32x64xf32, #tpu.memory_space<vmem>>, vector<32x64xf32>
    %cst_153 = arith.constant dense<0.000000e+00> : vector<128x64xf32>
    %628 = tpu.matmul %626, %627, %cst_153 {dimension_numbers = #tpu.dot_dimension_numbers<[1], [0], [0], [1], [0, 0, 1, 1], [], []>} : vector<128x32xf32>, vector<32x64xf32>, vector<128x64xf32> -> vector<128x64xf32>
    %c0_154 = arith.constant 0 : index
    %c0_155 = arith.constant 0 : index
    %629 = vector.load %arg9[%c0_154, %c0_155] : memref<1x64xf32, #tpu.memory_space<vmem>>, vector<1x64xf32>
    %630 = vector.broadcast %629 : vector<1x64xf32> to vector<128x64xf32>
    %631 = arith.addf %628, %630 : vector<128x64xf32>
    %632 = math.tanh %631 : vector<128x64xf32>
    %c0_156 = arith.constant 0 : index
    %c0_157 = arith.constant 0 : index
    %633 = vector.load %arg10[%c0_156, %c0_157] : memref<1x64xf32, #tpu.memory_space<vmem>>, vector<1x64xf32>
    %634 = vector.broadcast %633 : vector<1x64xf32> to vector<128x64xf32>
    %635 = arith.mulf %632, %634 : vector<128x64xf32>
    %cst_158 = arith.constant dense<0.000000e+00> : vector<128xf32>
    %636 = vector.multi_reduction <add>, %635, %cst_158 [1] : vector<128x64xf32> to vector<128xf32>
    %637 = vector.shape_cast %636 : vector<128xf32> to vector<128x1xf32>
    %c0_159 = arith.constant 0 : index
    %c0_160 = arith.constant 0 : index
    %638 = vector.load %arg11[%c0_159, %c0_160] : memref<1x1xf32, #tpu.memory_space<vmem>>, vector<1x1xf32>
    %639 = vector.broadcast %638 : vector<1x1xf32> to vector<128x1xf32>
    %640 = arith.addf %637, %639 : vector<128x1xf32>
    %641 = vector.shape_cast %640 : vector<128x1xf32> to vector<16x8x1xf32>
    %cst_161 = arith.constant dense<0xFF800000> : vector<8x1xf32>
    %642 = vector.multi_reduction <maximumf>, %641, %cst_161 [0] : vector<16x8x1xf32> to vector<8x1xf32>
    %643 = vector.shape_cast %642 : vector<8x1xf32> to vector<1x8x1xf32>
    %644 = vector.broadcast %643 : vector<1x8x1xf32> to vector<16x8x1xf32>
    %645 = arith.subf %641, %644 : vector<16x8x1xf32>
    %646 = math.exp %645 : vector<16x8x1xf32>
    %cst_162 = arith.constant dense<0.000000e+00> : vector<8x1xf32>
    %647 = vector.multi_reduction <add>, %646, %cst_162 [0] : vector<16x8x1xf32> to vector<8x1xf32>
    %648 = vector.shape_cast %647 : vector<8x1xf32> to vector<1x8x1xf32>
    %649 = vector.broadcast %648 : vector<1x8x1xf32> to vector<16x8x1xf32>
    %650 = arith.divf %646, %649 : vector<16x8x1xf32>
    %651 = vector.shape_cast %626 : vector<128x32xf32> to vector<16x8x32xf32>
    %652 = vector.broadcast %650 : vector<16x8x1xf32> to vector<16x8x32xf32>
    %653 = arith.mulf %652, %651 : vector<16x8x32xf32>
    %cst_163 = arith.constant dense<0.000000e+00> : vector<8x32xf32>
    %654 = vector.multi_reduction <add>, %653, %cst_163 [0] : vector<16x8x32xf32> to vector<8x32xf32>
    %c0_164 = arith.constant 0 : index
    %c0_165 = arith.constant 0 : index
    %655 = vector.load %arg12[%c0_164, %c0_165] : memref<32x128xf32, #tpu.memory_space<vmem>>, vector<32x128xf32>
    %cst_166 = arith.constant dense<0.000000e+00> : vector<8x128xf32>
    %656 = tpu.matmul %654, %655, %cst_166 {dimension_numbers = #tpu.dot_dimension_numbers<[1], [0], [0], [1], [0, 0, 1, 1], [], []>} : vector<8x32xf32>, vector<32x128xf32>, vector<8x128xf32> -> vector<8x128xf32>
    %c0_167 = arith.constant 0 : index
    %c0_168 = arith.constant 0 : index
    %657 = vector.load %arg13[%c0_167, %c0_168] : memref<1x128xf32, #tpu.memory_space<vmem>>, vector<1x128xf32>
    %658 = vector.broadcast %657 : vector<1x128xf32> to vector<8x128xf32>
    %659 = arith.addf %656, %658 : vector<8x128xf32>
    %cst_169 = arith.constant 0.000000e+00 : f32
    %660 = vector.broadcast %cst_169 : f32 to vector<8x128xf32>
    %661 = arith.maximumf %659, %660 : vector<8x128xf32>
    %c0_170 = arith.constant 0 : index
    %c0_171 = arith.constant 0 : index
    %662 = vector.load %arg14[%c0_170, %c0_171] : memref<128x5xf32, #tpu.memory_space<vmem>>, vector<128x5xf32>
    %cst_172 = arith.constant dense<0.000000e+00> : vector<8x5xf32>
    %663 = tpu.matmul %661, %662, %cst_172 {dimension_numbers = #tpu.dot_dimension_numbers<[1], [0], [0], [1], [0, 0, 1, 1], [], []>} : vector<8x128xf32>, vector<128x5xf32>, vector<8x5xf32> -> vector<8x5xf32>
    %c0_173 = arith.constant 0 : index
    %c0_174 = arith.constant 0 : index
    %664 = vector.load %arg15[%c0_173, %c0_174] : memref<1x5xf32, #tpu.memory_space<vmem>>, vector<1x5xf32>
    %665 = vector.broadcast %664 : vector<1x5xf32> to vector<8x5xf32>
    %666 = arith.addf %663, %665 : vector<8x5xf32>
    %c0_175 = arith.constant 0 : index
    %c0_176 = arith.constant 0 : index
    %667 = vector.load %arg16[%c0_175, %c0_176] : memref<8x5xf32, #tpu.memory_space<vmem>>, vector<8x5xf32>
    tpu.vector_store %arg16[%c0_175, %c0_176], %666 {strides = array<i32>} : memref<8x5xf32, #tpu.memory_space<vmem>>, vector<8x5xf32>,
    return
  }
  func.func @transform_0(%arg0: i32) -> (i32, i32, i32) {
    %c0_i32 = arith.constant 0 : i32
    %c0_i32_0 = arith.constant 0 : i32
    %c0_i32_1 = arith.constant 0 : i32
    return %c0_i32, %arg0, %c0_i32_0 : i32, i32, i32
  }
  func.func @transform_1(%arg0: i32) -> (i32, i32) {
    %c0_i32 = arith.constant 0 : i32
    %c0_i32_0 = arith.constant 0 : i32
    %c0_i32_1 = arith.constant 0 : i32
    return %c0_i32, %c0_i32_0 : i32, i32
  }
  func.func @transform_2(%arg0: i32) -> (i32, i32) {
    %c0_i32 = arith.constant 0 : i32
    %c0_i32_0 = arith.constant 0 : i32
    %c0_i32_1 = arith.constant 0 : i32
    return %c0_i32, %c0_i32_0 : i32, i32
  }
  func.func @transform_3(%arg0: i32) -> (i32, i32) {
    %c0_i32 = arith.constant 0 : i32
    %c0_i32_0 = arith.constant 0 : i32
    %c0_i32_1 = arith.constant 0 : i32
    return %c0_i32, %c0_i32_0 : i32, i32
  }
  func.func @transform_4(%arg0: i32) -> (i32, i32) {
    %c0_i32 = arith.constant 0 : i32
    %c0_i32_0 = arith.constant 0 : i32
    %c0_i32_1 = arith.constant 0 : i32
    return %c0_i32, %c0_i32_0 : i32, i32
  }
  func.func @transform_5(%arg0: i32) -> (i32, i32) {
    %c0_i32 = arith.constant 0 : i32
    %c0_i32_0 = arith.constant 0 : i32
    %c0_i32_1 = arith.constant 0 : i32
    return %c0_i32, %c0_i32_0 : i32, i32
  }
  func.func @transform_6(%arg0: i32) -> (i32, i32) {
    %c0_i32 = arith.constant 0 : i32
    %c0_i32_0 = arith.constant 0 : i32
    %c0_i32_1 = arith.constant 0 : i32
    return %c0_i32, %c0_i32_0 : i32, i32
  }
  func.func @transform_7(%arg0: i32) -> (i32, i32) {
    %c0_i32 = arith.constant 0 : i32
    %c0_i32_0 = arith.constant 0 : i32
    %c0_i32_1 = arith.constant 0 : i32
    return %c0_i32, %c0_i32_0 : i32, i32
  }
  func.func @transform_8(%arg0: i32) -> (i32, i32) {
    %c0_i32 = arith.constant 0 : i32
    %c0_i32_0 = arith.constant 0 : i32
    %c0_i32_1 = arith.constant 0 : i32
    return %c0_i32, %c0_i32_0 : i32, i32
  }
  func.func @transform_9(%arg0: i32) -> (i32, i32) {
    %c0_i32 = arith.constant 0 : i32
    %c0_i32_0 = arith.constant 0 : i32
    %c0_i32_1 = arith.constant 0 : i32
    return %c0_i32, %c0_i32_0 : i32, i32
  }
  func.func @transform_10(%arg0: i32) -> (i32, i32) {
    %c0_i32 = arith.constant 0 : i32
    %c0_i32_0 = arith.constant 0 : i32
    %c0_i32_1 = arith.constant 0 : i32
    return %c0_i32, %c0_i32_0 : i32, i32
  }
  func.func @transform_11(%arg0: i32) -> (i32, i32) {
    %c0_i32 = arith.constant 0 : i32
    %c0_i32_0 = arith.constant 0 : i32
    %c0_i32_1 = arith.constant 0 : i32
    return %c0_i32, %c0_i32_0 : i32, i32
  }
  func.func @transform_12(%arg0: i32) -> (i32, i32) {
    %c0_i32 = arith.constant 0 : i32
    %c0_i32_0 = arith.constant 0 : i32
    %c0_i32_1 = arith.constant 0 : i32
    return %c0_i32, %c0_i32_0 : i32, i32
  }
  func.func @transform_13(%arg0: i32) -> (i32, i32) {
    %c0_i32 = arith.constant 0 : i32
    %c0_i32_0 = arith.constant 0 : i32
    %c0_i32_1 = arith.constant 0 : i32
    return %c0_i32, %c0_i32_0 : i32, i32
  }
  func.func @transform_14(%arg0: i32) -> (i32, i32) {
    %c0_i32 = arith.constant 0 : i32
    %c0_i32_0 = arith.constant 0 : i32
    %c0_i32_1 = arith.constant 0 : i32
    return %c0_i32, %c0_i32_0 : i32, i32
  }
  func.func @transform_15(%arg0: i32) -> (i32, i32) {
    %c0_i32 = arith.constant 0 : i32
    %c0_i32_0 = arith.constant 0 : i32
    return %arg0, %c0_i32 : i32, i32
  }
}

</mosaic_0001>

<bundles_post_ra>
// kernel: lstm_workout_classifier.1
= control target key start
LH: loop header
LB: loop body
LE: loop exit
PB: predicated region body
PF: predicated region fallthrough
CT: control target
= control target key end

     0   :  { %s8581_s0 = inlined_call_operand.vmem [shape: f32[16,8,9], index: 0, kind: input, shape index: {}]   ;;  %s8582_s1 = inlined_call_operand.vmem [shape: f32[9,128], index: 1, kind: input, shape index: {}]   ;;  %s8583_s2 = inlined_call_operand.vmem [shape: f32[32,128], index: 2, kind: input, shape index: {}]   ;;  %s8584_s3 = inlined_call_operand.vmem [shape: f32[1,128], index: 3, kind: input, shape index: {}]   ;;  %s8585_s4 = inlined_call_operand.vmem [shape: f32[32,128], index: 4, kind: input, shape index: {}]   ;;  %s8586_s5 = inlined_call_operand.vmem [shape: f32[32,128], index: 5, kind: input, shape index: {}]   ;;  %s8587_s6 = inlined_call_operand.vmem [shape: f32[1,128], index: 6, kind: input, shape index: {}]   ;;  %s8588_s7 = inlined_call_operand.vmem [shape: f32[32,64], index: 7, kind: input, shape index: {}]   ;;  %s8589_s8 = inlined_call_operand.vmem [shape: f32[1,64], index: 8, kind: input, shape index: {}]   ;;  %s8590_s9 = inlined_call_operand.vmem [shape: f32[1,64], index: 9, kind: input, shape index: {}]   ;;  %s8591_s10 = inlined_call_operand.<no memory space> [shape: f32[1,1], index: 10, kind: input, shape index: {}]   ;;  %s8592_s11 = inlined_call_operand.vmem [shape: f32[32,128], index: 11, kind: input, shape index: {}]   ;;  %s8593_s12 = inlined_call_operand.vmem [shape: f32[1,128], index: 12, kind: input, shape index: {}]   ;;  %s8594_s13 = inlined_call_operand.vmem [shape: f32[128,5], index: 13, kind: input, shape index: {}]   ;;  %s8595_s14 = inlined_call_operand.vmem [shape: f32[1,5], index: 14, kind: input, shape index: {}]   ;;  %s8596_s15 = inlined_call_operand.hbm [shape: f32[8,5], index: 15, kind: output, shape index: {}]  }
   0x1   :  { %v20_v0 = vstv %s8591_s10 }
   0x2   :  { %21 = vst [vmem:[#allocation4] sm:$0x1] %v20_v0 }
   0x3   :  { %v69_v1 = vld [vmem:[%s8582_s1] sm:$0xff]  ;;  %v70_v2 = vld [vmem:[%s8582_s1 + $0x8] sm:$0x1]  ;;  %vm127_vm0 = vcmask 1040384   ;;  %vm7256_vm1 = vmmov 1   ;;  %vm78_vm3 = vcmask 72704  }
   0x4   :  { %v61_v3 = vld [vmem:[%s8581_s0 + $0x40] sm:$0xff]  ;;  %v6514_v4 = vpack.c.bf16 %v70_v2, %v69_v1  ;;  %vm6515_vm2 = vmpackc.low %vm127_vm0, %vm7256_vm1  ;;  %v301_v6 = vld [vmem:[%s8586_s5 + $0x8] sm:$0xff]  ;;  %v7257_v12 = vmov 0.0|0.0  }
   0x5   :  { %v300_v5 = vld [vmem:[%s8586_s5] sm:$0xff]  ;;  %5896 = vmatprep.mubr.msk.f32.mxu1 %vm78_vm3, %v61_v3  ;;  %v62_v7 = vld [vmem:[%s8581_s0 + $0x48] sm:$0xff]  ;;  %v63_v9 = vld [vmem:[%s8581_s0 + $0x50] sm:$0xff] }
   0x6   :  { %6846 = vmatprep.subr.msk.bf16.mxu1 %vm6515_vm2, %v6514_v4  ;;  %6516 = vmatprep.subr.msk.bf16.mxu0 %vm6515_vm2, %v6514_v4  ;;  %v7366_v8 = vpack.c.bf16 %v301_v6, %v300_v5  ;;  %v302_v10 = vld [vmem:[%s8586_s5 + $0x10] sm:$0xff]  ;;  %v303_v11 = vld [vmem:[%s8586_s5 + $0x18] sm:$0xff]  ;;  %v292_v13 = vld [vmem:[%s8583_s2] sm:$0xff] }
   0x7   :  { %6847 = vmatpush3.bf16.msk.msra.mxu1 %vm6515_vm2, %v6514_v4  ;;  %6519 = vmatpush3.bf16.msk.msra.mxu0 %vm6515_vm2, %v6514_v4  ;;  %v293_v14 = vld [vmem:[%s8583_s2 + $0x8] sm:$0xff]  ;;  %v53_v15 = vld [vmem:[%s8581_s0] sm:$0xff] }
   0x8   :  { %6520 = vmatprep.subr.bf16.mxu1 %v7257_v12  ;;  %6544 = vmatprep.subr.bf16.mxu0 %v7257_v12  ;;  %v54_v16 = vld [vmem:[%s8581_s0 + $0x8] sm:$0xff]  ;;  %v7393_v17 = vpack.c.bf16 %v293_v14, %v292_v13 }
   0x9   :  { %5884 = vmatprep.mubr.msk.f32.mxu0 %vm78_vm3, %v53_v15 }
   0xa   :  { %5897 = vmatmul.mubr.msk.f32.vlgmr.msra.gmra.mrb[0].mxu1 %vm78_vm3, %v62_v7  ;;  %5885 = vmatmul.mubr.msk.f32.vlgmr.msra.gmra.mrb[0].mxu0 %vm78_vm3, %v54_v16 }
   0xb   :  { %22 = vsyncpa [#allocation6], 0  ;;  %6522 = vmatpush3.bf16.msra.mxu1 %v7366_v8  ;;  %5899 = vmatprep.mubr.msk.f32.mxu1 %vm78_vm3, %v63_v9  ;;  %v64_v18 = vld [vmem:[%s8581_s0 + $0x58] sm:$0xff]  ;;  %v7401_v19 = vpack.c.bf16 %v303_v11, %v302_v10  ;;  %v294_v20 = vld [vmem:[%s8583_s2 + $0x10] sm:$0xff]  ;;  %vm7258_vm4 = vmmov 0   ;;  %v7259_v27 = vmov 0.0  }
   0xc   :  { %v295_v21 = vld [vmem:[%s8583_s2 + $0x18] sm:$0xff]  ;;  %v65_v22 = vld [vmem:[%s8581_s0 + $0x60] sm:$0xff]  ;;  %6523 = vmatprep.subr.bf16.mxu1 %v7257_v12  ;;  %6546 = vmatpush3.bf16.msra.mxu0 %v7393_v17  ;;  %v66_v24 = vld [vmem:[%s8581_s0 + $0x68] sm:$0xff]  ;;  %s7260_s26 = smov 64   ;;  %s7261_s5 = smov 32   ;;  %vm311_vm5 = vcmask 261120  }
   0xd   :  { %6547 = vmatprep.subr.bf16.mxu0 %v7257_v12  ;;  %v7416_v23 = vpack.c.bf16 %v295_v21, %v294_v20  ;;  %v67_v25 = vld [vmem:[%s8581_s0 + $0x70] sm:$0xff]  ;;  %v68_v26 = vld [vmem:[%s8581_s0 + $0x78] sm:$0xff]  ;;  %v7468_v38 = vld [vmem:[%s8584_s3] ss:$0 sm:$0xff]  ;;  %vm4940_vm6 = vcmask 523264   ;;  %vm5012_vm7 = vcmask 7168  }
   0xe   :  { %5900 = vmatmul.mubr.msk.f32.gmra.mrb[2].mxu1 %vm78_vm3, %v64_v18  ;;  %v55_v53 = vld [vmem:[%s8581_s0 + $0x10] sm:$0xff]  ;;  %v56_v54 = vld [vmem:[%s8581_s0 + $0x18] sm:$0xff]  ;;  %v57_v55 = vld [vmem:[%s8581_s0 + $0x20] sm:$0xff]  ;;  %s7263_s22 = smov [#allocation5]   ;;  %vm5445_vm8 = vcmask 39936  }
   0xf   :  { %5902 = vmatprep.mubr.msk.f32.mxu1 %vm78_vm3, %v65_v22  ;;  %6525 = vmatpush3.bf16.msra.mxu1 %v7401_v19  ;;  %v296_v56 = vld [vmem:[%s8585_s4] sm:$0xff]  ;;  %v297_v57 = vld [vmem:[%s8585_s4 + $0x8] sm:$0xff]  ;;  %v298_v59 = vld [vmem:[%s8585_s4 + $0x10] sm:$0xff]  ;;  %s5453_s23 = sshll.u32 %s7263_s22, 4  ;;  %s5454_s23 = int_to_ptr.vmem [resolvable:$true] %s5453_s23 }
  0x10   :  { %6526 = vmatprep.subr.bf16.mxu1 %v7257_v12  ;;  %6549 = vmatpush3.bf16.msra.mxu0 %v7416_v23  ;;  %v7493_v58 = vpack.c.bf16 %v297_v57, %v296_v56  ;;  %v58_v60 = vld [vmem:[%s8581_s0 + $0x28] sm:$0xff]  ;;  %v299_v61 = vld [vmem:[%s8585_s4 + $0x18] sm:$0xff]  ;;  %v59_v62 = vld [vmem:[%s8581_s0 + $0x30] sm:$0xff]  ;;  %p7237_p1 = scmp.lt.s32.totalorder %s5454_s23, %s5454_s23 }
  0x11   :  { %6556 = vmatprep.subr.bf16.mxu0 %v7257_v12  ;;  %5887 = vmatprep.mubr.msk.f32.mxu0 %vm78_vm3, %v55_v53  ;;  %v7509_v63 = vpack.c.bf16 %v299_v61, %v298_v59  ;;  %v60_v0 = vld [vmem:[%s8581_s0 + $0x38] sm:$0xff]  ;;  %v7553_v13 = vld [vmem:[%s8587_s6] ss:$0 sm:$0xff] }
  0x12   :  { %5903 = vmatmul.mubr.msk.f32.gmra.mrb[4].mxu1 %vm78_vm3, %v66_v24  ;;  %5888 = vmatmul.mubr.msk.f32.gmra.mrb[2].mxu0 %vm78_vm3, %v56_v54 }
  0x13   :  { %5905 = vmatprep.mubr.msk.f32.mxu1 %vm78_vm3, %v67_v25  ;;  %5890 = vmatprep.mubr.msk.f32.mxu0 %vm78_vm3, %v57_v55 }
  0x16   :  { %5906 = vmatmul.mubr.msk.f32.gmra.mrb[6].mxu1 %vm78_vm3, %v68_v26  ;;  %5891 = vmatmul.mubr.msk.f32.gmra.mrb[4].mxu0 %vm78_vm3, %v58_v60 }
  0x17   :  { %5916 = vmatprep.mubr.msk.f32.mxu1 %vm7258_vm4, %v7259_v27  ;;  %5893 = vmatprep.mubr.msk.f32.mxu0 %vm78_vm3, %v59_v62 }
  0x1a   :  { %5917 = vmatmul.mubr.f32.vlgmr.msra.gmra.mrb[8].mxu1 %v7259_v27  ;;  %5894 = vmatmul.mubr.msk.f32.gmra.mrb[6].mxu0 %vm78_vm3, %v60_v0 }
  0x1b   :  { %6528 = vmatpush3.bf16.msra.mxu1 %v7393_v17  ;;  %5927 = vmatprep.mubr.msk.f32.mxu1 %vm7258_vm4, %v7259_v27 }
  0x1c   :  { %6529 = vmatprep.subr.bf16.mxu1 %v7257_v12  ;;  %5960 = vmatprep.mubr.msk.f32.mxu0 %vm7258_vm4, %v7259_v27 }
  0x1f   :  { %6531 = vmatpush3.bf16.msra.mxu1 %v7416_v23 }
  0x20   :  { %6532 = vmatprep.subr.bf16.mxu1 %v7257_v12 }
  0x22   :  { %5928 = vmatmul.mubr.f32.vlgmr.msra.gmra.mrb[10].mxu1 %v7259_v27 }
  0x23   :  { %5938 = vmatprep.mubr.msk.f32.mxu1 %vm7258_vm4, %v7259_v27  ;;  %6534 = vmatpush3.bf16.msra.mxu1 %v7493_v58 }
  0x24   :  { %6535 = vmatprep.subr.bf16.mxu1 %v7257_v12 }
  0x27   :  { %6537 = vmatpush3.bf16.msra.mxu1 %v7509_v63 }
  0x28   :  { %6538 = vmatprep.subr.bf16.mxu1 %v7257_v12 }
  0xdd   :  { %v7447_v28 = vpop.f32.mrb[0].mxu1  ;;  %v7449_v29 = vpop.f32.mrb[0].mxu0 }
  0xde   :  { %v7451_v30 = vpop.f32.mrb[1].mxu1  ;;  %v197_v31 = vpop.f32.mrb[1].mxu0  ;;  %v203_v14 = vadd.f32 %v7449_v29, %v7468_v38 }
  0xdf   :  { %v198_v39 = vadd.f32 %v7468_v38, %v197_v31 }
  0xe1   :  { %v7453_v32 = vpop.f32.mrb[2].mxu1 }
  0xe2   :  { %v7455_v33 = vpop.f32.mrb[3].mxu1 }
  0xe5   :  { %v7457_v34 = vpop.f32.mrb[4].mxu1  ;;  %v7524_v4 = vpop.f32.mrb[2].mxu0 }
  0xe6   :  { %v7459_v35 = vpop.f32.mrb[5].mxu1  ;;  %v7526_v5 = vpop.f32.mrb[3].mxu0 }
  0xe9   :  { %v7461_v36 = vpop.f32.mrb[6].mxu1  ;;  %v7528_v6 = vpop.f32.mrb[4].mxu0 }
  0xea   :  { %v7463_v37 = vpop.f32.mrb[7].mxu1  ;;  %v7530_v7 = vpop.f32.mrb[5].mxu0 }
  0xed   :  { %v7532_v9 = vpop.f32.mrb[6].mxu0 }
  0xee   :  { %v7534_v10 = vpop.f32.mrb[7].mxu0 }
  0xf5   :  { %v452_v40 = vpop.f32.mrb[10].mxu1 }
  0xf6   :  { %v456_v41 = vadd.f32 %v452_v40, %v198_v39  ;;  %v5929_v42 = vpop.f32.mrb[11].mxu1 }
  0xf8   :  { %6906 = vtanh.f32 %v456_v41  ;;  %v5480_v44 = vmul.f32 -1.442695, %v456_v41 }
  0xfa   :  { %6908 = vpow2.f32 %v5480_v44 }
 0x102   :  { %v6907_v43 = vpop.eup %6906 }
 0x103   :  { %466 = vrot.lane.b32.xlu0 %v6907_v43, %s7260_s26 }
 0x104   :  { %v6909_v45 = vpop.eup %6908 }
 0x105   :  { %v460_v46 = vadd.f32 1.0, %v6909_v45 }
 0x107   :  { %6910 = vrcp.f32 %v460_v46 }
 0x111   :  { %v6911_v47 = vpop.eup %6910 }
 0x112   :  { %v464_v50 = vmul.f32 0.0, %v6911_v47 }
 0x175   :  { %v467_v48 = vpop.permute.xlu0 %466 }
 0x176   :  { %v469_v49 = vmul.f32 %v6911_v47, %v467_v48 }
 0x178   :  { %471 = vrot.lane.b32.xlu0 %v469_v49, %s7261_s5 }
 0x1ea   :  { %v472_v51 = vpop.permute.xlu0 %471 }
 0x1eb   :  { %v7473_v52 = vadd.f32 %v472_v51, %v464_v50 }
 0x1ed   :  { %6912 = vtanh.f32 %v7473_v52 }
 0x1f7   :  { %v6913_v1 = vpop.eup %6912 }
 0x1f8   :  { %477 = vrot.lane.b32.xlu1 %v6913_v1, %s7260_s26 }
 0x26a   :  { %v478_v2 = vpop.permute.xlu1 %477 }
 0x26b   :  { %v480_v3 = vmul.f32 %v6911_v47, %v478_v2 }
 0x26d   :  { %482 = vrot.lane.b32.xlu1 %v480_v3, %s7261_s5  ;;  %v208_v3 = vadd.f32 %v7468_v38, %v7526_v5 }
 0x2df   :  { %v483_v11 = vpop.permute.xlu1 %482 }
 0x2e0   :  { %5939 = vmatmul.mubr.msk.f32.vlgmr.msra.gmra.mrb[8].mxu1 %vm311_vm5, %v483_v11  ;;  %5961 = vmatmul.mubr.msk.f32.vlgmr.msra.gmra.mrb[8].mxu0 %vm311_vm5, %v483_v11 }
 0x2e1   :  { %6540 = vmatpush3.bf16.msra.mxu1 %v7366_v8  ;;  %5949 = vmatprep.mubr.msk.f32.mxu1 %vm7258_vm4, %v7259_v27 }
 0x2e2   :  { %6541 = vmatprep.subr.bf16.mxu1 %v7257_v12  ;;  %6558 = vmatpush3.bf16.msra.mxu0 %v7366_v8 }
 0x2e3   :  { %6559 = vmatprep.subr.bf16.mxu0 %v7257_v12  ;;  %5982 = vmatprep.mubr.msk.f32.mxu0 %vm7258_vm4, %v7259_v27 }
 0x2e5   :  { %6543 = vmatpush3.bf16.msra.mxu1 %v7401_v19 }
 0x2e6   :  { %6550 = vmatprep.subr.bf16.mxu1 %v7257_v12  ;;  %6561 = vmatpush3.bf16.msra.mxu0 %v7401_v19 }
 0x2e7   :  { %6568 = vmatprep.subr.bf16.mxu0 %v7257_v12 }
 0x3b3   :  { %v552_v15 = vpop.f32.mrb[8].mxu1  ;;  %v725_v16 = vpop.f32.mrb[8].mxu0 }
 0x3b4   :  { %v6848_v18 = vadd.f32 %v7553_v13, %v552_v15  ;;  %v729_v20 = vadd.f32 %v725_v16, %v203_v14  ;;  %v5940_v21 = vpop.f32.mrb[9].mxu1  ;;  %v5962_v22 = vpop.f32.mrb[9].mxu0 }
 0x3b6   :  { %6914 = vtanh.f32 %v6848_v18  ;;  %v5482_v26 = vmul.f32 -1.442695, %v6848_v18  ;;  %v5485_v31 = vmul.f32 -1.442695, %v729_v20 }
 0x3b7   :  { %6916 = vtanh.f32 %v729_v20 }
 0x3b8   :  { %6918 = vpow2.f32 %v5482_v26 }
 0x3b9   :  { %6920 = vpow2.f32 %v5485_v31 }
 0x3c0   :  { %v6915_v24 = vpop.eup %6914 }
 0x3c1   :  { %v6917_v25 = vpop.eup %6916  ;;  %566 = vrot.lane.b32.xlu0 %v6915_v24, %s7260_s26 }
 0x3c2   :  { %739 = vrot.lane.b32.xlu1 %v6917_v25, %s7260_s26  ;;  %v6919_v29 = vpop.eup %6918 }
 0x3c3   :  { %v6921_v39 = vpop.eup %6920  ;;  %v560_v40 = vadd.f32 1.0, %v6919_v29 }
 0x3c4   :  { %v733_v41 = vadd.f32 1.0, %v6921_v39 }
 0x3c5   :  { %6922 = vrcp.f32 %v560_v40 }
 0x3c6   :  { %6924 = vrcp.f32 %v733_v41 }
 0x3cf   :  { %v6923_v42 = vpop.eup %6922 }
 0x3d0   :  { %v6925_v44 = vpop.eup %6924  ;;  %v564_v48 = vmul.f32 0.0, %v6923_v42 }
 0x3d1   :  { %v737_v49 = vmul.f32 %v6925_v44, %v7473_v52 }
 0x433   :  { %v567_v43 = vpop.permute.xlu0 %566 }
 0x434   :  { %v740_v45 = vpop.permute.xlu1 %739  ;;  %v569_v46 = vmul.f32 %v6923_v42, %v567_v43 }
 0x435   :  { %v742_v47 = vmul.f32 %v6925_v44, %v740_v45 }
 0x436   :  { %571 = vrot.lane.b32.xlu0 %v569_v46, %s7261_s5 }
 0x437   :  { %744 = vrot.lane.b32.xlu1 %v742_v47, %s7261_s5 }
 0x4a8   :  { %v572_v50 = vpop.permute.xlu0 %571 }
 0x4a9   :  { %v745_v51 = vpop.permute.xlu1 %744  ;;  %v7563_v53 = vadd.f32 %v572_v50, %v564_v48 }
 0x4aa   :  { %v7565_v54 = vadd.f32 %v745_v51, %v737_v49 }
 0x4ab   :  { %6926 = vtanh.f32 %v7563_v53 }
 0x4ac   :  { %6928 = vtanh.f32 %v7565_v54 }
 0x4b5   :  { %v6927_v55 = vpop.eup %6926 }
 0x4b6   :  { %v6929_v56 = vpop.eup %6928  ;;  %577 = vrot.lane.b32.xlu0 %v6927_v55, %s7260_s26 }
 0x4b7   :  { %750 = vrot.lane.b32.xlu1 %v6929_v56, %s7260_s26 }
 0x528   :  { %v578_v57 = vpop.permute.xlu0 %577 }
 0x529   :  { %v751_v59 = vpop.permute.xlu1 %750  ;;  %v580_v60 = vmul.f32 %v6923_v42, %v578_v57 }
 0x52a   :  { %v753_v52 = vmul.f32 %v6925_v44, %v751_v59 }
 0x52b   :  { %582 = vrot.lane.b32.xlu0 %v580_v60, %s7261_s5 }
 0x52c   :  { %755 = vrot.lane.b32.xlu1 %v753_v52, %s7261_s5  ;;  %v213_v52 = vadd.f32 %v7524_v4, %v7468_v38 }
 0x59d   :  { %v583_v61 = vpop.permute.xlu0 %582 }
 0x59e   :  { %585 = vst.msk [vmem:[#allocation3] sm:$0xff] %vm311_vm5, %v583_v61  ;;  %5950 = vmatmul.mubr.msk.f32.vlgmr.msra.gmra.mrb[12].mxu1 %vm311_vm5, %v583_v61  ;;  %v756_v62 = vpop.permute.xlu1 %755 }
 0x59f   :  { %6552 = vmatpush3.bf16.msra.mxu1 %v7493_v58  ;;  %5971 = vmatprep.mubr.msk.f32.mxu1 %vm7258_vm4, %v7259_v27 }
 0x5a0   :  { %6553 = vmatprep.subr.bf16.mxu1 %v7257_v12 }
 0x5a3   :  { %6555 = vmatpush3.bf16.msra.mxu1 %v7509_v63 }
 0x5a4   :  { %6562 = vmatprep.subr.bf16.mxu1 %v7257_v12 }
 0x5a6   :  { %5972 = vmatmul.mubr.msk.f32.vlgmr.msra.gmra.mrb[12].mxu1 %vm311_vm5, %v756_v62 }
 0x5a7   :  { %6564 = vmatpush3.bf16.msra.mxu1 %v7393_v17  ;;  %5993 = vmatprep.mubr.msk.f32.mxu1 %vm7258_vm4, %v7259_v27 }
 0x5a8   :  { %6565 = vmatprep.subr.bf16.mxu1 %v7257_v12 }
 0x5ab   :  { %6567 = vmatpush3.bf16.msra.mxu1 %v7416_v23 }
 0x5ac   :  { %6574 = vmatprep.subr.bf16.mxu1 %v7257_v12 }
 0x5ae   :  { %5994 = vmatmul.mubr.msk.f32.vlgmr.msra.gmra.mrb[14].mxu1 %vm311_vm5, %v756_v62 }
 0x5af   :  { %6576 = vmatpush3.bf16.msra.mxu1 %v7366_v8  ;;  %6015 = vmatprep.mubr.msk.f32.mxu1 %vm7258_vm4, %v7259_v27 }
 0x5b0   :  { %6577 = vmatprep.subr.bf16.mxu1 %v7257_v12 }
 0x5b3   :  { %6579 = vmatpush3.bf16.msra.mxu1 %v7401_v19 }
 0x5b4   :  { %6586 = vmatprep.subr.bf16.mxu1 %v7257_v12 }
 0x679   :  { %v825_v0 = vpop.f32.mrb[12].mxu1 }
 0x67a   :  { %v6849_v1 = vadd.f32 %v7553_v13, %v825_v0  ;;  %v5973_v2 = vpop.f32.mrb[13].mxu1 }
 0x67c   :  { %6930 = vtanh.f32 %v6849_v1  ;;  %v5487_v20 = vmul.f32 -1.442695, %v6849_v1 }
 0x681   :  { %v998_v11 = vpop.f32.mrb[14].mxu1 }
 0x682   :  { %v1002_v14 = vadd.f32 %v998_v11, %v208_v3  ;;  %v5995_v15 = vpop.f32.mrb[15].mxu1 }
 0x684   :  { %6932 = vtanh.f32 %v1002_v14  ;;  %v5490_v21 = vmul.f32 -1.442695, %v1002_v14 }
 0x685   :  { %6934 = vpow2.f32 %v5487_v20 }
 0x686   :  { %v6931_v16 = vpop.eup %6930  ;;  %6936 = vpow2.f32 %v5490_v21 }
 0x687   :  { %839 = vrot.lane.b32.xlu0 %v6931_v16, %s7260_s26 }
 0x68e   :  { %v6933_v18 = vpop.eup %6932 }
 0x68f   :  { %1012 = vrot.lane.b32.xlu1 %v6933_v18, %s7260_s26  ;;  %v6935_v22 = vpop.eup %6934 }
 0x690   :  { %v833_v24 = vadd.f32 1.0, %v6935_v22  ;;  %v6937_v25 = vpop.eup %6936 }
 0x691   :  { %v1006_v26 = vadd.f32 1.0, %v6937_v25 }
 0x692   :  { %6938 = vrcp.f32 %v833_v24 }
 0x693   :  { %6940 = vrcp.f32 %v1006_v26 }
 0x69c   :  { %v6939_v5 = vpop.eup %6938 }
 0x69d   :  { %v6941_v39 = vpop.eup %6940  ;;  %v837_v42 = vmul.f32 %v6939_v5, %v7563_v53 }
 0x69e   :  { %v1010_v45 = vmul.f32 %v6941_v39, %v7565_v54 }
 0x6f9   :  { %v840_v31 = vpop.permute.xlu0 %839 }
 0x6fa   :  { %v842_v29 = vmul.f32 %v6939_v5, %v840_v31 }
 0x6fc   :  { %844 = vrot.lane.b32.xlu0 %v842_v29, %s7261_s5 }
 0x701   :  { %v1013_v40 = vpop.permute.xlu1 %1012 }
 0x702   :  { %v1015_v41 = vmul.f32 %v6941_v39, %v1013_v40 }
 0x704   :  { %1017 = vrot.lane.b32.xlu1 %v1015_v41, %s7261_s5 }
 0x76e   :  { %v845_v43 = vpop.permute.xlu0 %844 }
 0x76f   :  { %v7603_v44 = vadd.f32 %v845_v43, %v837_v42 }
 0x771   :  { %6942 = vtanh.f32 %v7603_v44 }
 0x776   :  { %v1018_v46 = vpop.permute.xlu1 %1017 }
 0x777   :  { %v7607_v47 = vadd.f32 %v1018_v46, %v1010_v45 }
 0x779   :  { %6944 = vtanh.f32 %v7607_v47 }
 0x77b   :  { %v6943_v48 = vpop.eup %6942 }
 0x77c   :  { %850 = vrot.lane.b32.xlu0 %v6943_v48, %s7260_s26 }
 0x783   :  { %v6945_v49 = vpop.eup %6944 }
 0x784   :  { %1023 = vrot.lane.b32.xlu1 %v6945_v49, %s7260_s26 }
 0x7ee   :  { %v851_v50 = vpop.permute.xlu0 %850 }
 0x7ef   :  { %v853_v51 = vmul.f32 %v6939_v5, %v851_v50 }
 0x7f1   :  { %855 = vrot.lane.b32.xlu0 %v853_v51, %s7261_s5 }
 0x7f6   :  { %v1024_v53 = vpop.permute.xlu1 %1023 }
 0x7f7   :  { %v1026_v55 = vmul.f32 %v6941_v39, %v1024_v53  ;;  %v218_v53 = vadd.f32 %v7468_v38, %v7530_v7 }
 0x7f9   :  { %1028 = vrot.lane.b32.xlu1 %v1026_v55, %s7261_s5 }
 0x863   :  { %v856_v54 = vpop.permute.xlu0 %855 }
 0x864   :  { %858 = vst.msk [vmem:[#allocation3 + $0x8] sm:$0xff] %vm311_vm5, %v856_v54  ;;  %5983 = vmatmul.mubr.msk.f32.vlgmr.msra.gmra.mrb[10].mxu0 %vm311_vm5, %v856_v54 }
 0x865   :  { %6570 = vmatpush3.bf16.msra.mxu0 %v7493_v58  ;;  %6004 = vmatprep.mubr.msk.f32.mxu0 %vm7258_vm4, %v7259_v27 }
 0x866   :  { %6571 = vmatprep.subr.bf16.mxu0 %v7257_v12 }
 0x869   :  { %6573 = vmatpush3.bf16.msra.mxu0 %v7509_v63 }
 0x86a   :  { %6580 = vmatprep.subr.bf16.mxu0 %v7257_v12 }
 0x86b   :  { %v1029_v56 = vpop.permute.xlu1 %1028 }
 0x86c   :  { %6005 = vmatmul.mubr.msk.f32.vlgmr.msra.gmra.mrb[10].mxu0 %vm311_vm5, %v1029_v56 }
 0x86d   :  { %6582 = vmatpush3.bf16.msra.mxu0 %v7393_v17  ;;  %6026 = vmatprep.mubr.msk.f32.mxu0 %vm7258_vm4, %v7259_v27 }
 0x86e   :  { %6583 = vmatprep.subr.bf16.mxu0 %v7257_v12 }
 0x871   :  { %6585 = vmatpush3.bf16.msra.mxu0 %v7416_v23 }
 0x872   :  { %6592 = vmatprep.subr.bf16.mxu0 %v7257_v12 }
 0x874   :  { %6027 = vmatmul.mubr.msk.f32.vlgmr.msra.gmra.mrb[12].mxu0 %vm311_vm5, %v1029_v56 }
 0x875   :  { %6594 = vmatpush3.bf16.msra.mxu0 %v7366_v8  ;;  %6048 = vmatprep.mubr.msk.f32.mxu0 %vm7258_vm4, %v7259_v27 }
 0x876   :  { %6595 = vmatprep.subr.bf16.mxu0 %v7257_v12 }
 0x879   :  { %6597 = vmatpush3.bf16.msra.mxu0 %v7401_v19 }
 0x87a   :  { %6604 = vmatprep.subr.bf16.mxu0 %v7257_v12 }
 0x93f   :  { %v1098_v57 = vpop.f32.mrb[10].mxu0 }
 0x940   :  { %v6850_v59 = vadd.f32 %v7553_v13, %v1098_v57  ;;  %v6006_v60 = vpop.f32.mrb[11].mxu0 }
 0x942   :  { %6946 = vtanh.f32 %v6850_v59  ;;  %v5492_v3 = vmul.f32 -1.442695, %v6850_v59 }
 0x947   :  { %v1271_v61 = vpop.f32.mrb[12].mxu0 }
 0x948   :  { %v1275_v62 = vadd.f32 %v1271_v61, %v213_v52  ;;  %v6028_v0 = vpop.f32.mrb[13].mxu0 }
 0x94a   :  { %6948 = vtanh.f32 %v1275_v62  ;;  %v5495_v11 = vmul.f32 -1.442695, %v1275_v62 }
 0x94b   :  { %6950 = vpow2.f32 %v5492_v3 }
 0x94c   :  { %v6947_v1 = vpop.eup %6946  ;;  %6952 = vpow2.f32 %v5495_v11 }
 0x94d   :  { %1112 = vrot.lane.b32.xlu0 %v6947_v1, %s7260_s26 }
 0x954   :  { %v6949_v2 = vpop.eup %6948 }
 0x955   :  { %1285 = vrot.lane.b32.xlu1 %v6949_v2, %s7260_s26  ;;  %v6951_v14 = vpop.eup %6950 }
 0x956   :  { %v1106_v15 = vadd.f32 1.0, %v6951_v14  ;;  %v6953_v16 = vpop.eup %6952 }
 0x957   :  { %v1279_v18 = vadd.f32 1.0, %v6953_v16 }
 0x958   :  { %6954 = vrcp.f32 %v1106_v15 }
 0x959   :  { %6956 = vrcp.f32 %v1279_v18 }
 0x962   :  { %v6955_v4 = vpop.eup %6954 }
 0x963   :  { %v6957_v22 = vpop.eup %6956  ;;  %v1110_v26 = vmul.f32 %v6955_v4, %v7603_v44 }
 0x964   :  { %v1283_v29 = vmul.f32 %v6957_v22, %v7607_v47 }
 0x9bf   :  { %v1113_v20 = vpop.permute.xlu0 %1112 }
 0x9c0   :  { %v1115_v21 = vmul.f32 %v6955_v4, %v1113_v20 }
 0x9c2   :  { %1117 = vrot.lane.b32.xlu0 %v1115_v21, %s7261_s5 }
 0x9c7   :  { %v1286_v24 = vpop.permute.xlu1 %1285 }
 0x9c8   :  { %v1288_v25 = vmul.f32 %v6957_v22, %v1286_v24 }
 0x9ca   :  { %1290 = vrot.lane.b32.xlu1 %v1288_v25, %s7261_s5 }
 0xa34   :  { %v1118_v5 = vpop.permute.xlu0 %1117 }
 0xa35   :  { %v7644_v31 = vadd.f32 %v1118_v5, %v1110_v26 }
 0xa37   :  { %6958 = vtanh.f32 %v7644_v31 }
 0xa3c   :  { %v1291_v39 = vpop.permute.xlu1 %1290 }
 0xa3d   :  { %v7648_v40 = vadd.f32 %v1291_v39, %v1283_v29 }
 0xa3f   :  { %6960 = vtanh.f32 %v7648_v40 }
 0xa41   :  { %v6959_v41 = vpop.eup %6958 }
 0xa42   :  { %1123 = vrot.lane.b32.xlu0 %v6959_v41, %s7260_s26 }
 0xa49   :  { %v6961_v42 = vpop.eup %6960 }
 0xa4a   :  { %1296 = vrot.lane.b32.xlu1 %v6961_v42, %s7260_s26 }
 0xab4   :  { %v1124_v43 = vpop.permute.xlu0 %1123 }
 0xab5   :  { %v1126_v44 = vmul.f32 %v6955_v4, %v1124_v43 }
 0xab7   :  { %1128 = vrot.lane.b32.xlu0 %v1126_v44, %s7261_s5  ;;  %v223_v44 = vadd.f32 %v7528_v6, %v7468_v38 }
 0xabc   :  { %v1297_v45 = vpop.permute.xlu1 %1296 }
 0xabd   :  { %v1299_v46 = vmul.f32 %v6957_v22, %v1297_v45 }
 0xabf   :  { %1301 = vrot.lane.b32.xlu1 %v1299_v46, %s7261_s5 }
 0xb29   :  { %v1129_v47 = vpop.permute.xlu0 %1128 }
 0xb2a   :  { %1131 = vst.msk [vmem:[#allocation3 + $0x10] sm:$0xff] %vm311_vm5, %v1129_v47  ;;  %6016 = vmatmul.mubr.msk.f32.vlgmr.msra.gmra.mrb[16].mxu1 %vm311_vm5, %v1129_v47 }
 0xb2b   :  { %6588 = vmatpush3.bf16.msra.mxu1 %v7493_v58  ;;  %6037 = vmatprep.mubr.msk.f32.mxu1 %vm7258_vm4, %v7259_v27 }
 0xb2c   :  { %6589 = vmatprep.subr.bf16.mxu1 %v7257_v12 }
 0xb2f   :  { %6591 = vmatpush3.bf16.msra.mxu1 %v7509_v63 }
 0xb30   :  { %6598 = vmatprep.subr.bf16.mxu1 %v7257_v12 }
 0xb31   :  { %v1302_v48 = vpop.permute.xlu1 %1301 }
 0xb32   :  { %6038 = vmatmul.mubr.msk.f32.vlgmr.msra.gmra.mrb[16].mxu1 %vm311_vm5, %v1302_v48 }
 0xb33   :  { %6600 = vmatpush3.bf16.msra.mxu1 %v7393_v17  ;;  %6059 = vmatprep.mubr.msk.f32.mxu1 %vm7258_vm4, %v7259_v27 }
 0xb34   :  { %6601 = vmatprep.subr.bf16.mxu1 %v7257_v12 }
 0xb37   :  { %6603 = vmatpush3.bf16.msra.mxu1 %v7416_v23 }
 0xb38   :  { %6610 = vmatprep.subr.bf16.mxu1 %v7257_v12 }
 0xb3a   :  { %6060 = vmatmul.mubr.msk.f32.vlgmr.msra.gmra.mrb[18].mxu1 %vm311_vm5, %v1302_v48 }
 0xb3b   :  { %6612 = vmatpush3.bf16.msra.mxu1 %v7366_v8  ;;  %6081 = vmatprep.mubr.msk.f32.mxu1 %vm7258_vm4, %v7259_v27 }
 0xb3c   :  { %6613 = vmatprep.subr.bf16.mxu1 %v7257_v12 }
 0xb3f   :  { %6615 = vmatpush3.bf16.msra.mxu1 %v7401_v19 }
 0xb40   :  { %6622 = vmatprep.subr.bf16.mxu1 %v7257_v12 }
 0xc05   :  { %v1371_v49 = vpop.f32.mrb[16].mxu1 }
 0xc06   :  { %v6851_v50 = vadd.f32 %v7553_v13, %v1371_v49  ;;  %v6039_v51 = vpop.f32.mrb[17].mxu1 }
 0xc08   :  { %6962 = vtanh.f32 %v6851_v50  ;;  %v5497_v60 = vmul.f32 -1.442695, %v6851_v50 }
 0xc0d   :  { %v1544_v55 = vpop.f32.mrb[18].mxu1 }
 0xc0e   :  { %v1548_v54 = vadd.f32 %v1544_v55, %v218_v53  ;;  %v6061_v56 = vpop.f32.mrb[19].mxu1 }
 0xc10   :  { %6964 = vtanh.f32 %v1548_v54  ;;  %v5500_v52 = vmul.f32 -1.442695, %v1548_v54 }
 0xc11   :  { %6966 = vpow2.f32 %v5497_v60 }
 0xc12   :  { %v6963_v57 = vpop.eup %6962  ;;  %6968 = vpow2.f32 %v5500_v52 }
 0xc13   :  { %1385 = vrot.lane.b32.xlu0 %v6963_v57, %s7260_s26 }
 0xc1a   :  { %v6965_v59 = vpop.eup %6964 }
 0xc1b   :  { %1558 = vrot.lane.b32.xlu1 %v6965_v59, %s7260_s26  ;;  %v6967_v61 = vpop.eup %6966 }
 0xc1c   :  { %v1379_v62 = vadd.f32 1.0, %v6967_v61  ;;  %v6969_v0 = vpop.eup %6968 }
 0xc1d   :  { %v1552_v1 = vadd.f32 1.0, %v6969_v0 }
 0xc1e   :  { %6970 = vrcp.f32 %v1379_v62 }
 0xc1f   :  { %6972 = vrcp.f32 %v1552_v1 }
 0xc28   :  { %v6971_v7 = vpop.eup %6970 }
 0xc29   :  { %v6973_v11 = vpop.eup %6972  ;;  %v1383_v16 = vmul.f32 %v6971_v7, %v7644_v31 }
 0xc2a   :  { %v1556_v20 = vmul.f32 %v6973_v11, %v7648_v40 }
 0xc85   :  { %v1386_v2 = vpop.permute.xlu0 %1385 }
 0xc86   :  { %v1388_v3 = vmul.f32 %v6971_v7, %v1386_v2 }
 0xc88   :  { %1390 = vrot.lane.b32.xlu0 %v1388_v3, %s7261_s5 }
 0xc8d   :  { %v1559_v14 = vpop.permute.xlu1 %1558 }
 0xc8e   :  { %v1561_v15 = vmul.f32 %v6973_v11, %v1559_v14 }
 0xc90   :  { %1563 = vrot.lane.b32.xlu1 %v1561_v15, %s7261_s5 }
 0xcfa   :  { %v1391_v18 = vpop.permute.xlu0 %1390 }
 0xcfb   :  { %v7685_v4 = vadd.f32 %v1391_v18, %v1383_v16 }
 0xcfd   :  { %6974 = vtanh.f32 %v7685_v4 }
 0xd02   :  { %v1564_v21 = vpop.permute.xlu1 %1563 }
 0xd03   :  { %v7689_v22 = vadd.f32 %v1564_v21, %v1556_v20 }
 0xd05   :  { %6976 = vtanh.f32 %v7689_v22 }
 0xd07   :  { %v6975_v24 = vpop.eup %6974 }
 0xd08   :  { %1396 = vrot.lane.b32.xlu0 %v6975_v24, %s7260_s26 }
 0xd0f   :  { %v6977_v25 = vpop.eup %6976 }
 0xd10   :  { %1569 = vrot.lane.b32.xlu1 %v6977_v25, %s7260_s26 }
 0xd7a   :  { %v1397_v26 = vpop.permute.xlu0 %1396 }
 0xd7b   :  { %v1399_v5 = vmul.f32 %v6971_v7, %v1397_v26  ;;  %v228_v26 = vadd.f32 %v7468_v38, %v7534_v10 }
 0xd7d   :  { %1401 = vrot.lane.b32.xlu0 %v1399_v5, %s7261_s5 }
 0xd82   :  { %v1570_v31 = vpop.permute.xlu1 %1569 }
 0xd83   :  { %v1572_v29 = vmul.f32 %v6973_v11, %v1570_v31 }
 0xd85   :  { %1574 = vrot.lane.b32.xlu1 %v1572_v29, %s7261_s5 }
 0xdef   :  { %v1402_v39 = vpop.permute.xlu0 %1401 }
 0xdf0   :  { %1404 = vst.msk [vmem:[#allocation3 + $0x18] sm:$0xff] %vm311_vm5, %v1402_v39  ;;  %6049 = vmatmul.mubr.msk.f32.vlgmr.msra.gmra.mrb[14].mxu0 %vm311_vm5, %v1402_v39 }
 0xdf1   :  { %6606 = vmatpush3.bf16.msra.mxu0 %v7493_v58  ;;  %6070 = vmatprep.mubr.msk.f32.mxu0 %vm7258_vm4, %v7259_v27 }
 0xdf2   :  { %6607 = vmatprep.subr.bf16.mxu0 %v7257_v12 }
 0xdf5   :  { %6609 = vmatpush3.bf16.msra.mxu0 %v7509_v63 }
 0xdf6   :  { %6616 = vmatprep.subr.bf16.mxu0 %v7257_v12 }
 0xdf7   :  { %v1575_v40 = vpop.permute.xlu1 %1574 }
 0xdf8   :  { %6071 = vmatmul.mubr.msk.f32.vlgmr.msra.gmra.mrb[14].mxu0 %vm311_vm5, %v1575_v40 }
 0xdf9   :  { %6618 = vmatpush3.bf16.msra.mxu0 %v7393_v17  ;;  %6092 = vmatprep.mubr.msk.f32.mxu0 %vm7258_vm4, %v7259_v27 }
 0xdfa   :  { %6619 = vmatprep.subr.bf16.mxu0 %v7257_v12 }
 0xdfd   :  { %6621 = vmatpush3.bf16.msra.mxu0 %v7416_v23 }
 0xdfe   :  { %6628 = vmatprep.subr.bf16.mxu0 %v7257_v12 }
 0xe00   :  { %6093 = vmatmul.mubr.msk.f32.vlgmr.msra.gmra.mrb[16].mxu0 %vm311_vm5, %v1575_v40 }
 0xe01   :  { %6630 = vmatpush3.bf16.msra.mxu0 %v7366_v8  ;;  %6114 = vmatprep.mubr.msk.f32.mxu0 %vm7258_vm4, %v7259_v27 }
 0xe02   :  { %6631 = vmatprep.subr.bf16.mxu0 %v7257_v12 }
 0xe05   :  { %6633 = vmatpush3.bf16.msra.mxu0 %v7401_v19 }
 0xe06   :  { %6640 = vmatprep.subr.bf16.mxu0 %v7257_v12 }
 0xecb   :  { %v1644_v41 = vpop.f32.mrb[14].mxu0 }
 0xecc   :  { %v6852_v42 = vadd.f32 %v7553_v13, %v1644_v41  ;;  %v6072_v43 = vpop.f32.mrb[15].mxu0 }
 0xece   :  { %6978 = vtanh.f32 %v6852_v42  ;;  %v5502_v50 = vmul.f32 -1.442695, %v6852_v42 }
 0xed3   :  { %v1817_v45 = vpop.f32.mrb[16].mxu0 }
 0xed4   :  { %v1821_v46 = vadd.f32 %v1817_v45, %v223_v44  ;;  %v6094_v47 = vpop.f32.mrb[17].mxu0 }
 0xed6   :  { %6980 = vtanh.f32 %v1821_v46  ;;  %v5505_v51 = vmul.f32 -1.442695, %v1821_v46 }
 0xed7   :  { %6982 = vpow2.f32 %v5502_v50 }
 0xed8   :  { %v6979_v48 = vpop.eup %6978  ;;  %6984 = vpow2.f32 %v5505_v51 }
 0xed9   :  { %1658 = vrot.lane.b32.xlu0 %v6979_v48, %s7260_s26 }
 0xee0   :  { %v6981_v49 = vpop.eup %6980 }
 0xee1   :  { %1831 = vrot.lane.b32.xlu1 %v6981_v49, %s7260_s26  ;;  %v6983_v53 = vpop.eup %6982 }
 0xee2   :  { %v1652_v55 = vadd.f32 1.0, %v6983_v53  ;;  %v6985_v54 = vpop.eup %6984 }
 0xee3   :  { %v1825_v56 = vadd.f32 1.0, %v6985_v54 }
 0xee4   :  { %6986 = vrcp.f32 %v1652_v55 }
 0xee5   :  { %6988 = vrcp.f32 %v1825_v56 }
 0xeee   :  { %v6987_v6 = vpop.eup %6986 }
 0xeef   :  { %v6989_v60 = vpop.eup %6988  ;;  %v1656_v62 = vmul.f32 %v6987_v6, %v7685_v4 }
 0xef0   :  { %v1829_v7 = vmul.f32 %v6989_v60, %v7689_v22 }
 0xf4b   :  { %v1659_v57 = vpop.permute.xlu0 %1658 }
 0xf4c   :  { %v1661_v59 = vmul.f32 %v6987_v6, %v1659_v57 }
 0xf4e   :  { %1663 = vrot.lane.b32.xlu0 %v1661_v59, %s7261_s5 }
 0xf53   :  { %v1832_v52 = vpop.permute.xlu1 %1831 }
 0xf54   :  { %v1834_v61 = vmul.f32 %v6989_v60, %v1832_v52 }
 0xf56   :  { %1836 = vrot.lane.b32.xlu1 %v1834_v61, %s7261_s5 }
 0xfc0   :  { %v1664_v0 = vpop.permute.xlu0 %1663 }
 0xfc1   :  { %v7726_v1 = vadd.f32 %v1664_v0, %v1656_v62 }
 0xfc3   :  { %6990 = vtanh.f32 %v7726_v1 }
 0xfc8   :  { %v1837_v2 = vpop.permute.xlu1 %1836 }
 0xfc9   :  { %v7730_v3 = vadd.f32 %v1837_v2, %v1829_v7 }
 0xfcb   :  { %6992 = vtanh.f32 %v7730_v3 }
 0xfcd   :  { %v6991_v11 = vpop.eup %6990 }
 0xfce   :  { %1669 = vrot.lane.b32.xlu0 %v6991_v11, %s7260_s26 }
 0xfd5   :  { %v6993_v14 = vpop.eup %6992 }
 0xfd6   :  { %1842 = vrot.lane.b32.xlu1 %v6993_v14, %s7260_s26  ;;  %v233_v14 = vadd.f32 %v7532_v9, %v7468_v38 }
0x1040   :  { %v1670_v15 = vpop.permute.xlu0 %1669 }
0x1041   :  { %v1672_v16 = vmul.f32 %v6987_v6, %v1670_v15 }
0x1043   :  { %1674 = vrot.lane.b32.xlu0 %v1672_v16, %s7261_s5 }
0x1048   :  { %v1843_v18 = vpop.permute.xlu1 %1842 }
0x1049   :  { %v1845_v4 = vmul.f32 %v6989_v60, %v1843_v18 }
0x104b   :  { %1847 = vrot.lane.b32.xlu1 %v1845_v4, %s7261_s5 }
0x10b5   :  { %v1675_v20 = vpop.permute.xlu0 %1674 }
0x10b6   :  { %1677 = vst.msk [vmem:[#allocation3 + $0x20] sm:$0xff] %vm311_vm5, %v1675_v20  ;;  %6082 = vmatmul.mubr.msk.f32.vlgmr.msra.gmra.mrb[20].mxu1 %vm311_vm5, %v1675_v20 }
0x10b7   :  { %6624 = vmatpush3.bf16.msra.mxu1 %v7493_v58  ;;  %6103 = vmatprep.mubr.msk.f32.mxu1 %vm7258_vm4, %v7259_v27 }
0x10b8   :  { %6625 = vmatprep.subr.bf16.mxu1 %v7257_v12 }
0x10bb   :  { %6627 = vmatpush3.bf16.msra.mxu1 %v7509_v63 }
0x10bc   :  { %6634 = vmatprep.subr.bf16.mxu1 %v7257_v12 }
0x10bd   :  { %v1848_v21 = vpop.permute.xlu1 %1847 }
0x10be   :  { %6104 = vmatmul.mubr.msk.f32.vlgmr.msra.gmra.mrb[20].mxu1 %vm311_vm5, %v1848_v21 }
0x10bf   :  { %6636 = vmatpush3.bf16.msra.mxu1 %v7393_v17  ;;  %6125 = vmatprep.mubr.msk.f32.mxu1 %vm7258_vm4, %v7259_v27 }
0x10c0   :  { %6637 = vmatprep.subr.bf16.mxu1 %v7257_v12 }
0x10c3   :  { %6639 = vmatpush3.bf16.msra.mxu1 %v7416_v23 }
0x10c4   :  { %6646 = vmatprep.subr.bf16.mxu1 %v7257_v12 }
0x10c6   :  { %6126 = vmatmul.mubr.msk.f32.vlgmr.msra.gmra.mrb[22].mxu1 %vm311_vm5, %v1848_v21 }
0x10c7   :  { %6648 = vmatpush3.bf16.msra.mxu1 %v7366_v8  ;;  %6147 = vmatprep.mubr.msk.f32.mxu1 %vm7258_vm4, %v7259_v27 }
0x10c8   :  { %6649 = vmatprep.subr.bf16.mxu1 %v7257_v12 }
0x10cb   :  { %6651 = vmatpush3.bf16.msra.mxu1 %v7401_v19 }
0x10cc   :  { %6658 = vmatprep.subr.bf16.mxu1 %v7257_v12 }
0x1191   :  { %v1917_v22 = vpop.f32.mrb[20].mxu1 }
0x1192   :  { %v6853_v24 = vadd.f32 %v7553_v13, %v1917_v22  ;;  %v6105_v25 = vpop.f32.mrb[21].mxu1 }
0x1194   :  { %6994 = vtanh.f32 %v6853_v24  ;;  %v5507_v41 = vmul.f32 -1.442695, %v6853_v24 }
0x1199   :  { %v2090_v5 = vpop.f32.mrb[22].mxu1 }
0x119a   :  { %v2094_v31 = vadd.f32 %v2090_v5, %v228_v26  ;;  %v6127_v29 = vpop.f32.mrb[23].mxu1 }
0x119c   :  { %6996 = vtanh.f32 %v2094_v31  ;;  %v5510_v42 = vmul.f32 -1.442695, %v2094_v31 }
0x119d   :  { %6998 = vpow2.f32 %v5507_v41 }
0x119e   :  { %v6995_v39 = vpop.eup %6994  ;;  %7000 = vpow2.f32 %v5510_v42 }
0x119f   :  { %1931 = vrot.lane.b32.xlu0 %v6995_v39, %s7260_s26 }
0x11a6   :  { %v6997_v40 = vpop.eup %6996 }
0x11a7   :  { %2104 = vrot.lane.b32.xlu1 %v6997_v40, %s7260_s26  ;;  %v6999_v43 = vpop.eup %6998 }
0x11a8   :  { %v1925_v44 = vadd.f32 1.0, %v6999_v43  ;;  %v7001_v45 = vpop.eup %7000 }
0x11a9   :  { %v2098_v46 = vadd.f32 1.0, %v7001_v45 }
0x11aa   :  { %7002 = vrcp.f32 %v1925_v44 }
0x11ab   :  { %7004 = vrcp.f32 %v2098_v46 }
0x11b4   :  { %v7003_v10 = vpop.eup %7002 }
0x11b5   :  { %v7005_v49 = vpop.eup %7004  ;;  %v1929_v53 = vmul.f32 %v7003_v10, %v7726_v1 }
0x11b6   :  { %v2102_v56 = vmul.f32 %v7005_v49, %v7730_v3 }
0x1211   :  { %v1932_v47 = vpop.permute.xlu0 %1931 }
0x1212   :  { %v1934_v48 = vmul.f32 %v7003_v10, %v1932_v47 }
0x1214   :  { %1936 = vrot.lane.b32.xlu0 %v1934_v48, %s7261_s5 }
0x1219   :  { %v2105_v50 = vpop.permute.xlu1 %2104 }
0x121a   :  { %v2107_v51 = vmul.f32 %v7005_v49, %v2105_v50 }
0x121c   :  { %2109 = vrot.lane.b32.xlu1 %v2107_v51, %s7261_s5 }
0x1286   :  { %v1937_v55 = vpop.permute.xlu0 %1936 }
0x1287   :  { %v7767_v54 = vadd.f32 %v1937_v55, %v1929_v53 }
0x1289   :  { %7006 = vtanh.f32 %v7767_v54 }
0x128e   :  { %v2110_v6 = vpop.permute.xlu1 %2109 }
0x128f   :  { %v7771_v57 = vadd.f32 %v2110_v6, %v2102_v56 }
0x1291   :  { %7008 = vtanh.f32 %v7771_v57 }
0x1293   :  { %v7007_v59 = vpop.eup %7006 }
0x1294   :  { %1942 = vrot.lane.b32.xlu0 %v7007_v59, %s7260_s26 }
0x129b   :  { %v7009_v60 = vpop.eup %7008 }
0x129c   :  { %2115 = vrot.lane.b32.xlu1 %v7009_v60, %s7260_s26 }
0x1306   :  { %v1943_v52 = vpop.permute.xlu0 %1942 }
0x1307   :  { %v1945_v61 = vmul.f32 %v7003_v10, %v1943_v52 }
0x1309   :  { %1947 = vrot.lane.b32.xlu0 %v1945_v61, %s7261_s5 }
0x130e   :  { %v2116_v62 = vpop.permute.xlu1 %2115 }
0x130f   :  { %v2118_v0 = vmul.f32 %v7005_v49, %v2116_v62 }
0x1311   :  { %2120 = vrot.lane.b32.xlu1 %v2118_v0, %s7261_s5 }
0x137b   :  { %v1948_v1 = vpop.permute.xlu0 %1947 }
0x137c   :  { %1950 = vst.msk [vmem:[#allocation3 + $0x28] sm:$0xff] %vm311_vm5, %v1948_v1  ;;  %6115 = vmatmul.mubr.msk.f32.vlgmr.msra.gmra.mrb[18].mxu0 %vm311_vm5, %v1948_v1 }
0x137d   :  { %6642 = vmatpush3.bf16.msra.mxu0 %v7493_v58  ;;  %6136 = vmatprep.mubr.msk.f32.mxu0 %vm7258_vm4, %v7259_v27 }
0x137e   :  { %6643 = vmatprep.subr.bf16.mxu0 %v7257_v12 }
0x1381   :  { %6645 = vmatpush3.bf16.msra.mxu0 %v7509_v63 }
0x1382   :  { %6652 = vmatprep.subr.bf16.mxu0 %v7257_v12 }
0x1383   :  { %v2121_v7 = vpop.permute.xlu1 %2120 }
0x1384   :  { %6137 = vmatmul.mubr.msk.f32.vlgmr.msra.gmra.mrb[18].mxu0 %vm311_vm5, %v2121_v7 }
0x1385   :  { %6654 = vmatpush3.bf16.msra.mxu0 %v7393_v17  ;;  %6158 = vmatprep.mubr.msk.f32.mxu0 %vm7258_vm4, %v7259_v27 }
0x1386   :  { %6655 = vmatprep.subr.bf16.mxu0 %v7257_v12 }
0x1389   :  { %6657 = vmatpush3.bf16.msra.mxu0 %v7416_v23 }
0x138a   :  { %6664 = vmatprep.subr.bf16.mxu0 %v7257_v12 }
0x138c   :  { %6159 = vmatmul.mubr.msk.f32.vlgmr.msra.gmra.mrb[20].mxu0 %vm311_vm5, %v2121_v7 }
0x138d   :  { %6666 = vmatpush3.bf16.msra.mxu0 %v7366_v8  ;;  %6180 = vmatprep.mubr.msk.f32.mxu0 %vm7258_vm4, %v7259_v27 }
0x138e   :  { %6667 = vmatprep.subr.bf16.mxu0 %v7257_v12 }
0x1391   :  { %6669 = vmatpush3.bf16.msra.mxu0 %v7401_v19 }
0x1392   :  { %6676 = vmatprep.subr.bf16.mxu0 %v7257_v12 }
0x1457   :  { %v2190_v2 = vpop.f32.mrb[18].mxu0 }
0x1458   :  { %v6854_v3 = vadd.f32 %v7553_v13, %v2190_v2  ;;  %v6138_v11 = vpop.f32.mrb[19].mxu0 }
0x145a   :  { %7010 = vtanh.f32 %v6854_v3  ;;  %v5512_v21 = vmul.f32 -1.442695, %v6854_v3 }
0x145f   :  { %v2363_v15 = vpop.f32.mrb[20].mxu0 }
0x1460   :  { %v2367_v16 = vadd.f32 %v2363_v15, %v233_v14  ;;  %v6160_v18 = vpop.f32.mrb[21].mxu0 }
0x1462   :  { %7012 = vtanh.f32 %v2367_v16  ;;  %v5515_v22 = vmul.f32 -1.442695, %v2367_v16 }
0x1463   :  { %7014 = vpow2.f32 %v5512_v21 }
0x1464   :  { %v7011_v4 = vpop.eup %7010  ;;  %7016 = vpow2.f32 %v5515_v22 }
0x1465   :  { %2204 = vrot.lane.b32.xlu0 %v7011_v4, %s7260_s26 }
0x146c   :  { %v7013_v20 = vpop.eup %7012 }
0x146d   :  { %2377 = vrot.lane.b32.xlu1 %v7013_v20, %s7260_s26  ;;  %v7015_v24 = vpop.eup %7014 }
0x146e   :  { %v2198_v25 = vadd.f32 1.0, %v7015_v24  ;;  %v7017_v26 = vpop.eup %7016 }
0x146f   :  { %v2371_v5 = vadd.f32 1.0, %v7017_v26 }
0x1470   :  { %7018 = vrcp.f32 %v2198_v25 }
0x1471   :  { %7020 = vrcp.f32 %v2371_v5 }
0x147a   :  { %v7019_v38 = vpop.eup %7018 }
0x147b   :  { %v7021_v29 = vpop.eup %7020  ;;  %v2202_v41 = vmul.f32 %v7019_v38, %v7767_v54 }
0x147c   :  { %v2375_v44 = vmul.f32 %v7021_v29, %v7771_v57  ;;  %v7845_v57 = vld [vmem:[%s8584_s3] ss:$0 sm:$0xff] }
0x147d   :  { %v238_v59 = vadd.f32 %v7845_v57, %v7451_v30 }
0x14d7   :  { %v2205_v9 = vpop.permute.xlu0 %2204 }
0x14d8   :  { %v2207_v31 = vmul.f32 %v7019_v38, %v2205_v9 }
0x14da   :  { %2209 = vrot.lane.b32.xlu0 %v2207_v31, %s7261_s5 }
0x14df   :  { %v2378_v39 = vpop.permute.xlu1 %2377 }
0x14e0   :  { %v2380_v40 = vmul.f32 %v7021_v29, %v2378_v39 }
0x14e2   :  { %2382 = vrot.lane.b32.xlu1 %v2380_v40, %s7261_s5 }
0x154c   :  { %v2210_v42 = vpop.permute.xlu0 %2209 }
0x154d   :  { %v7808_v43 = vadd.f32 %v2210_v42, %v2202_v41 }
0x154f   :  { %7022 = vtanh.f32 %v7808_v43 }
0x1554   :  { %v2383_v45 = vpop.permute.xlu1 %2382 }
0x1555   :  { %v7812_v46 = vadd.f32 %v2383_v45, %v2375_v44 }
0x1557   :  { %7024 = vtanh.f32 %v7812_v46 }
0x1559   :  { %v7023_v10 = vpop.eup %7022 }
0x155a   :  { %2215 = vrot.lane.b32.xlu0 %v7023_v10, %s7260_s26 }
0x1561   :  { %v7025_v47 = vpop.eup %7024 }
0x1562   :  { %2388 = vrot.lane.b32.xlu1 %v7025_v47, %s7260_s26 }
0x15cc   :  { %v2216_v48 = vpop.permute.xlu0 %2215 }
0x15cd   :  { %v2218_v49 = vmul.f32 %v7019_v38, %v2216_v48 }
0x15cf   :  { %2220 = vrot.lane.b32.xlu0 %v2218_v49, %s7261_s5 }
0x15d4   :  { %v2389_v50 = vpop.permute.xlu1 %2388 }
0x15d5   :  { %v2391_v51 = vmul.f32 %v7021_v29, %v2389_v50 }
0x15d7   :  { %2393 = vrot.lane.b32.xlu1 %v2391_v51, %s7261_s5 }
0x1641   :  { %v2221_v53 = vpop.permute.xlu0 %2220 }
0x1642   :  { %2223 = vst.msk [vmem:[#allocation3 + $0x30] sm:$0xff] %vm311_vm5, %v2221_v53  ;;  %6148 = vmatmul.mubr.msk.f32.vlgmr.msra.gmra.mrb[24].mxu1 %vm311_vm5, %v2221_v53 }
0x1643   :  { %6660 = vmatpush3.bf16.msra.mxu1 %v7493_v58  ;;  %6169 = vmatprep.mubr.msk.f32.mxu1 %vm7258_vm4, %v7259_v27 }
0x1644   :  { %6661 = vmatprep.subr.bf16.mxu1 %v7257_v12 }
0x1647   :  { %6663 = vmatpush3.bf16.msra.mxu1 %v7509_v63 }
0x1648   :  { %6670 = vmatprep.subr.bf16.mxu1 %v7257_v12 }
0x1649   :  { %v2394_v55 = vpop.permute.xlu1 %2393 }
0x164a   :  { %6170 = vmatmul.mubr.msk.f32.vlgmr.msra.gmra.mrb[24].mxu1 %vm311_vm5, %v2394_v55 }
0x164b   :  { %6672 = vmatpush3.bf16.msra.mxu1 %v7393_v17  ;;  %6191 = vmatprep.mubr.msk.f32.mxu1 %vm7258_vm4, %v7259_v27 }
0x164c   :  { %6673 = vmatprep.subr.bf16.mxu1 %v7257_v12 }
0x164f   :  { %6675 = vmatpush3.bf16.msra.mxu1 %v7416_v23 }
0x1650   :  { %6682 = vmatprep.subr.bf16.mxu1 %v7257_v12 }
0x1652   :  { %6192 = vmatmul.mubr.msk.f32.vlgmr.msra.gmra.mrb[26].mxu1 %vm311_vm5, %v2394_v55 }
0x1653   :  { %6684 = vmatpush3.bf16.msra.mxu1 %v7366_v8  ;;  %6213 = vmatprep.mubr.msk.f32.mxu1 %vm7258_vm4, %v7259_v27 }
0x1654   :  { %6685 = vmatprep.subr.bf16.mxu1 %v7257_v12 }
0x1657   :  { %6687 = vmatpush3.bf16.msra.mxu1 %v7401_v19 }
0x1658   :  { %6694 = vmatprep.subr.bf16.mxu1 %v7257_v12 }
0x171d   :  { %v2463_v54 = vpop.f32.mrb[24].mxu1 }
0x171e   :  { %v6855_v56 = vadd.f32 %v7553_v13, %v2463_v54  ;;  %v6171_v6 = vpop.f32.mrb[25].mxu1 }
0x1720   :  { %7026 = vtanh.f32 %v6855_v56  ;;  %v5517_v13 = vmul.f32 -1.442695, %v6855_v56 }
0x1725   :  { %v2636_v60 = vpop.f32.mrb[26].mxu1 }
0x1726   :  { %v2640_v52 = vadd.f32 %v2636_v60, %v238_v59  ;;  %v6193_v61 = vpop.f32.mrb[27].mxu1 }
0x1728   :  { %7028 = vtanh.f32 %v2640_v52  ;;  %v5520_v1 = vmul.f32 -1.442695, %v2640_v52 }
0x1729   :  { %7030 = vpow2.f32 %v5517_v13 }
0x172a   :  { %v7027_v62 = vpop.eup %7026  ;;  %7032 = vpow2.f32 %v5520_v1 }
0x172b   :  { %2477 = vrot.lane.b32.xlu0 %v7027_v62, %s7260_s26 }
0x1732   :  { %v7029_v0 = vpop.eup %7028 }
0x1733   :  { %2650 = vrot.lane.b32.xlu1 %v7029_v0, %s7260_s26  ;;  %v7031_v7 = vpop.eup %7030 }
0x1734   :  { %v2471_v2 = vadd.f32 1.0, %v7031_v7  ;;  %v7033_v3 = vpop.eup %7032 }
0x1735   :  { %v2644_v11 = vadd.f32 1.0, %v7033_v3 }
0x1736   :  { %7034 = vrcp.f32 %v2471_v2 }
0x1737   :  { %7036 = vrcp.f32 %v2644_v11 }
0x1740   :  { %v7035_v30 = vpop.eup %7034 }
0x1741   :  { %v7037_v16 = vpop.eup %7036  ;;  %v2475_v20 = vmul.f32 %v7035_v30, %v7808_v43  ;;  %v7890_v43 = vld [vmem:[%s8587_s6] ss:$0 sm:$0xff] }
0x1742   :  { %v2648_v24 = vmul.f32 %v7037_v16, %v7812_v46  ;;  %v243_v46 = vadd.f32 %v7845_v57, %v7447_v28 }
0x179d   :  { %v2478_v14 = vpop.permute.xlu0 %2477 }
0x179e   :  { %v2480_v15 = vmul.f32 %v7035_v30, %v2478_v14 }
0x17a0   :  { %2482 = vrot.lane.b32.xlu0 %v2480_v15, %s7261_s5 }
0x17a5   :  { %v2651_v18 = vpop.permute.xlu1 %2650 }
0x17a6   :  { %v2653_v4 = vmul.f32 %v7037_v16, %v2651_v18 }
0x17a8   :  { %2655 = vrot.lane.b32.xlu1 %v2653_v4, %s7261_s5 }
0x1812   :  { %v2483_v21 = vpop.permute.xlu0 %2482 }
0x1813   :  { %v7854_v22 = vadd.f32 %v2483_v21, %v2475_v20 }
0x1815   :  { %7038 = vtanh.f32 %v7854_v22 }
0x181a   :  { %v2656_v25 = vpop.permute.xlu1 %2655 }
0x181b   :  { %v7858_v26 = vadd.f32 %v2656_v25, %v2648_v24  ;;  %v248_v25 = vadd.f32 %v7845_v57, %v7455_v33 }
0x181d   :  { %7040 = vtanh.f32 %v7858_v26 }
0x181f   :  { %v7039_v5 = vpop.eup %7038 }
0x1820   :  { %2488 = vrot.lane.b32.xlu0 %v7039_v5, %s7260_s26 }
0x1827   :  { %v7041_v38 = vpop.eup %7040 }
0x1828   :  { %2661 = vrot.lane.b32.xlu1 %v7041_v38, %s7260_s26 }
0x1892   :  { %v2489_v9 = vpop.permute.xlu0 %2488 }
0x1893   :  { %v2491_v31 = vmul.f32 %v7035_v30, %v2489_v9 }
0x1895   :  { %2493 = vrot.lane.b32.xlu0 %v2491_v31, %s7261_s5 }
0x189a   :  { %v2662_v29 = vpop.permute.xlu1 %2661 }
0x189b   :  { %v2664_v39 = vmul.f32 %v7037_v16, %v2662_v29 }
0x189d   :  { %2666 = vrot.lane.b32.xlu1 %v2664_v39, %s7261_s5 }
0x1907   :  { %v2494_v40 = vpop.permute.xlu0 %2493 }
0x1908   :  { %2496 = vst.msk [vmem:[#allocation3 + $0x38] sm:$0xff] %vm311_vm5, %v2494_v40  ;;  %6181 = vmatmul.mubr.msk.f32.vlgmr.msra.gmra.mrb[22].mxu0 %vm311_vm5, %v2494_v40 }
0x1909   :  { %6678 = vmatpush3.bf16.msra.mxu0 %v7493_v58  ;;  %6202 = vmatprep.mubr.msk.f32.mxu0 %vm7258_vm4, %v7259_v27 }
0x190a   :  { %6679 = vmatprep.subr.bf16.mxu0 %v7257_v12 }
0x190d   :  { %6681 = vmatpush3.bf16.msra.mxu0 %v7509_v63 }
0x190e   :  { %6688 = vmatprep.subr.bf16.mxu0 %v7257_v12 }
0x190f   :  { %v2667_v41 = vpop.permute.xlu1 %2666 }
0x1910   :  { %6203 = vmatmul.mubr.msk.f32.vlgmr.msra.gmra.mrb[22].mxu0 %vm311_vm5, %v2667_v41 }
0x1911   :  { %6690 = vmatpush3.bf16.msra.mxu0 %v7393_v17  ;;  %6224 = vmatprep.mubr.msk.f32.mxu0 %vm7258_vm4, %v7259_v27 }
0x1912   :  { %6691 = vmatprep.subr.bf16.mxu0 %v7257_v12 }
0x1915   :  { %6693 = vmatpush3.bf16.msra.mxu0 %v7416_v23 }
0x1916   :  { %6700 = vmatprep.subr.bf16.mxu0 %v7257_v12 }
0x1918   :  { %6225 = vmatmul.mubr.msk.f32.vlgmr.msra.gmra.mrb[24].mxu0 %vm311_vm5, %v2667_v41 }
0x1919   :  { %6702 = vmatpush3.bf16.msra.mxu0 %v7366_v8  ;;  %6246 = vmatprep.mubr.msk.f32.mxu0 %vm7258_vm4, %v7259_v27 }
0x191a   :  { %6703 = vmatprep.subr.bf16.mxu0 %v7257_v12 }
0x191d   :  { %6705 = vmatpush3.bf16.msra.mxu0 %v7401_v19 }
0x191e   :  { %6712 = vmatprep.subr.bf16.mxu0 %v7257_v12 }
0x19e3   :  { %v2736_v42 = vpop.f32.mrb[22].mxu0 }
0x19e4   :  { %v6856_v44 = vadd.f32 %v7890_v43, %v2736_v42  ;;  %v6204_v45 = vpop.f32.mrb[23].mxu0 }
0x19e6   :  { %7042 = vtanh.f32 %v6856_v44  ;;  %v5522_v51 = vmul.f32 -1.442695, %v6856_v44 }
0x19eb   :  { %v2909_v10 = vpop.f32.mrb[24].mxu0 }
0x19ec   :  { %v2913_v47 = vadd.f32 %v2909_v10, %v243_v46  ;;  %v6226_v48 = vpop.f32.mrb[25].mxu0 }
0x19ee   :  { %7044 = vtanh.f32 %v2913_v47  ;;  %v5525_v53 = vmul.f32 -1.442695, %v2913_v47 }
0x19ef   :  { %7046 = vpow2.f32 %v5522_v51 }
0x19f0   :  { %v7043_v49 = vpop.eup %7042  ;;  %7048 = vpow2.f32 %v5525_v53 }
0x19f1   :  { %2750 = vrot.lane.b32.xlu0 %v7043_v49, %s7260_s26 }
0x19f8   :  { %v7045_v50 = vpop.eup %7044 }
0x19f9   :  { %2923 = vrot.lane.b32.xlu1 %v7045_v50, %s7260_s26  ;;  %v7047_v55 = vpop.eup %7046 }
0x19fa   :  { %v2744_v54 = vadd.f32 1.0, %v7047_v55  ;;  %v7049_v56 = vpop.eup %7048 }
0x19fb   :  { %v2917_v6 = vadd.f32 1.0, %v7049_v56 }
0x19fc   :  { %7050 = vrcp.f32 %v2744_v54 }
0x19fd   :  { %7052 = vrcp.f32 %v2917_v6 }
0x1a06   :  { %v7051_v28 = vpop.eup %7050 }
0x1a07   :  { %v7053_v52 = vpop.eup %7052  ;;  %v2748_v0 = vmul.f32 %v7051_v28, %v7854_v22 }
0x1a08   :  { %v2921_v7 = vmul.f32 %v7053_v52, %v7858_v26 }
0x1a63   :  { %v2751_v59 = vpop.permute.xlu0 %2750 }
0x1a64   :  { %v2753_v60 = vmul.f32 %v7051_v28, %v2751_v59 }
0x1a66   :  { %2755 = vrot.lane.b32.xlu0 %v2753_v60, %s7261_s5 }
0x1a6b   :  { %v2924_v61 = vpop.permute.xlu1 %2923 }
0x1a6c   :  { %v2926_v62 = vmul.f32 %v7053_v52, %v2924_v61 }
0x1a6e   :  { %2928 = vrot.lane.b32.xlu1 %v2926_v62, %s7261_s5 }
0x1ad8   :  { %v2756_v13 = vpop.permute.xlu0 %2755 }
0x1ad9   :  { %v7900_v1 = vadd.f32 %v2756_v13, %v2748_v0 }
0x1adb   :  { %7054 = vtanh.f32 %v7900_v1 }
0x1ae0   :  { %v2929_v2 = vpop.permute.xlu1 %2928 }
0x1ae1   :  { %v7904_v3 = vadd.f32 %v2929_v2, %v2921_v7  ;;  %v253_v7 = vadd.f32 %v7845_v57, %v7453_v32 }
0x1ae3   :  { %7056 = vtanh.f32 %v7904_v3 }
0x1ae5   :  { %v7055_v11 = vpop.eup %7054 }
0x1ae6   :  { %2761 = vrot.lane.b32.xlu0 %v7055_v11, %s7260_s26 }
0x1aed   :  { %v7057_v30 = vpop.eup %7056 }
0x1aee   :  { %2934 = vrot.lane.b32.xlu1 %v7057_v30, %s7260_s26 }
0x1b58   :  { %v2762_v14 = vpop.permute.xlu0 %2761 }
0x1b59   :  { %v2764_v15 = vmul.f32 %v7051_v28, %v2762_v14 }
0x1b5b   :  { %2766 = vrot.lane.b32.xlu0 %v2764_v15, %s7261_s5 }
0x1b60   :  { %v2935_v16 = vpop.permute.xlu1 %2934 }
0x1b61   :  { %v2937_v18 = vmul.f32 %v7053_v52, %v2935_v16 }
0x1b63   :  { %2939 = vrot.lane.b32.xlu1 %v2937_v18, %s7261_s5 }
0x1bcd   :  { %v2767_v4 = vpop.permute.xlu0 %2766 }
0x1bce   :  { %2769 = vst.msk [vmem:[#allocation3 + $0x40] sm:$0xff] %vm311_vm5, %v2767_v4  ;;  %6214 = vmatmul.mubr.msk.f32.vlgmr.msra.gmra.mrb[28].mxu1 %vm311_vm5, %v2767_v4 }
0x1bcf   :  { %6696 = vmatpush3.bf16.msra.mxu1 %v7493_v58  ;;  %6235 = vmatprep.mubr.msk.f32.mxu1 %vm7258_vm4, %v7259_v27 }
0x1bd0   :  { %6697 = vmatprep.subr.bf16.mxu1 %v7257_v12 }
0x1bd3   :  { %6699 = vmatpush3.bf16.msra.mxu1 %v7509_v63 }
0x1bd4   :  { %6706 = vmatprep.subr.bf16.mxu1 %v7257_v12 }
0x1bd5   :  { %v2940_v20 = vpop.permute.xlu1 %2939 }
0x1bd6   :  { %6236 = vmatmul.mubr.msk.f32.vlgmr.msra.gmra.mrb[28].mxu1 %vm311_vm5, %v2940_v20 }
0x1bd7   :  { %6708 = vmatpush3.bf16.msra.mxu1 %v7393_v17  ;;  %6257 = vmatprep.mubr.msk.f32.mxu1 %vm7258_vm4, %v7259_v27 }
0x1bd8   :  { %6709 = vmatprep.subr.bf16.mxu1 %v7257_v12 }
0x1bdb   :  { %6711 = vmatpush3.bf16.msra.mxu1 %v7416_v23 }
0x1bdc   :  { %6718 = vmatprep.subr.bf16.mxu1 %v7257_v12 }
0x1bde   :  { %6258 = vmatmul.mubr.msk.f32.vlgmr.msra.gmra.mrb[30].mxu1 %vm311_vm5, %v2940_v20 }
0x1bdf   :  { %6720 = vmatpush3.bf16.msra.mxu1 %v7366_v8  ;;  %6279 = vmatprep.mubr.msk.f32.mxu1 %vm7258_vm4, %v7259_v27 }
0x1be0   :  { %6721 = vmatprep.subr.bf16.mxu1 %v7257_v12 }
0x1be3   :  { %6723 = vmatpush3.bf16.msra.mxu1 %v7401_v19 }
0x1be4   :  { %6730 = vmatprep.subr.bf16.mxu1 %v7257_v12 }
0x1ca9   :  { %v3009_v21 = vpop.f32.mrb[28].mxu1 }
0x1caa   :  { %v6857_v22 = vadd.f32 %v7890_v43, %v3009_v21  ;;  %v6237_v24 = vpop.f32.mrb[29].mxu1 }
0x1cac   :  { %7058 = vtanh.f32 %v6857_v22  ;;  %v5527_v29 = vmul.f32 -1.442695, %v6857_v22 }
0x1cb1   :  { %v3182_v26 = vpop.f32.mrb[30].mxu1 }
0x1cb2   :  { %v3186_v5 = vadd.f32 %v3182_v26, %v248_v25  ;;  %v6259_v38 = vpop.f32.mrb[31].mxu1 }
0x1cb4   :  { %7060 = vtanh.f32 %v3186_v5  ;;  %v5530_v39 = vmul.f32 -1.442695, %v3186_v5 }
0x1cb5   :  { %7062 = vpow2.f32 %v5527_v29 }
0x1cb6   :  { %v7059_v9 = vpop.eup %7058  ;;  %7064 = vpow2.f32 %v5530_v39 }
0x1cb7   :  { %3023 = vrot.lane.b32.xlu0 %v7059_v9, %s7260_s26 }
0x1cbe   :  { %v7061_v31 = vpop.eup %7060 }
0x1cbf   :  { %3196 = vrot.lane.b32.xlu1 %v7061_v31, %s7260_s26  ;;  %v7063_v40 = vpop.eup %7062 }
0x1cc0   :  { %v3017_v41 = vadd.f32 1.0, %v7063_v40  ;;  %v7065_v42 = vpop.eup %7064 }
0x1cc1   :  { %v3190_v44 = vadd.f32 1.0, %v7065_v42 }
0x1cc2   :  { %7066 = vrcp.f32 %v3017_v41 }
0x1cc3   :  { %7068 = vrcp.f32 %v3190_v44 }
0x1ccc   :  { %v7067_v33 = vpop.eup %7066 }
0x1ccd   :  { %v7069_v10 = vpop.eup %7068  ;;  %v3021_v49 = vmul.f32 %v7067_v33, %v7900_v1 }
0x1cce   :  { %v3194_v53 = vmul.f32 %v7069_v10, %v7904_v3 }
0x1d29   :  { %v3024_v45 = vpop.permute.xlu0 %3023 }
0x1d2a   :  { %v3026_v46 = vmul.f32 %v7067_v33, %v3024_v45 }
0x1d2c   :  { %3028 = vrot.lane.b32.xlu0 %v3026_v46, %s7261_s5 }
0x1d31   :  { %v3197_v47 = vpop.permute.xlu1 %3196 }
0x1d32   :  { %v3199_v48 = vmul.f32 %v7069_v10, %v3197_v47 }
0x1d34   :  { %3201 = vrot.lane.b32.xlu1 %v3199_v48, %s7261_s5 }
0x1d9e   :  { %v3029_v50 = vpop.permute.xlu0 %3028 }
0x1d9f   :  { %v7941_v51 = vadd.f32 %v3029_v50, %v3021_v49 }
0x1da1   :  { %7070 = vtanh.f32 %v7941_v51 }
0x1da6   :  { %v3202_v55 = vpop.permute.xlu1 %3201 }
0x1da7   :  { %v7945_v54 = vadd.f32 %v3202_v55, %v3194_v53 }
0x1da9   :  { %7072 = vtanh.f32 %v7945_v54 }
0x1dab   :  { %v7071_v56 = vpop.eup %7070 }
0x1dac   :  { %3034 = vrot.lane.b32.xlu0 %v7071_v56, %s7260_s26 }
0x1db3   :  { %v7073_v6 = vpop.eup %7072 }
0x1db4   :  { %3207 = vrot.lane.b32.xlu1 %v7073_v6, %s7260_s26 }
0x1e1e   :  { %v3035_v28 = vpop.permute.xlu0 %3034 }
0x1e1f   :  { %v3037_v59 = vmul.f32 %v7067_v33, %v3035_v28 }
0x1e21   :  { %3039 = vrot.lane.b32.xlu0 %v3037_v59, %s7261_s5 }
0x1e26   :  { %v3208_v60 = vpop.permute.xlu1 %3207 }
0x1e27   :  { %v3210_v52 = vmul.f32 %v7069_v10, %v3208_v60 }
0x1e29   :  { %3212 = vrot.lane.b32.xlu1 %v3210_v52, %s7261_s5 }
0x1e93   :  { %v3040_v61 = vpop.permute.xlu0 %3039 }
0x1e94   :  { %3042 = vst.msk [vmem:[#allocation3 + $0x48] sm:$0xff] %vm311_vm5, %v3040_v61  ;;  %6247 = vmatmul.mubr.msk.f32.vlgmr.msra.gmra.mrb[26].mxu0 %vm311_vm5, %v3040_v61 }
0x1e95   :  { %6714 = vmatpush3.bf16.msra.mxu0 %v7493_v58  ;;  %6268 = vmatprep.mubr.msk.f32.mxu0 %vm7258_vm4, %v7259_v27 }
0x1e96   :  { %6715 = vmatprep.subr.bf16.mxu0 %v7257_v12 }
0x1e99   :  { %6717 = vmatpush3.bf16.msra.mxu0 %v7509_v63 }
0x1e9a   :  { %6724 = vmatprep.subr.bf16.mxu0 %v7257_v12 }
0x1e9b   :  { %v3213_v62 = vpop.permute.xlu1 %3212 }
0x1e9c   :  { %6269 = vmatmul.mubr.msk.f32.vlgmr.msra.gmra.mrb[26].mxu0 %vm311_vm5, %v3213_v62 }
0x1e9d   :  { %6726 = vmatpush3.bf16.msra.mxu0 %v7393_v17  ;;  %6290 = vmatprep.mubr.msk.f32.mxu0 %vm7258_vm4, %v7259_v27 }
0x1e9e   :  { %6727 = vmatprep.subr.bf16.mxu0 %v7257_v12 }
0x1ea1   :  { %6729 = vmatpush3.bf16.msra.mxu0 %v7416_v23 }
0x1ea2   :  { %6736 = vmatprep.subr.bf16.mxu0 %v7257_v12 }
0x1ea4   :  { %6291 = vmatmul.mubr.msk.f32.vlgmr.msra.gmra.mrb[28].mxu0 %vm311_vm5, %v3213_v62 }
0x1ea5   :  { %6738 = vmatpush3.bf16.msra.mxu0 %v7366_v8  ;;  %6312 = vmatprep.mubr.msk.f32.mxu0 %vm7258_vm4, %v7259_v27 }
0x1ea6   :  { %6739 = vmatprep.subr.bf16.mxu0 %v7257_v12 }
0x1ea9   :  { %6741 = vmatpush3.bf16.msra.mxu0 %v7401_v19 }
0x1eaa   :  { %6748 = vmatprep.subr.bf16.mxu0 %v7257_v12 }
0x1f6f   :  { %v3282_v0 = vpop.f32.mrb[26].mxu0 }
0x1f70   :  { %v6858_v13 = vadd.f32 %v7890_v43, %v3282_v0  ;;  %v6270_v1 = vpop.f32.mrb[27].mxu0 }
0x1f72   :  { %7074 = vtanh.f32 %v6858_v13  ;;  %v5532_v15 = vmul.f32 -1.442695, %v6858_v13 }
0x1f77   :  { %v3455_v2 = vpop.f32.mrb[28].mxu0 }
0x1f78   :  { %v3459_v3 = vadd.f32 %v3455_v2, %v253_v7  ;;  %v6292_v11 = vpop.f32.mrb[29].mxu0 }
0x1f7a   :  { %7076 = vtanh.f32 %v3459_v3  ;;  %v5535_v16 = vmul.f32 -1.442695, %v3459_v3 }
0x1f7b   :  { %7078 = vpow2.f32 %v5532_v15 }
0x1f7c   :  { %v7075_v30 = vpop.eup %7074  ;;  %7080 = vpow2.f32 %v5535_v16 }
0x1f7d   :  { %3296 = vrot.lane.b32.xlu0 %v7075_v30, %s7260_s26 }
0x1f84   :  { %v7077_v14 = vpop.eup %7076 }
0x1f85   :  { %3469 = vrot.lane.b32.xlu1 %v7077_v14, %s7260_s26  ;;  %v7079_v18 = vpop.eup %7078 }
0x1f86   :  { %v3290_v4 = vadd.f32 1.0, %v7079_v18  ;;  %v7081_v20 = vpop.eup %7080 }
0x1f87   :  { %v3463_v21 = vadd.f32 1.0, %v7081_v20 }
0x1f88   :  { %7082 = vrcp.f32 %v3290_v4 }
0x1f89   :  { %7084 = vrcp.f32 %v3463_v21 }
0x1f92   :  { %v7083_v32 = vpop.eup %7082 }
0x1f93   :  { %v7085_v25 = vpop.eup %7084  ;;  %v3294_v38 = vmul.f32 %v7083_v32, %v7941_v51  ;;  %v258_v51 = vadd.f32 %v7845_v57, %v7459_v35 }
0x1f94   :  { %v3467_v29 = vmul.f32 %v7085_v25, %v7945_v54 }
0x1fef   :  { %v3297_v22 = vpop.permute.xlu0 %3296 }
0x1ff0   :  { %v3299_v24 = vmul.f32 %v7083_v32, %v3297_v22 }
0x1ff2   :  { %3301 = vrot.lane.b32.xlu0 %v3299_v24, %s7261_s5 }
0x1ff7   :  { %v3470_v26 = vpop.permute.xlu1 %3469 }
0x1ff8   :  { %v3472_v5 = vmul.f32 %v7085_v25, %v3470_v26 }
0x1ffa   :  { %3474 = vrot.lane.b32.xlu1 %v3472_v5, %s7261_s5 }
0x2064   :  { %v3302_v9 = vpop.permute.xlu0 %3301 }
0x2065   :  { %v7982_v31 = vadd.f32 %v3302_v9, %v3294_v38  ;;  %v263_v9 = vadd.f32 %v7845_v57, %v7457_v34 }
0x2067   :  { %7086 = vtanh.f32 %v7982_v31 }
0x206c   :  { %v3475_v39 = vpop.permute.xlu1 %3474 }
0x206d   :  { %v7986_v40 = vadd.f32 %v3475_v39, %v3467_v29 }
0x206f   :  { %7088 = vtanh.f32 %v7986_v40 }
0x2071   :  { %v7087_v41 = vpop.eup %7086 }
0x2072   :  { %3307 = vrot.lane.b32.xlu0 %v7087_v41, %s7260_s26 }
0x2079   :  { %v7089_v42 = vpop.eup %7088 }
0x207a   :  { %3480 = vrot.lane.b32.xlu1 %v7089_v42, %s7260_s26 }
0x20e4   :  { %v3308_v44 = vpop.permute.xlu0 %3307 }
0x20e5   :  { %v3310_v33 = vmul.f32 %v7083_v32, %v3308_v44 }
0x20e7   :  { %3312 = vrot.lane.b32.xlu0 %v3310_v33, %s7261_s5 }
0x20ec   :  { %v3481_v45 = vpop.permute.xlu1 %3480 }
0x20ed   :  { %v3483_v46 = vmul.f32 %v7085_v25, %v3481_v45 }
0x20ef   :  { %3485 = vrot.lane.b32.xlu1 %v3483_v46, %s7261_s5 }
0x2159   :  { %v3313_v10 = vpop.permute.xlu0 %3312 }
0x215a   :  { %3315 = vst.msk [vmem:[#allocation3 + $0x50] sm:$0xff] %vm311_vm5, %v3313_v10  ;;  %6280 = vmatmul.mubr.msk.f32.vlgmr.msra.gmra.mrb[32].mxu1 %vm311_vm5, %v3313_v10 }
0x215b   :  { %6732 = vmatpush3.bf16.msra.mxu1 %v7493_v58  ;;  %6301 = vmatprep.mubr.msk.f32.mxu1 %vm7258_vm4, %v7259_v27 }
0x215c   :  { %6733 = vmatprep.subr.bf16.mxu1 %v7257_v12 }
0x215f   :  { %6735 = vmatpush3.bf16.msra.mxu1 %v7509_v63 }
0x2160   :  { %6742 = vmatprep.subr.bf16.mxu1 %v7257_v12 }
0x2161   :  { %v3486_v47 = vpop.permute.xlu1 %3485 }
0x2162   :  { %6302 = vmatmul.mubr.msk.f32.vlgmr.msra.gmra.mrb[32].mxu1 %vm311_vm5, %v3486_v47 }
0x2163   :  { %6744 = vmatpush3.bf16.msra.mxu1 %v7393_v17  ;;  %6323 = vmatprep.mubr.msk.f32.mxu1 %vm7258_vm4, %v7259_v27 }
0x2164   :  { %6745 = vmatprep.subr.bf16.mxu1 %v7257_v12 }
0x2167   :  { %6747 = vmatpush3.bf16.msra.mxu1 %v7416_v23 }
0x2168   :  { %6754 = vmatprep.subr.bf16.mxu1 %v7257_v12 }
0x216a   :  { %6324 = vmatmul.mubr.msk.f32.vlgmr.msra.gmra.mrb[34].mxu1 %vm311_vm5, %v3486_v47 }
0x216b   :  { %6756 = vmatpush3.bf16.msra.mxu1 %v7366_v8  ;;  %6345 = vmatprep.mubr.msk.f32.mxu1 %vm7258_vm4, %v7259_v27 }
0x216c   :  { %6757 = vmatprep.subr.bf16.mxu1 %v7257_v12 }
0x216f   :  { %6759 = vmatpush3.bf16.msra.mxu1 %v7401_v19 }
0x2170   :  { %6766 = vmatprep.subr.bf16.mxu1 %v7257_v12 }
0x2235   :  { %v3555_v48 = vpop.f32.mrb[32].mxu1 }
0x2236   :  { %v6859_v49 = vadd.f32 %v7890_v43, %v3555_v48  ;;  %v6303_v50 = vpop.f32.mrb[33].mxu1 }
0x2238   :  { %7090 = vtanh.f32 %v6859_v49  ;;  %v5537_v28 = vmul.f32 -1.442695, %v6859_v49 }
0x223d   :  { %v3728_v53 = vpop.f32.mrb[34].mxu1 }
0x223e   :  { %v3732_v55 = vadd.f32 %v3728_v53, %v258_v51  ;;  %v6325_v54 = vpop.f32.mrb[35].mxu1 }
0x2240   :  { %7092 = vtanh.f32 %v3732_v55  ;;  %v5540_v59 = vmul.f32 -1.442695, %v3732_v55 }
0x2241   :  { %7094 = vpow2.f32 %v5537_v28 }
0x2242   :  { %v7091_v56 = vpop.eup %7090  ;;  %7096 = vpow2.f32 %v5540_v59 }
0x2243   :  { %3569 = vrot.lane.b32.xlu0 %v7091_v56, %s7260_s26 }
0x224a   :  { %v7093_v6 = vpop.eup %7092 }
0x224b   :  { %3742 = vrot.lane.b32.xlu1 %v7093_v6, %s7260_s26  ;;  %v7095_v60 = vpop.eup %7094 }
0x224c   :  { %v3563_v52 = vadd.f32 1.0, %v7095_v60  ;;  %v7097_v61 = vpop.eup %7096 }
0x224d   :  { %v3736_v62 = vadd.f32 1.0, %v7097_v61 }
0x224e   :  { %7098 = vrcp.f32 %v3563_v52 }
0x224f   :  { %7100 = vrcp.f32 %v3736_v62 }
0x2258   :  { %v7099_v35 = vpop.eup %7098 }
0x2259   :  { %v7101_v1 = vpop.eup %7100  ;;  %v3567_v3 = vmul.f32 %v7099_v35, %v7982_v31 }
0x225a   :  { %v3740_v14 = vmul.f32 %v7101_v1, %v7986_v40 }
0x22b5   :  { %v3570_v0 = vpop.permute.xlu0 %3569 }
0x22b6   :  { %v3572_v13 = vmul.f32 %v7099_v35, %v3570_v0 }
0x22b8   :  { %3574 = vrot.lane.b32.xlu0 %v3572_v13, %s7261_s5 }
0x22bd   :  { %v3743_v7 = vpop.permute.xlu1 %3742 }
0x22be   :  { %v3745_v2 = vmul.f32 %v7101_v1, %v3743_v7 }
0x22c0   :  { %3747 = vrot.lane.b32.xlu1 %v3745_v2, %s7261_s5 }
0x232a   :  { %v3575_v11 = vpop.permute.xlu0 %3574 }
0x232b   :  { %v8023_v30 = vadd.f32 %v3575_v11, %v3567_v3  ;;  %v268_v3 = vadd.f32 %v7845_v57, %v7463_v37 }
0x232d   :  { %7102 = vtanh.f32 %v8023_v30 }
0x2332   :  { %v3748_v15 = vpop.permute.xlu1 %3747 }
0x2333   :  { %v8027_v16 = vadd.f32 %v3748_v15, %v3740_v14 }
0x2335   :  { %7104 = vtanh.f32 %v8027_v16 }
0x2337   :  { %v7103_v18 = vpop.eup %7102 }
0x2338   :  { %3580 = vrot.lane.b32.xlu0 %v7103_v18, %s7260_s26 }
0x233f   :  { %v7105_v4 = vpop.eup %7104 }
0x2340   :  { %3753 = vrot.lane.b32.xlu1 %v7105_v4, %s7260_s26 }
0x23aa   :  { %v3581_v20 = vpop.permute.xlu0 %3580 }
0x23ab   :  { %v3583_v21 = vmul.f32 %v7099_v35, %v3581_v20 }
0x23ad   :  { %3585 = vrot.lane.b32.xlu0 %v3583_v21, %s7261_s5 }
0x23b2   :  { %v3754_v32 = vpop.permute.xlu1 %3753 }
0x23b3   :  { %v3756_v22 = vmul.f32 %v7101_v1, %v3754_v32 }
0x23b5   :  { %3758 = vrot.lane.b32.xlu1 %v3756_v22, %s7261_s5 }
0x241f   :  { %v3586_v24 = vpop.permute.xlu0 %3585 }
0x2420   :  { %3588 = vst.msk [vmem:[#allocation3 + $0x58] sm:$0xff] %vm311_vm5, %v3586_v24  ;;  %6313 = vmatmul.mubr.msk.f32.vlgmr.msra.gmra.mrb[30].mxu0 %vm311_vm5, %v3586_v24 }
0x2421   :  { %6750 = vmatpush3.bf16.msra.mxu0 %v7493_v58  ;;  %6334 = vmatprep.mubr.msk.f32.mxu0 %vm7258_vm4, %v7259_v27 }
0x2422   :  { %6751 = vmatprep.subr.bf16.mxu0 %v7257_v12 }
0x2425   :  { %6753 = vmatpush3.bf16.msra.mxu0 %v7509_v63 }
0x2426   :  { %6760 = vmatprep.subr.bf16.mxu0 %v7257_v12 }
0x2427   :  { %v3759_v25 = vpop.permute.xlu1 %3758 }
0x2428   :  { %6335 = vmatmul.mubr.msk.f32.vlgmr.msra.gmra.mrb[30].mxu0 %vm311_vm5, %v3759_v25 }
0x2429   :  { %6762 = vmatpush3.bf16.msra.mxu0 %v7393_v17  ;;  %6356 = vmatprep.mubr.msk.f32.mxu0 %vm7258_vm4, %v7259_v27 }
0x242a   :  { %6763 = vmatprep.subr.bf16.mxu0 %v7257_v12 }
0x242d   :  { %6765 = vmatpush3.bf16.msra.mxu0 %v7416_v23 }
0x242e   :  { %6772 = vmatprep.subr.bf16.mxu0 %v7257_v12 }
0x2430   :  { %6357 = vmatmul.mubr.msk.f32.vlgmr.msra.gmra.mrb[32].mxu0 %vm311_vm5, %v3759_v25 }
0x2431   :  { %6774 = vmatpush3.bf16.msra.mxu0 %v7366_v8  ;;  %6378 = vmatprep.mubr.msk.f32.mxu0 %vm7258_vm4, %v7259_v27 }
0x2432   :  { %6775 = vmatprep.subr.bf16.mxu0 %v7257_v12 }
0x2435   :  { %6777 = vmatpush3.bf16.msra.mxu0 %v7401_v19 }
0x2436   :  { %6784 = vmatprep.subr.bf16.mxu0 %v7257_v12 }
0x24fb   :  { %v3828_v26 = vpop.f32.mrb[30].mxu0 }
0x24fc   :  { %v6860_v5 = vadd.f32 %v7890_v43, %v3828_v26  ;;  %v6336_v38 = vpop.f32.mrb[31].mxu0 }
0x24fe   :  { %7106 = vtanh.f32 %v6860_v5  ;;  %v5542_v42 = vmul.f32 -1.442695, %v6860_v5 }
0x2503   :  { %v4001_v31 = vpop.f32.mrb[32].mxu0 }
0x2504   :  { %v4005_v29 = vadd.f32 %v4001_v31, %v263_v9  ;;  %v6358_v39 = vpop.f32.mrb[33].mxu0 }
0x2506   :  { %7108 = vtanh.f32 %v4005_v29  ;;  %v5545_v44 = vmul.f32 -1.442695, %v4005_v29 }
0x2507   :  { %7110 = vpow2.f32 %v5542_v42 }
0x2508   :  { %v7107_v40 = vpop.eup %7106  ;;  %7112 = vpow2.f32 %v5545_v44 }
0x2509   :  { %3842 = vrot.lane.b32.xlu0 %v7107_v40, %s7260_s26 }
0x2510   :  { %v7109_v41 = vpop.eup %7108 }
0x2511   :  { %4015 = vrot.lane.b32.xlu1 %v7109_v41, %s7260_s26  ;;  %v7111_v33 = vpop.eup %7110 }
0x2512   :  { %v3836_v45 = vadd.f32 1.0, %v7111_v33  ;;  %v7113_v46 = vpop.eup %7112 }
0x2513   :  { %v4009_v10 = vadd.f32 1.0, %v7113_v46 }
0x2514   :  { %7114 = vrcp.f32 %v3836_v45 }
0x2515   :  { %7116 = vrcp.f32 %v4009_v10  ;;  %v4697_v10 = vld [vmem:[%s8588_s7] sm:$0xff] }
0x251e   :  { %v7115_v34 = vpop.eup %7114 }
0x251f   :  { %v7117_v49 = vpop.eup %7116  ;;  %v3840_v53 = vmul.f32 %v7115_v34, %v8023_v30 }
0x2520   :  { %v4013_v56 = vmul.f32 %v7117_v49, %v8027_v16 }
0x257b   :  { %v3843_v47 = vpop.permute.xlu0 %3842 }
0x257c   :  { %v3845_v48 = vmul.f32 %v7115_v34, %v3843_v47 }
0x257e   :  { %3847 = vrot.lane.b32.xlu0 %v3845_v48, %s7261_s5  ;;  %v4699_v48 = vld [vmem:[%s8588_s7 + $0x10] sm:$0xff] }
0x2583   :  { %v4016_v50 = vpop.permute.xlu1 %4015 }
0x2584   :  { %v4018_v51 = vmul.f32 %v7117_v49, %v4016_v50 }
0x2586   :  { %4020 = vrot.lane.b32.xlu1 %v4018_v51, %s7261_s5  ;;  %v8148_v51 = vld [vmem:[#allocation3 + $0x8] sm:$0xff] }
0x25f0   :  { %v3848_v55 = vpop.permute.xlu0 %3847 }
0x25f1   :  { %v8064_v54 = vadd.f32 %v3848_v55, %v3840_v53  ;;  %v8156_v53 = vld [vmem:[#allocation3 + $0x18] sm:$0xff]  ;;  %v8160_v55 = vld [vmem:[#allocation3 + $0x20] sm:$0xff] }
0x25f3   :  { %7118 = vtanh.f32 %v8064_v54 }
0x25f8   :  { %v4021_v6 = vpop.permute.xlu1 %4020 }
0x25f9   :  { %v8068_v28 = vadd.f32 %v4021_v6, %v4013_v56  ;;  %v8168_v56 = vld [vmem:[#allocation3 + $0x30] sm:$0xff]  ;;  %v8172_v6 = vld [vmem:[#allocation3 + $0x38] sm:$0xff] }
0x25fb   :  { %7120 = vtanh.f32 %v8068_v28 }
0x25fd   :  { %v7119_v59 = vpop.eup %7118 }
0x25fe   :  { %3853 = vrot.lane.b32.xlu0 %v7119_v59, %s7260_s26  ;;  %v8180_v59 = vld [vmem:[#allocation3 + $0x48] sm:$0xff] }
0x2605   :  { %v7121_v60 = vpop.eup %7120 }
0x2606   :  { %4026 = vrot.lane.b32.xlu1 %v7121_v60, %s7260_s26  ;;  %v8184_v60 = vld [vmem:[#allocation3 + $0x50] sm:$0xff] }
0x2670   :  { %v3854_v52 = vpop.permute.xlu0 %3853 }
0x2671   :  { %v3856_v61 = vmul.f32 %v7115_v34, %v3854_v52  ;;  %v4698_v34 = vld [vmem:[%s8588_s7 + $0x8] sm:$0xff]  ;;  %v8188_v52 = vld [vmem:[#allocation3 + $0x58] sm:$0xff] }
0x2672   :  { %v6808_v47 = vpack.c.bf16 %v4698_v34, %v4697_v10 }
0x2673   :  { %3858 = vrot.lane.b32.xlu0 %v3856_v61, %s7261_s5 }
0x2678   :  { %v4027_v62 = vpop.permute.xlu1 %4026 }
0x2679   :  { %v4029_v35 = vmul.f32 %v7117_v49, %v4027_v62  ;;  %v4700_v49 = vld [vmem:[%s8588_s7 + $0x18] sm:$0xff] }
0x267a   :  { %v6812_v50 = vpack.c.bf16 %v4700_v49, %v4699_v48 }
0x267b   :  { %4031 = vrot.lane.b32.xlu1 %v4029_v35, %s7261_s5 }
0x26e5   :  { %v3859_v0 = vpop.permute.xlu0 %3858 }
0x26e6   :  { %3861 = vst.msk [vmem:[#allocation3 + $0x60] sm:$0xff] %vm311_vm5, %v3859_v0  ;;  %6346 = vmatmul.mubr.msk.f32.vlgmr.msra.gmra.mrb[36].mxu1 %vm311_vm5, %v3859_v0 }
0x26e7   :  { %6768 = vmatpush3.bf16.msra.mxu1 %v7493_v58  ;;  %6367 = vmatprep.mubr.msk.f32.mxu1 %vm7258_vm4, %v7259_v27 }
0x26e8   :  { %6769 = vmatprep.subr.bf16.mxu1 %v7257_v12 }
0x26eb   :  { %6771 = vmatpush3.bf16.msra.mxu1 %v7509_v63 }
0x26ec   :  { %6778 = vmatprep.subr.bf16.mxu1 %v7257_v12 }
0x26ed   :  { %v4032_v13 = vpop.permute.xlu1 %4031  ;;  %v8192_v61 = vld [vmem:[#allocation3 + $0x60] sm:$0xff] }
0x26ee   :  { %6368 = vmatmul.mubr.msk.f32.vlgmr.msra.gmra.mrb[36].mxu1 %vm311_vm5, %v4032_v13 }
0x26ef   :  { %6780 = vmatpush3.bf16.msra.mxu1 %v7393_v17  ;;  %6389 = vmatprep.mubr.msk.f32.mxu1 %vm7258_vm4, %v7259_v27 }
0x26f0   :  { %6781 = vmatprep.subr.bf16.mxu1 %v7257_v12 }
0x26f3   :  { %6783 = vmatpush3.bf16.msra.mxu1 %v7416_v23 }
0x26f4   :  { %6790 = vmatprep.subr.bf16.mxu1 %v7257_v12 }
0x26f6   :  { %6390 = vmatmul.mubr.msk.f32.vlgmr.msra.gmra.mrb[38].mxu1 %vm311_vm5, %v4032_v13 }
0x26f7   :  { %6792 = vmatpush3.bf16.msra.mxu1 %v7366_v8  ;;  %6411 = vmatprep.mubr.msk.f32.mxu1 %vm7258_vm4, %v7259_v27 }
0x26f8   :  { %6793 = vmatprep.subr.bf16.mxu1 %v7257_v12 }
0x26fb   :  { %6795 = vmatpush3.bf16.msra.mxu1 %v7401_v19 }
0x26fc   :  { %6802 = vmatprep.subr.bf16.mxu1 %v7257_v12 }
0x27c1   :  { %v4101_v1 = vpop.f32.mrb[36].mxu1 }
0x27c2   :  { %v6861_v7 = vadd.f32 %v7890_v43, %v4101_v1  ;;  %v6369_v2 = vpop.f32.mrb[37].mxu1  ;;  %v7230_v1 = vld [vmem:[%s8584_s3] ss:$0 sm:$0xff] }
0x27c4   :  { %7122 = vtanh.f32 %v6861_v7  ;;  %v5547_v19 = vmul.f32 -1.442695, %v6861_v7  ;;  %v273_v7 = vadd.f32 %v7230_v1, %v7461_v36 }
0x27c9   :  { %v4274_v11 = vpop.f32.mrb[38].mxu1 }
0x27ca   :  { %v4278_v30 = vadd.f32 %v4274_v11, %v268_v3  ;;  %v6391_v8 = vpop.f32.mrb[39].mxu1 }
0x27cc   :  { %7124 = vtanh.f32 %v4278_v30  ;;  %v5550_v16 = vmul.f32 -1.442695, %v4278_v30 }
0x27cd   :  { %7126 = vpow2.f32 %v5547_v19 }
0x27ce   :  { %v7123_v14 = vpop.eup %7122  ;;  %7128 = vpow2.f32 %v5550_v16 }
0x27cf   :  { %4115 = vrot.lane.b32.xlu0 %v7123_v14, %s7260_s26 }
0x27d6   :  { %v7125_v15 = vpop.eup %7124 }
0x27d7   :  { %4288 = vrot.lane.b32.xlu1 %v7125_v15, %s7260_s26  ;;  %v7127_v18 = vpop.eup %7126 }
0x27d8   :  { %v4109_v4 = vadd.f32 1.0, %v7127_v18  ;;  %v7129_v20 = vpop.eup %7128 }
0x27d9   :  { %v4282_v21 = vadd.f32 1.0, %v7129_v20 }
0x27da   :  { %7130 = vrcp.f32 %v4109_v4 }
0x27db   :  { %7132 = vrcp.f32 %v4282_v21 }
0x27e4   :  { %v7131_v37 = vpop.eup %7130 }
0x27e5   :  { %v7133_v22 = vpop.eup %7132  ;;  %v4113_v26 = vmul.f32 %v7131_v37, %v8064_v54  ;;  %v8164_v54 = vld [vmem:[#allocation3 + $0x28] sm:$0xff] }
0x27e6   :  { %v4286_v9 = vmul.f32 %v7133_v22, %v8068_v28  ;;  %v8176_v28 = vld [vmem:[#allocation3 + $0x40] sm:$0xff] }
0x2841   :  { %v4116_v57 = vpop.permute.xlu0 %4115 }
0x2842   :  { %v4118_v32 = vmul.f32 %v7131_v37, %v4116_v57 }
0x2844   :  { %4120 = vrot.lane.b32.xlu0 %v4118_v32, %s7261_s5 }
0x2849   :  { %v4289_v24 = vpop.permute.xlu1 %4288 }
0x284a   :  { %v4291_v25 = vmul.f32 %v7133_v22, %v4289_v24 }
0x284c   :  { %4293 = vrot.lane.b32.xlu1 %v4291_v25, %s7261_s5 }
0x28b6   :  { %v4121_v5 = vpop.permute.xlu0 %4120 }
0x28b7   :  { %v8105_v38 = vadd.f32 %v4121_v5, %v4113_v26 }
0x28b9   :  { %7134 = vtanh.f32 %v8105_v38 }
0x28be   :  { %v4294_v31 = vpop.permute.xlu1 %4293 }
0x28bf   :  { %v8109_v29 = vadd.f32 %v4294_v31, %v4286_v9 }
0x28c1   :  { %7136 = vtanh.f32 %v8109_v29 }
0x28c3   :  { %v7135_v39 = vpop.eup %7134 }
0x28c4   :  { %4126 = vrot.lane.b32.xlu0 %v7135_v39, %s7260_s26 }
0x28cb   :  { %v7137_v40 = vpop.eup %7136 }
0x28cc   :  { %4299 = vrot.lane.b32.xlu1 %v7137_v40, %s7260_s26 }
0x2936   :  { %v4127_v41 = vpop.permute.xlu0 %4126 }
0x2937   :  { %v4129_v42 = vmul.f32 %v7131_v37, %v4127_v41 }
0x2939   :  { %4131 = vrot.lane.b32.xlu0 %v4129_v42, %s7261_s5 }
0x293e   :  { %v4300_v44 = vpop.permute.xlu1 %4299 }
0x293f   :  { %v4302_v33 = vmul.f32 %v7133_v22, %v4300_v44 }
0x2941   :  { %4304 = vrot.lane.b32.xlu1 %v4302_v33, %s7261_s5 }
0x29ab   :  { %v4132_v45 = vpop.permute.xlu0 %4131 }
0x29ac   :  { %4134 = vst.msk [vmem:[#allocation3 + $0x68] sm:$0xff] %vm311_vm5, %v4132_v45  ;;  %6379 = vmatmul.mubr.msk.f32.vlgmr.msra.gmra.mrb[34].mxu0 %vm311_vm5, %v4132_v45 }
0x29ad   :  { %6786 = vmatpush3.bf16.msra.mxu0 %v7493_v58  ;;  %6400 = vmatprep.mubr.msk.f32.mxu0 %vm7258_vm4, %v7259_v27 }
0x29ae   :  { %6787 = vmatprep.subr.bf16.mxu0 %v7257_v12 }
0x29b1   :  { %6789 = vmatpush3.bf16.msra.mxu0 %v7509_v63 }
0x29b2   :  { %6796 = vmatprep.subr.bf16.mxu0 %v7257_v12 }
0x29b3   :  { %v4305_v46 = vpop.permute.xlu1 %4304  ;;  %v8196_v62 = vld [vmem:[#allocation3 + $0x68] sm:$0xff] }
0x29b4   :  { %6401 = vmatmul.mubr.msk.f32.vlgmr.msra.gmra.mrb[34].mxu0 %vm311_vm5, %v4305_v46 }
0x29b5   :  { %6798 = vmatpush3.bf16.msra.mxu0 %v7393_v17  ;;  %6422 = vmatprep.mubr.msk.f32.mxu0 %vm7258_vm4, %v7259_v27  ;;  %v8143_v17 = vld [vmem:[#allocation3] sm:$0xff] }
0x29b6   :  { %6799 = vmatprep.subr.bf16.mxu0 %v7257_v12 }
0x29b9   :  { %6801 = vmatpush3.bf16.msra.mxu0 %v7416_v23  ;;  %v8152_v23 = vld [vmem:[#allocation3 + $0x10] sm:$0xff] }
0x29ba   :  { %6809 = vmatprep.subr.bf16.mxu0 %v6808_v47 }
0x29bc   :  { %6423 = vmatmul.mubr.msk.f32.vlgmr.msra.gmra.mrb[36].mxu0 %vm311_vm5, %v4305_v46 }
0x29bd   :  { %6811 = vmatpush3.bf16.msra.mxu0 %v6808_v47  ;;  %6444 = vmatprep.mubr.msk.f32.mxu0 %vm311_vm5, %v8143_v17 }
0x29be   :  { %6813 = vmatprep.subr.bf16.mxu0 %v6812_v50 }
0x29c1   :  { %6815 = vmatpush3.bf16.msra.mxu0 %v6812_v50 }
0x29c2   :  { %6822 = vmatprep.subr.bf16.mxu0 %v7257_v12 }
0x29c4   :  { %6445 = vmatmul.mubr.msk.f32.vlgmr.msra.gmra.mrb[38].mxu0 %vm311_vm5, %v8148_v51 }
0x29c5   :  { %6447 = vmatprep.mubr.msk.f32.mxu0 %vm311_vm5, %v8152_v23 }
0x29c8   :  { %6448 = vmatmul.mubr.msk.f32.gmra.mrb[40].mxu0 %vm311_vm5, %v8156_v53 }
0x29c9   :  { %6450 = vmatprep.mubr.msk.f32.mxu0 %vm311_vm5, %v8160_v55 }
0x29cc   :  { %6451 = vmatmul.mubr.msk.f32.gmra.mrb[42].mxu0 %vm311_vm5, %v8164_v54 }
0x29cd   :  { %6453 = vmatprep.mubr.msk.f32.mxu0 %vm311_vm5, %v8168_v56 }
0x29d0   :  { %6454 = vmatmul.mubr.msk.f32.gmra.mrb[44].mxu0 %vm311_vm5, %v8172_v6 }
0x29d1   :  { %6456 = vmatprep.mubr.msk.f32.mxu0 %vm311_vm5, %v8176_v28 }
0x29d4   :  { %6457 = vmatmul.mubr.msk.f32.gmra.mrb[46].mxu0 %vm311_vm5, %v8180_v59 }
0x29d5   :  { %6459 = vmatprep.mubr.msk.f32.mxu0 %vm311_vm5, %v8184_v60 }
0x29d8   :  { %6460 = vmatmul.mubr.msk.f32.gmra.mrb[48].mxu0 %vm311_vm5, %v8188_v52 }
0x29d9   :  { %6462 = vmatprep.mubr.msk.f32.mxu0 %vm311_vm5, %v8192_v61 }
0x29dc   :  { %6463 = vmatmul.mubr.msk.f32.gmra.mrb[50].mxu0 %vm311_vm5, %v8196_v62 }
0x2a87   :  { %v4374_v35 = vpop.f32.mrb[34].mxu0 }
0x2a88   :  { %v6862_v0 = vadd.f32 %v7890_v43, %v4374_v35  ;;  %v6402_v13 = vpop.f32.mrb[35].mxu0 }
0x2a8a   :  { %7138 = vtanh.f32 %v6862_v0  ;;  %v5552_v24 = vmul.f32 -1.442695, %v6862_v0 }
0x2a8f   :  { %v4547_v2 = vpop.f32.mrb[36].mxu0 }
0x2a90   :  { %v4551_v3 = vadd.f32 %v4547_v2, %v273_v7  ;;  %v6424_v11 = vpop.f32.mrb[37].mxu0  ;;  %v7231_v2 = vld [vmem:[%s8587_s6] ss:$0 sm:$0xff] }
0x2a92   :  { %7140 = vtanh.f32 %v4551_v3  ;;  %v5555_v25 = vmul.f32 -1.442695, %v4551_v3 }
0x2a93   :  { %7142 = vpow2.f32 %v5552_v24 }
0x2a94   :  { %v7139_v30 = vpop.eup %7138  ;;  %7144 = vpow2.f32 %v5555_v25 }
0x2a95   :  { %4388 = vrot.lane.b32.xlu0 %v7139_v30, %s7260_s26 }
0x2a97   :  { %v8206_v8 = vpop.f32.mrb[38].mxu0 }
0x2a98   :  { %v8208_v14 = vpop.f32.mrb[39].mxu0 }
0x2a9b   :  { %v8210_v43 = vpop.f32.mrb[40].mxu0 }
0x2a9c   :  { %v7141_v15 = vpop.eup %7140  ;;  %v8212_v19 = vpop.f32.mrb[41].mxu0 }
0x2a9d   :  { %4561 = vrot.lane.b32.xlu1 %v7141_v15, %s7260_s26  ;;  %v7143_v26 = vpop.eup %7142 }
0x2a9e   :  { %v4382_v5 = vadd.f32 1.0, %v7143_v26  ;;  %v7145_v9 = vpop.eup %7144 }
0x2a9f   :  { %v8215_v16 = vpop.f32.mrb[42].mxu0  ;;  %v4555_v31 = vadd.f32 1.0, %v7145_v9 }
0x2aa0   :  { %v8217_v36 = vpop.f32.mrb[43].mxu0  ;;  %7146 = vrcp.f32 %v4382_v5 }
0x2aa1   :  { %7148 = vrcp.f32 %v4555_v31 }
0x2aa3   :  { %v8219_v18 = vpop.f32.mrb[44].mxu0 }
0x2aa4   :  { %v8221_v4 = vpop.f32.mrb[45].mxu0 }
0x2aa7   :  { %v8223_v20 = vpop.f32.mrb[46].mxu0 }
0x2aa8   :  { %v8225_v21 = vpop.f32.mrb[47].mxu0 }
0x2aaa   :  { %v7147_v39 = vpop.eup %7146 }
0x2aab   :  { %v8227_v37 = vpop.f32.mrb[48].mxu0  ;;  %v7149_v42 = vpop.eup %7148  ;;  %v4386_v45 = vmul.f32 %v7147_v39, %v8105_v38 }
0x2aac   :  { %v8229_v57 = vpop.f32.mrb[49].mxu0  ;;  %v4559_v34 = vmul.f32 %v7149_v42, %v8109_v29 }
0x2aaf   :  { %v8231_v32 = vpop.f32.mrb[50].mxu0 }
0x2ab0   :  { %v8233_v22 = vpop.f32.mrb[51].mxu0 }
0x2b07   :  { %v4389_v40 = vpop.permute.xlu0 %4388 }
0x2b08   :  { %v4391_v41 = vmul.f32 %v7147_v39, %v4389_v40 }
0x2b0a   :  { %4393 = vrot.lane.b32.xlu0 %v4391_v41, %s7261_s5  ;;  %v8267_v41 = vld [vmem:[%s8589_s8] ss:$0 sm:$0xff] }
0x2b0f   :  { %v4562_v44 = vpop.permute.xlu1 %4561 }
0x2b10   :  { %v4564_v33 = vmul.f32 %v7149_v42, %v4562_v44  ;;  %v4833_v44 = vadd.f32 %v8267_v41, %v8212_v19 }
0x2b12   :  { %4566 = vrot.lane.b32.xlu1 %v4564_v33, %s7261_s5  ;;  %v4838_v33 = vadd.f32 %v8210_v43, %v8267_v41  ;;  %v4868_v43 = vadd.f32 %v8223_v20, %v8267_v41  ;;  %v4888_v20 = vadd.f32 %v8231_v32, %v8267_v41 }
0x2b7c   :  { %v4394_v46 = vpop.permute.xlu0 %4393 }
0x2b7d   :  { %v4396_v10 = vadd.f32 %v4394_v46, %v4386_v45  ;;  %v4848_v45 = vadd.f32 %v8215_v16, %v8267_v41 }
0x2b7f   :  { %7150 = vtanh.f32 %v4396_v10 }
0x2b84   :  { %v4567_v47 = vpop.permute.xlu1 %4566 }
0x2b85   :  { %v4569_v48 = vadd.f32 %v4567_v47, %v4559_v34 }
0x2b87   :  { %7152 = vtanh.f32 %v4569_v48 }
0x2b89   :  { %v7151_v49 = vpop.eup %7150 }
0x2b8a   :  { %4399 = vrot.lane.b32.xlu0 %v7151_v49, %s7260_s26  ;;  %v4878_v49 = vadd.f32 %v8227_v37, %v8267_v41 }
0x2b91   :  { %v7153_v50 = vpop.eup %7152 }
0x2b92   :  { %4572 = vrot.lane.b32.xlu1 %v7153_v50, %s7260_s26 }
0x2bfc   :  { %v4400_v35 = vpop.permute.xlu0 %4399 }
0x2bfd   :  { %v4402_v0 = vmul.f32 %v7147_v39, %v4400_v35 }
0x2bff   :  { %4404 = vrot.lane.b32.xlu0 %v4402_v0, %s7261_s5 }
0x2c04   :  { %v4573_v13 = vpop.permute.xlu1 %4572 }
0x2c05   :  { %v4575_v38 = vmul.f32 %v7149_v42, %v4573_v13  ;;  %v4823_v42 = vadd.f32 %v8267_v41, %v8208_v14  ;;  %v4858_v14 = vadd.f32 %v8219_v18, %v8267_v41 }
0x2c07   :  { %4577 = vrot.lane.b32.xlu1 %v4575_v38, %s7261_s5 }
0x2c71   :  { %v4405_v1 = vpop.permute.xlu0 %4404 }
0x2c72   :  { %4407 = vst.msk [vmem:[#allocation3 + $0x70] sm:$0xff] %vm311_vm5, %v4405_v1  ;;  %6412 = vmatmul.mubr.msk.f32.vlgmr.msra.gmra.mrb[40].mxu1 %vm311_vm5, %v4405_v1 }
0x2c73   :  { %6804 = vmatpush3.bf16.msra.mxu1 %v7493_v58  ;;  %6433 = vmatprep.mubr.msk.f32.mxu1 %vm7258_vm4, %v7259_v27 }
0x2c74   :  { %6805 = vmatprep.subr.bf16.mxu1 %v7257_v12 }
0x2c77   :  { %6807 = vmatpush3.bf16.msra.mxu1 %v7509_v63 }
0x2c78   :  { %6816 = vmatprep.subr.bf16.mxu1 %v7257_v12 }
0x2c79   :  { %v4578_v29 = vpop.permute.xlu1 %4577  ;;  %v8251_v7 = vld [vmem:[#allocation3 + $0x70] sm:$0xff] }
0x2c7a   :  { %6434 = vmatmul.mubr.msk.f32.vlgmr.msra.gmra.mrb[40].mxu1 %vm311_vm5, %v4578_v29  ;;  %6465 = vmatprep.mubr.msk.f32.mxu0 %vm311_vm5, %v8251_v7 }
0x2c7b   :  { %6476 = vmatprep.mubr.msk.f32.mxu1 %vm7258_vm4, %v7259_v27 }
0x2d4d   :  { %v4647_v58 = vpop.f32.mrb[40].mxu1 }
0x2d4e   :  { %v6863_v3 = vadd.f32 %v7231_v2, %v4647_v58  ;;  %v6435_v63 = vpop.f32.mrb[41].mxu1 }
0x2d50   :  { %7154 = vtanh.f32 %v6863_v3  ;;  %v5557_v30 = vmul.f32 -1.442695, %v6863_v3 }
0x2d52   :  { %7156 = vpow2.f32 %v5557_v30 }
0x2d5a   :  { %v7155_v11 = vpop.eup %7154 }
0x2d5b   :  { %4661 = vrot.lane.b32.xlu0 %v7155_v11, %s7260_s26 }
0x2d5c   :  { %v7157_v15 = vpop.eup %7156 }
0x2d5d   :  { %v4655_v24 = vadd.f32 1.0, %v7157_v15 }
0x2d5f   :  { %7158 = vrcp.f32 %v4655_v24 }
0x2d69   :  { %v7159_v25 = vpop.eup %7158 }
0x2d6a   :  { %v4659_v9 = vmul.f32 %v7159_v25, %v4396_v10  ;;  %v8280_v10 = vld [vmem:[%s8590_s9] ss:$0 sm:$0xff] }
0x2dcd   :  { %v4662_v26 = vpop.permute.xlu0 %4661 }
0x2dce   :  { %v4664_v5 = vmul.f32 %v7159_v25, %v4662_v26 }
0x2dd0   :  { %4666 = vrot.lane.b32.xlu1 %v4664_v5, %s7261_s5 }
0x2e42   :  { %v4667_v31 = vpop.permute.xlu1 %4666 }
0x2e43   :  { %v4669_v39 = vadd.f32 %v4667_v31, %v4659_v9  ;;  %v4828_v9 = vadd.f32 %v8206_v8, %v8267_v41  ;;  %v4843_v31 = vadd.f32 %v8267_v41, %v8217_v36  ;;  %v4883_v36 = vadd.f32 %v8267_v41, %v8233_v22 }
0x2e45   :  { %7160 = vtanh.f32 %v4669_v39  ;;  %v4853_v39 = vadd.f32 %v8267_v41, %v8221_v4 }
0x2e46   :  { %7162 = vtanh.f32 %v4823_v42 }
0x2e47   :  { %7164 = vtanh.f32 %v4833_v44 }
0x2e48   :  { %7166 = vtanh.f32 %v4838_v33 }
0x2e49   :  { %7168 = vtanh.f32 %v4848_v45 }
0x2e4a   :  { %7170 = vtanh.f32 %v4858_v14 }
0x2e4b   :  { %7172 = vtanh.f32 %v4868_v43 }
0x2e4c   :  { %7174 = vtanh.f32 %v4878_v49 }
0x2e4d   :  { %7176 = vtanh.f32 %v4888_v20 }
0x2e4e   :  { %7178 = vtanh.f32 %v4828_v9  ;;  %v5576_v9 = vld [vmem:[#allocation4] ss:$0 sm:$0xff] }
0x2e4f   :  { %v7161_v40 = vpop.eup %7160  ;;  %7180 = vtanh.f32 %v4843_v31 }
0x2e50   :  { %4672 = vrot.lane.b32.xlu0 %v7161_v40, %s7260_s26  ;;  %v7163_v46 = vpop.eup %7162  ;;  %7182 = vtanh.f32 %v4853_v39  ;;  %v4863_v40 = vadd.f32 %v8267_v41, %v8225_v21 }
0x2e51   :  { %v4924_v19 = vmul.f32 %v7163_v46, %v8280_v10  ;;  %v7165_v34 = vpop.eup %7164 }
0x2e52   :  { %v4926_v47 = vmul.f32 %v7165_v34, %v8280_v10  ;;  %v7167_v48 = vpop.eup %7166  ;;  %7184 = vtanh.f32 %v4863_v40 }
0x2e53   :  { %v4941_v16 = vsel %vm4940_vm6, %v4924_v19, 0.0  ;;  %v4927_v50 = vmul.f32 %v7167_v48, %v8280_v10  ;;  %v7169_v35 = vpop.eup %7168 }
0x2e54   :  { %v4947_v18 = vsel %vm4940_vm6, %v4926_v47, 0.0  ;;  %v4929_v13 = vmul.f32 %v7169_v35, %v8280_v10  ;;  %v7171_v38 = vpop.eup %7170 }
0x2e55   :  { %v4950_v0 = vsel %vm4940_vm6, %v4927_v50, 0.0  ;;  %v4931_v37 = vmul.f32 %v7171_v38, %v8280_v10  ;;  %v7173_v29 = vpop.eup %7172 }
0x2e56   :  { %v4956_v1 = vsel %vm4940_vm6, %v4929_v13, 0.0  ;;  %v4933_v2 = vmul.f32 %v7173_v29, %v8280_v10  ;;  %v7175_v3 = vpop.eup %7174 }
0x2e57   :  { %v4962_v58 = vsel %vm4940_vm6, %v4931_v37, 0.0  ;;  %v4935_v63 = vmul.f32 %v7175_v3, %v8280_v10  ;;  %v7177_v11 = vpop.eup %7176 }
0x2e58   :  { %v4968_v32 = vsel %vm4940_vm6, %v4933_v2, 0.0  ;;  %v4937_v15 = vmul.f32 %v7177_v11, %v8280_v10  ;;  %v7179_v42 = vpop.eup %7178 }
0x2e59   :  { %v4974_v30 = vsel %vm4940_vm6, %v4935_v63, 0.0  ;;  %v4925_v44 = vmul.f32 %v7179_v42, %v8280_v10  ;;  %v7181_v8 = vpop.eup %7180 }
0x2e5a   :  { %v4980_v24 = vsel %vm4940_vm6, %v4937_v15, 0.0  ;;  %v4928_v4 = vmul.f32 %v7181_v8, %v8280_v10  ;;  %v7183_v45 = vpop.eup %7182 }
0x2e5b   :  { %v4944_v33 = vsel %vm4940_vm6, %v4925_v44, 0.0  ;;  %v4930_v46 = vmul.f32 %v7183_v45, %v8280_v10 }
0x2e5c   :  { %v4953_v21 = vsel %vm4940_vm6, %v4928_v4, 0.0  ;;  %v7185_v14 = vpop.eup %7184 }
0x2e5d   :  { %v4932_v19 = vmul.f32 %v7185_v14, %v8280_v10 }
0x2e5f   :  { %v4965_v22 = vsel %vm4940_vm6, %v4932_v19, 0.0 }
0x2e6f   :  { %4942 = vadd.xlane.f32.xlu0 %v4941_v16 }
0x2e73   :  { %4948 = vadd.xlane.f32.xlu0 %v4947_v18 }
0x2e77   :  { %4951 = vadd.xlane.f32.xlu0 %v4950_v0 }
0x2e7b   :  { %4957 = vadd.xlane.f32.xlu0 %v4956_v1 }
0x2e7f   :  { %4963 = vadd.xlane.f32.xlu0 %v4962_v58 }
0x2e83   :  { %4969 = vadd.xlane.f32.xlu0 %v4968_v32 }
0x2e87   :  { %4975 = vadd.xlane.f32.xlu0 %v4974_v30 }
0x2e8b   :  { %4981 = vadd.xlane.f32.xlu0 %v4980_v24 }
0x2ec2   :  { %v4673_v26 = vpop.permute.xlu0 %4672 }
0x2ec3   :  { %v4675_v5 = vmul.f32 %v7159_v25, %v4673_v26  ;;  %v4873_v25 = vadd.f32 %v8267_v41, %v8229_v57  ;;  %v4959_v57 = vsel %vm4940_vm6, %v4930_v46, 0.0 }
0x2ec5   :  { %4677 = vrot.lane.b32.xlu1 %v4675_v5, %s7261_s5  ;;  %7186 = vtanh.f32 %v4873_v25 }
0x2ec6   :  { %7188 = vtanh.f32 %v4883_v36 }
0x2ecf   :  { %v7187_v34 = vpop.eup %7186 }
0x2ed0   :  { %v4934_v43 = vmul.f32 %v7187_v34, %v8280_v10  ;;  %v7189_v16 = vpop.eup %7188 }
0x2ed1   :  { %v4936_v48 = vmul.f32 %v7189_v16, %v8280_v10 }
0x2ed2   :  { %v4971_v47 = vsel %vm4940_vm6, %v4934_v43, 0.0 }
0x2ed3   :  { %v4977_v49 = vsel %vm4940_vm6, %v4936_v48, 0.0 }
0x2ee9   :  { %4945 = vadd.xlane.f32.xlu1 %v4944_v33 }
0x2eed   :  { %4954 = vadd.xlane.f32.xlu1 %v4953_v21 }
0x2ef1   :  { %4960 = vadd.xlane.f32.xlu1 %v4959_v57 }
0x2ef5   :  { %4966 = vadd.xlane.f32.xlu1 %v4965_v22 }
0x2ef9   :  { %4972 = vadd.xlane.f32.xlu1 %v4971_v47 }
0x2efc   :  { %v4943_v3 = vpop.xlane.xlu0 %4942 }
0x2efd   :  { %4978 = vadd.xlane.f32.xlu1 %v4977_v49  ;;  %v4996_v44 = vadd.f32 %v5576_v9, %v4943_v3 }
0x2eff   :  { %v5013_v48 = vsel %vm5012_vm7, %v4996_v44, -inf }
0x2f00   :  { %v4949_v32 = vpop.xlane.xlu0 %4948 }
0x2f01   :  { %v4998_v21 = vadd.f32 %v5576_v9, %v4949_v32 }
0x2f04   :  { %v4952_v63 = vpop.xlane.xlu0 %4951 }
0x2f05   :  { %v4999_v36 = vadd.f32 %v5576_v9, %v4952_v63 }
0x2f07   :  { %v5016_v49 = vsel %vm5012_vm7, %v4999_v36, -inf }
0x2f08   :  { %v4958_v30 = vpop.xlane.xlu0 %4957 }
0x2f09   :  { %v8344_v40 = vadd.f32 %v5576_v9, %v4958_v30 }
0x2f0b   :  { %v5019_v46 = vsel %vm5012_vm7, %v8344_v40, -inf }
0x2f0c   :  { %v4964_v24 = vpop.xlane.xlu0 %4963 }
0x2f0d   :  { %v8346_v42 = vadd.f32 %v5576_v9, %v4964_v24 }
0x2f0f   :  { %v5023_v14 = vsel %vm5012_vm7, %v8346_v42, -inf }
0x2f10   :  { %v4970_v5 = vpop.xlane.xlu0 %4969 }
0x2f11   :  { %v8359_v19 = vadd.f32 %v5576_v9, %v4970_v5 }
0x2f14   :  { %v4976_v31 = vpop.xlane.xlu0 %4975 }
0x2f15   :  { %v8357_v57 = vadd.f32 %v5576_v9, %v4976_v31 }
0x2f18   :  { %v4982_v34 = vpop.xlane.xlu0 %4981 }
0x2f37   :  { %v4678_v18 = vpop.permute.xlu1 %4677 }
0x2f38   :  { %4680 = vst.msk [vmem:[#allocation3 + $0x78] sm:$0xff] %vm311_vm5, %v4678_v18 }
0x2f3f   :  { %v8332_v50 = vld [vmem:[#allocation3 + $0x78] sm:$0xff] }
0x2f40   :  { %6466 = vmatmul.mubr.msk.f32.gmra.mrb[52].mxu0 %vm311_vm5, %v8332_v50 }
0x2f41   :  { %6511 = vmatprep.mubr.msk.f32.mxu0 %vm7258_vm4, %v7259_v27  ;;  %v7262_v27 = vmov 0  }
0x2f42   :  { %6905 = vset.pattern.permute.xlu0 %v7262_v27  ;;  %6904 = vset.pattern.permute.xlu1 %v7262_v27 }
0x3013   :  { %v6467_v35 = vpop.f32.mrb[52].mxu0 }
0x3014   :  { %v4898_v20 = vadd.f32 %v6467_v35, %v8267_v41  ;;  %v4892_v0 = vpop.f32.mrb[53].mxu0 }
0x3015   :  { %v4893_v13 = vadd.f32 %v8267_v41, %v4892_v0  ;;  %v4946_v41 = vpop.xlane.xlu1 %4945  ;;  %v5024_v0 = vmax.f32 %v5016_v49, %v5023_v14 }
0x3016   :  { %7190 = vtanh.f32 %v4898_v20  ;;  %v4997_v39 = vadd.f32 %v5576_v9, %v4946_v41  ;;  %v5015_v20 = vsel %vm5012_vm7, %v4998_v21, -inf }
0x3017   :  { %7192 = vtanh.f32 %v4893_v13  ;;  %v5031_v13 = vsel %vm5012_vm7, %v8357_v57, -inf }
0x3018   :  { %v5014_v33 = vsel %vm5012_vm7, %v4997_v39, -inf }
0x3019   :  { %v4955_v11 = vpop.xlane.xlu1 %4954  ;;  %v5020_v47 = vmax.f32 %v5014_v33, %v5019_v46 }
0x301a   :  { %v5000_v25 = vadd.f32 %v5576_v9, %v4955_v11  ;;  %v5032_v11 = vmax.f32 %v5024_v0, %v5031_v13 }
0x301c   :  { %v5017_v22 = vsel %vm5012_vm7, %v5000_v25, -inf }
0x301d   :  { %v4961_v15 = vpop.xlane.xlu1 %4960 }
0x301e   :  { %v8349_v4 = vadd.f32 %v5576_v9, %v4961_v15 }
0x3020   :  { %v7191_v38 = vpop.eup %7190  ;;  %v5021_v18 = vsel %vm5012_vm7, %v8349_v4, -inf }
0x3021   :  { %v7193_v1 = vpop.eup %7192  ;;  %v4939_v37 = vmul.f32 %v7191_v38, %v8280_v10  ;;  %v4967_v26 = vpop.xlane.xlu1 %4966  ;;  %v5018_v38 = vmax.f32 %v5013_v48, %v5017_v22  ;;  %v5022_v3 = vmax.f32 %v5015_v20, %v5021_v18 }
0x3022   :  { %v4938_v29 = vmul.f32 %v7193_v1, %v8280_v10  ;;  %v8351_v45 = vadd.f32 %v5576_v9, %v4967_v26  ;;  %v5027_v1 = vsel %vm5012_vm7, %v8359_v19, -inf }
0x3023   :  { %v4986_v58 = vsel %vm4940_vm6, %v4939_v37, 0.0  ;;  %v8377_v37 = vadd.f32 %v5576_v9, %v4982_v34  ;;  %v5028_v27 = vmax.f32 %v5020_v47, %v5027_v1 }
0x3024   :  { %4987 = vadd.xlane.f32.xlu0 %v4986_v58  ;;  %v4983_v2 = vsel %vm4940_vm6, %v4938_v29, 0.0  ;;  %v5025_v35 = vsel %vm5012_vm7, %v8351_v45, -inf }
0x3025   :  { %4984 = vadd.xlane.f32.xlu1 %v4983_v2  ;;  %v4973_v10 = vpop.xlane.xlu1 %4972  ;;  %v5026_v32 = vmax.f32 %v5018_v38, %v5025_v35  ;;  %v5035_v5 = vsel %vm5012_vm7, %v8377_v37, -inf }
0x3026   :  { %v8362_v43 = vadd.f32 %v5576_v9, %v4973_v10 }
0x3028   :  { %v5029_v29 = vsel %vm5012_vm7, %v8362_v43, -inf }
0x3029   :  { %v4979_v8 = vpop.xlane.xlu1 %4978  ;;  %v5030_v15 = vmax.f32 %v5022_v3, %v5029_v29 }
0x302a   :  { %v8364_v16 = vadd.f32 %v5576_v9, %v4979_v8  ;;  %v5036_v8 = vmax.f32 %v5028_v27, %v5035_v5 }
0x302c   :  { %v5033_v58 = vsel %vm5012_vm7, %v8364_v16, -inf }
0x302d   :  { %v5034_v24 = vmax.f32 %v5026_v32, %v5033_v58 }
0x302f   :  { %v5041_v46 = vmax.f32 %v5034_v24, %v5036_v8 }
0x30b1   :  { %v4988_v2 = vpop.xlane.xlu0 %4987 }
0x30b2   :  { %v8383_v41 = vadd.f32 %v5576_v9, %v4988_v2  ;;  %v4985_v63 = vpop.xlane.xlu1 %4984 }
0x30b3   :  { %v8385_v30 = vadd.f32 %v5576_v9, %v4985_v63 }
0x30b4   :  { %v5039_v26 = vsel %vm5012_vm7, %v8383_v41, -inf }
0x30b5   :  { %v5040_v10 = vmax.f32 %v5032_v11, %v5039_v26  ;;  %v5037_v31 = vsel %vm5012_vm7, %v8385_v30, -inf }
0x30b6   :  { %v5038_v33 = vmax.f32 %v5030_v15, %v5037_v31 }
0x30b8   :  { %v5042_v14 = vmax.f32 %v5038_v33, %v5040_v10 }
0x30ba   :  { %v8393_v34 = vmax.f32 %v5041_v46, %v5042_v14 }
0x30bc   :  { %v5044_v9 = vsub.f32 %v4996_v44, %v8393_v34  ;;  %v5045_v22 = vsub.f32 %v4997_v39, %v8393_v34  ;;  %v5046_v47 = vsub.f32 %v4998_v21, %v8393_v34  ;;  %v5047_v48 = vsub.f32 %v4999_v36, %v8393_v34 }
0x30bd   :  { %v5048_v49 = vsub.f32 %v5000_v25, %v8393_v34  ;;  %v5049_v0 = vsub.f32 %v8344_v40, %v8393_v34  ;;  %v5050_v38 = vsub.f32 %v8349_v4, %v8393_v34  ;;  %v5051_v39 = vsub.f32 %v8346_v42, %v8393_v34 }
0x30be   :  { %v5060_v18 = vmul.f32 1.442695, %v5044_v9  ;;  %v5062_v35 = vmul.f32 1.442695, %v5045_v22  ;;  %v5064_v20 = vmul.f32 1.442695, %v5046_v47  ;;  %v5052_v25 = vsub.f32 %v8351_v45, %v8393_v34 }
0x30bf   :  { %v5066_v13 = vmul.f32 1.442695, %v5047_v48  ;;  %v5068_v44 = vmul.f32 1.442695, %v5048_v49  ;;  %v5070_v36 = vmul.f32 1.442695, %v5049_v0  ;;  %v5053_v40 = vsub.f32 %v8359_v19, %v8393_v34 }
0x30c0   :  { %7194 = vpow2.f32 %v5060_v18  ;;  %v5072_v21 = vmul.f32 1.442695, %v5050_v38  ;;  %v5074_v1 = vmul.f32 1.442695, %v5051_v39  ;;  %v5054_v4 = vsub.f32 %v8362_v43, %v8393_v34 }
0x30c1   :  { %7196 = vpow2.f32 %v5062_v35  ;;  %v5076_v29 = vmul.f32 1.442695, %v5052_v25  ;;  %v5055_v2 = vsub.f32 %v8357_v57, %v8393_v34  ;;  %v5078_v45 = vmul.f32 1.442695, %v5053_v40 }
0x30c2   :  { %7198 = vpow2.f32 %v5064_v20  ;;  %v5056_v32 = vsub.f32 %v8364_v16, %v8393_v34  ;;  %v5080_v63 = vmul.f32 1.442695, %v5054_v4  ;;  %v5057_v24 = vsub.f32 %v8377_v37, %v8393_v34 }
0x30c3   :  { %7200 = vpow2.f32 %v5066_v13  ;;  %v5082_v26 = vmul.f32 1.442695, %v5055_v2  ;;  %v5058_v16 = vsub.f32 %v8385_v30, %v8393_v34  ;;  %v5059_v37 = vsub.f32 %v8383_v41, %v8393_v34 }
0x30c4   :  { %7202 = vpow2.f32 %v5068_v44  ;;  %v5084_v8 = vmul.f32 1.442695, %v5056_v32  ;;  %v5086_v9 = vmul.f32 1.442695, %v5057_v24 }
0x30c5   :  { %7204 = vpow2.f32 %v5070_v36  ;;  %v5088_v49 = vmul.f32 1.442695, %v5058_v16  ;;  %v5090_v20 = vmul.f32 1.442695, %v5059_v37 }
0x30c6   :  { %7206 = vpow2.f32 %v5072_v21 }
0x30c7   :  { %7208 = vpow2.f32 %v5074_v1 }
0x30c8   :  { %7210 = vpow2.f32 %v5076_v29 }
0x30c9   :  { %7212 = vpow2.f32 %v5078_v45 }
0x30ca   :  { %v8412_v58 = vpop.eup %7194  ;;  %7214 = vpow2.f32 %v5080_v63 }
0x30cb   :  { %v8414_v42 = vpop.eup %7196  ;;  %v5092_v27 = vsel %vm5012_vm7, %v8412_v58, 0.0  ;;  %7216 = vpow2.f32 %v5082_v26 }
0x30cc   :  { %v8420_v19 = vpop.eup %7198  ;;  %v5093_v3 = vsel %vm5012_vm7, %v8414_v42, 0.0  ;;  %7218 = vpow2.f32 %v5084_v8 }
0x30cd   :  { %v8424_v43 = vpop.eup %7200  ;;  %v5094_v11 = vadd.f32 %v5093_v3, %v5092_v27  ;;  %v5095_v57 = vsel %vm5012_vm7, %v8420_v19, 0.0  ;;  %7220 = vpow2.f32 %v5086_v9 }
0x30ce   :  { %v8430_v15 = vpop.eup %7202  ;;  %v5097_v10 = vsel %vm5012_vm7, %v8424_v43, 0.0  ;;  %7222 = vpow2.f32 %v5088_v49 }
0x30cf   :  { %v5096_v5 = vadd.f32 %v5095_v57, %v5094_v11  ;;  %v8436_v31 = vpop.eup %7204  ;;  %v5099_v46 = vsel %vm5012_vm7, %v8430_v15, 0.0  ;;  %7224 = vpow2.f32 %v5090_v20 }
0x30d0   :  { %v7207_v14 = vpop.eup %7206  ;;  %v5101_v47 = vsel %vm5012_vm7, %v8436_v31, 0.0 }
0x30d1   :  { %v5098_v33 = vadd.f32 %v5097_v10, %v5096_v5  ;;  %v7209_v48 = vpop.eup %7208  ;;  %v5103_v18 = vsel %vm5012_vm7, %v7207_v14, 0.0 }
0x30d2   :  { %v7211_v35 = vpop.eup %7210  ;;  %v5105_v13 = vsel %vm5012_vm7, %v7209_v48, 0.0 }
0x30d3   :  { %v5100_v22 = vadd.f32 %v5099_v46, %v5098_v33  ;;  %v7213_v38 = vpop.eup %7212  ;;  %v5107_v34 = vsel %vm5012_vm7, %v7211_v35, 0.0 }
0x30d4   :  { %v7215_v44 = vpop.eup %7214  ;;  %v5109_v36 = vsel %vm5012_vm7, %v7213_v38, 0.0 }
0x30d5   :  { %v5102_v30 = vadd.f32 %v5101_v47, %v5100_v22  ;;  %v7217_v25 = vpop.eup %7216  ;;  %v5111_v40 = vsel %vm5012_vm7, %v7215_v44, 0.0 }
0x30d6   :  { %v7219_v1 = vpop.eup %7218  ;;  %v5113_v29 = vsel %vm5012_vm7, %v7217_v25, 0.0 }
0x30d7   :  { %v5104_v0 = vadd.f32 %v5103_v18, %v5102_v30  ;;  %v7221_v2 = vpop.eup %7220  ;;  %v5115_v27 = vsel %vm5012_vm7, %v7219_v1, 0.0 }
0x30d8   :  { %v7223_v3 = vpop.eup %7222  ;;  %v5117_v63 = vsel %vm5012_vm7, %v7221_v2, 0.0 }
0x30d9   :  { %v5106_v41 = vadd.f32 %v5105_v13, %v5104_v0  ;;  %v7225_v11 = vpop.eup %7224  ;;  %v5119_v24 = vsel %vm5012_vm7, %v7223_v3, 0.0 }
0x30da   :  { %v5121_v5 = vsel %vm5012_vm7, %v7225_v11, 0.0 }
0x30db   :  { %v5108_v39 = vadd.f32 %v5107_v34, %v5106_v41  ;;  %v5353_v41 = vld [vmem:[%s8594_s13 + $0x8] sm:$0xff]  ;;  %v5354_v34 = vld [vmem:[%s8594_s13 + $0x10] sm:$0xff] }
0x30dd   :  { %v5110_v21 = vadd.f32 %v5109_v36, %v5108_v39  ;;  %v5355_v39 = vld [vmem:[%s8594_s13 + $0x18] sm:$0xff] }
0x30de   :  { %v6826_v36 = vpack.c.bf16 %v5355_v39, %v5354_v34 }
0x30df   :  { %v5112_v4 = vadd.f32 %v5111_v40, %v5110_v21  ;;  %v5357_v21 = vld [vmem:[%s8594_s13 + $0x28] sm:$0xff] }
0x30e1   :  { %v5114_v45 = vadd.f32 %v5113_v29, %v5112_v4  ;;  %v5359_v4 = vld [vmem:[%s8594_s13 + $0x38] sm:$0xff] }
0x30e3   :  { %v5116_v32 = vadd.f32 %v5115_v27, %v5114_v45  ;;  %v5361_v45 = vld [vmem:[%s8594_s13 + $0x48] sm:$0xff] }
0x30e5   :  { %v5118_v57 = vadd.f32 %v5117_v63, %v5116_v32  ;;  %v5363_v32 = vld [vmem:[%s8594_s13 + $0x58] sm:$0xff] }
0x30e7   :  { %v5120_v26 = vadd.f32 %v5119_v24, %v5118_v57  ;;  %v5365_v57 = vld [vmem:[%s8594_s13 + $0x68] sm:$0xff] }
0x30e9   :  { %v5122_v10 = vadd.f32 %v5121_v5, %v5120_v26 }
0x30eb   :  { %7226 = vrcp.f32 %v5122_v10 }
0x30f5   :  { %v7227_v16 = vpop.eup %7226 }
0x30f6   :  { %v5125_v8 = vmul.f32 %v7227_v16, %v8414_v42  ;;  %v5124_v33 = vmul.f32 %v7227_v16, %v8412_v58  ;;  %v5134_v46 = vmul.f32 %v7227_v16, %v7215_v44  ;;  %v5126_v37 = vmul.f32 %v7227_v16, %v8420_v19 }
0x30f7   :  { %v5136_v9 = vmul.f32 %v7227_v16, %v7219_v1  ;;  %v5127_v22 = vmul.f32 %v7227_v16, %v8424_v43  ;;  %v5138_v47 = vmul.f32 %v7227_v16, %v7223_v3  ;;  %v5128_v49 = vmul.f32 %v7227_v16, %v8430_v15  ;;  %v5267_v15 = vld [vmem:[%s8592_s11] sm:$0xff]  ;;  %v5358_v1 = vld [vmem:[%s8594_s13 + $0x30] sm:$0xff] }
0x30f8   :  { %5147 = vperm.xlu0 %6905, %v5125_v8   ;;  %5142 = vperm.xlu1 %6904, %v5124_v33   ;;  %v5129_v42 = vmul.f32 %v7227_v16, %v8436_v31  ;;  %v5130_v58 = vmul.f32 %v7227_v16, %v7207_v14  ;;  %v5131_v30 = vmul.f32 %v7227_v16, %v7209_v48  ;;  %v5268_v31 = vld [vmem:[%s8592_s11 + $0x8] sm:$0xff]  ;;  %v5269_v48 = vld [vmem:[%s8592_s11 + $0x10] sm:$0xff] }
0x30f9   :  { %v5132_v19 = vmul.f32 %v7227_v16, %v7211_v35  ;;  %v5133_v18 = vmul.f32 %v7227_v16, %v7213_v38  ;;  %v5135_v20 = vmul.f32 %v7227_v16, %v7217_v25  ;;  %v5137_v43 = vmul.f32 %v7227_v16, %v7221_v2  ;;  %v5270_v35 = vld [vmem:[%s8592_s11 + $0x18] sm:$0xff]  ;;  %v5352_v38 = vld [vmem:[%s8594_s13] sm:$0xff]  ;;  %v5362_v3 = vld [vmem:[%s8594_s13 + $0x50] sm:$0xff] }
0x30fa   :  { %v5139_v0 = vmul.f32 %v7227_v16, %v7225_v11  ;;  %v6817_v14 = vpack.c.bf16 %v5268_v31, %v5267_v15  ;;  %v6820_v13 = vpack.c.bf16 %v5270_v35, %v5269_v48  ;;  %v6823_v44 = vpack.c.bf16 %v5353_v41, %v5352_v38  ;;  %v5356_v25 = vld [vmem:[%s8594_s13 + $0x20] sm:$0xff] }
0x30fb   :  { %v6829_v40 = vpack.c.bf16 %v5357_v21, %v5356_v25  ;;  %v6832_v29 = vpack.c.bf16 %v5359_v4, %v5358_v1  ;;  %v5360_v2 = vld [vmem:[%s8594_s13 + $0x40] sm:$0xff]  ;;  %v6838_v63 = vpack.c.bf16 %v5363_v32, %v5362_v3 }
0x30fc   :  { %5192 = vperm.xlu0 %6905, %v5134_v46   ;;  %5152 = vperm.xlu1 %6904, %v5126_v37   ;;  %v6835_v27 = vpack.c.bf16 %v5361_v45, %v5360_v2  ;;  %v5364_v11 = vld [vmem:[%s8594_s13 + $0x60] sm:$0xff] }
0x30fd   :  { %6818 = vmatpush3.bf16.msra.mxu1 %v6817_v14  ;;  %6824 = vmatpush3.bf16.msra.mxu0 %v6823_v44  ;;  %v6841_v24 = vpack.c.bf16 %v5365_v57, %v5364_v11 }
0x30fe   :  { %6819 = vmatprep.subr.bf16.mxu1 %v7257_v12  ;;  %6825 = vmatprep.subr.bf16.mxu0 %v7257_v12 }
0x3100   :  { %5202 = vperm.xlu0 %6905, %v5136_v9   ;;  %5157 = vperm.xlu1 %6904, %v5127_v22  }
0x3101   :  { %6821 = vmatpush3.bf16.msra.mxu1 %v6820_v13  ;;  %6827 = vmatpush3.bf16.msra.mxu0 %v6826_v36 }
0x3102   :  { %6828 = vmatprep.subr.bf16.mxu0 %v7257_v12 }
0x3104   :  { %5212 = vperm.xlu0 %6905, %v5138_v47   ;;  %5162 = vperm.xlu1 %6904, %v5128_v49  }
0x3105   :  { %6830 = vmatpush3.bf16.msra.mxu0 %v6829_v40 }
0x3106   :  { %6831 = vmatprep.subr.bf16.mxu0 %v7257_v12 }
0x3108   :  { %5167 = vperm.xlu1 %6904, %v5129_v42  }
0x3109   :  { %6833 = vmatpush3.bf16.msra.mxu0 %v6832_v29 }
0x310a   :  { %6834 = vmatprep.subr.bf16.mxu0 %v7257_v12 }
0x310c   :  { %5172 = vperm.xlu1 %6904, %v5130_v58  }
0x310d   :  { %6836 = vmatpush3.bf16.msra.mxu0 %v6835_v27 }
0x310e   :  { %6837 = vmatprep.subr.bf16.mxu0 %v7257_v12 }
0x3110   :  { %5177 = vperm.xlu1 %6904, %v5131_v30  }
0x3111   :  { %6839 = vmatpush3.bf16.msra.mxu0 %v6838_v63 }
0x3112   :  { %6840 = vmatprep.subr.bf16.mxu0 %v7257_v12 }
0x3114   :  { %5182 = vperm.xlu1 %6904, %v5132_v19  }
0x3115   :  { %6842 = vmatpush3.bf16.msra.mxu0 %v6841_v24 }
0x3116   :  { %6843 = vmatprep.subr.bf16.mxu0 %v7257_v12 }
0x3118   :  { %5187 = vperm.xlu1 %6904, %v5133_v18  }
0x311c   :  { %5197 = vperm.xlu1 %6904, %v5135_v20  }
0x3120   :  { %5207 = vperm.xlu1 %6904, %v5137_v43  }
0x3124   :  { %5217 = vperm.xlu1 %6904, %v5139_v0  }
0x3177   :  { %v5143_v26 = vpop.permute.xlu1 %5142  ;;  %v5148_v16 = vpop.permute.xlu0 %5147 }
0x3178   :  { %v5221_v33 = vmul.f32 %v5148_v16, %v8148_v51  ;;  %v5220_v46 = vmul.f32 %v5143_v26, %v8143_v17 }
0x317a   :  { %v5237_v22 = vsel %vm311_vm5, %v5221_v33, 0.0  ;;  %v5236_v47 = vsel %vm311_vm5, %v5220_v46, 0.0 }
0x317b   :  { %v5153_v5 = vpop.permute.xlu1 %5152  ;;  %v5238_v58 = vadd.f32 %v5237_v22, %v5236_v47  ;;  %v5193_v15 = vpop.permute.xlu0 %5192 }
0x317c   :  { %v5222_v37 = vmul.f32 %v5153_v5, %v8152_v23  ;;  %v5230_v44 = vmul.f32 %v5193_v15, %v8184_v60 }
0x317e   :  { %v5239_v12 = vsel %vm311_vm5, %v5222_v37, 0.0  ;;  %v5255_v40 = vsel %vm311_vm5, %v5230_v44, 0.0  ;;  %v5579_v37 = vld [vmem:[%s8595_s14] ss:$0 sm:$0xff] }
0x317f   :  { %v5158_v10 = vpop.permute.xlu1 %5157  ;;  %v5240_v17 = vadd.f32 %v5239_v12, %v5238_v58 }
0x3180   :  { %v5223_v49 = vmul.f32 %v5158_v10, %v8156_v53 }
0x3182   :  { %v5241_v19 = vsel %vm311_vm5, %v5223_v49, 0.0 }
0x3183   :  { %v5163_v8 = vpop.permute.xlu1 %5162  ;;  %v5242_v20 = vadd.f32 %v5241_v19, %v5240_v17 }
0x3184   :  { %v5224_v42 = vmul.f32 %v5163_v8, %v8160_v55 }
0x3186   :  { %v5243_v23 = vsel %vm311_vm5, %v5224_v42, 0.0 }
0x3187   :  { %v5168_v9 = vpop.permute.xlu1 %5167  ;;  %v5244_v31 = vadd.f32 %v5243_v23, %v5242_v20 }
0x3188   :  { %v5225_v51 = vmul.f32 %v5168_v9, %v8164_v54 }
0x318a   :  { %v5245_v0 = vsel %vm311_vm5, %v5225_v51, 0.0 }
0x318b   :  { %v5173_v30 = vpop.permute.xlu1 %5172  ;;  %v5246_v14 = vadd.f32 %v5245_v0, %v5244_v31 }
0x318c   :  { %v5226_v18 = vmul.f32 %v5173_v30, %v8168_v56  ;;  %v5203_v56 = vpop.permute.xlu0 %5202 }
0x318d   :  { %v5232_v1 = vmul.f32 %v5203_v56, %v8192_v61 }
0x318e   :  { %v5247_v55 = vsel %vm311_vm5, %v5226_v18, 0.0 }
0x318f   :  { %v5178_v43 = vpop.permute.xlu1 %5177  ;;  %v5248_v13 = vadd.f32 %v5247_v55, %v5246_v14  ;;  %v5259_v60 = vsel %vm311_vm5, %v5232_v1, 0.0 }
0x3190   :  { %v5227_v53 = vmul.f32 %v5178_v43, %v8172_v6  ;;  %v5213_v4 = vpop.permute.xlu0 %5212 }
0x3192   :  { %v5249_v35 = vsel %vm311_vm5, %v5227_v53, 0.0 }
0x3193   :  { %v5183_v48 = vpop.permute.xlu1 %5182  ;;  %v5250_v41 = vadd.f32 %v5249_v35, %v5248_v13 }
0x3194   :  { %v5228_v54 = vmul.f32 %v5183_v48, %v8176_v28 }
0x3196   :  { %v5251_v38 = vsel %vm311_vm5, %v5228_v54, 0.0 }
0x3197   :  { %v5188_v34 = vpop.permute.xlu1 %5187  ;;  %v5252_v39 = vadd.f32 %v5251_v38, %v5250_v41 }
0x3198   :  { %v5229_v6 = vmul.f32 %v5188_v34, %v8180_v59  ;;  %v5234_v59 = vmul.f32 %v5213_v4, %v8251_v7  ;;  %v5366_v7 = vld [vmem:[%s8594_s13 + $0x70] sm:$0xff] }
0x319a   :  { %v5253_v36 = vsel %vm311_vm5, %v5229_v6, 0.0  ;;  %v5263_v61 = vsel %vm311_vm5, %v5234_v59, 0.0 }
0x319b   :  { %v5254_v25 = vadd.f32 %v5253_v36, %v5252_v39  ;;  %v5198_v21 = vpop.permute.xlu1 %5197 }
0x319c   :  { %v5231_v28 = vmul.f32 %v5198_v21, %v8188_v52 }
0x319d   :  { %v5256_v29 = vadd.f32 %v5255_v40, %v5254_v25 }
0x319e   :  { %v5257_v2 = vsel %vm311_vm5, %v5231_v28, 0.0 }
0x319f   :  { %v5258_v45 = vadd.f32 %v5257_v2, %v5256_v29  ;;  %v5208_v27 = vpop.permute.xlu1 %5207 }
0x31a0   :  { %v5233_v3 = vmul.f32 %v5208_v27, %v8196_v62  ;;  %v5367_v62 = vld [vmem:[%s8594_s13 + $0x78] sm:$0xff]  ;;  %s7232_s13 = scalar_lea.vmem %s5454_s23, 128 }
0x31a1   :  { %v5260_v32 = vadd.f32 %v5259_v60, %v5258_v45  ;;  %v6844_v10 = vpack.c.bf16 %v5367_v62, %v5366_v7  ;;  %p7233_p0 = scmp.ne.s32.totalorder %s5454_s23, %s7232_s13  ;;  %p7238_p2 = scmp.lt.s32.totalorder %s7232_s13, %s7232_s13 }
0x31a2   :  { %v5261_v63 = vsel %vm311_vm5, %v5233_v3, 0.0 }
0x31a3   :  { %v5262_v11 = vadd.f32 %v5261_v63, %v5260_v32  ;;  %v5218_v57 = vpop.permute.xlu1 %5217  ;;  %6845 = vmatpush3.bf16.msra.mxu0 %v6844_v10  ;;  %p7239_p3 = por %p7238_p2, %p7237_p1 }
0x31a4   :  { %v5235_v52 = vmul.f32 %v5218_v57, %v8332_v50  ;;  %v5577_v50 = vld [vmem:[%s8593_s12] ss:$0 sm:$0xff] }
0x31a5   :  { %v5264_v24 = vadd.f32 %v5263_v61, %v5262_v11  ;;  %p7240_p4 = pnand %p7239_p3, %p7233_p0 }
0x31a6   :  { %v5265_v26 = vsel %vm311_vm5, %v5235_v52, 0.0 }
0x31a7   :  { %v5266_v5 = vadd.f32 %v5265_v26, %v5264_v24 }
0x31a9   :  { %6477 = vmatmul.mubr.msk.f32.vlgmr.msra.gmra.mrb[42].mxu1 %vm311_vm5, %v5266_v5 }
0x327c   :  { %v5347_v16 = vpop.f32.mrb[42].mxu1 }
0x327d   :  { %v5348_v8 = vadd.f32 %v5577_v50, %v5347_v16  ;;  %v6478_v33 = vpop.f32.mrb[43].mxu1 }
0x327f   :  { %v5351_v46 = vmax.f32 %v5348_v8, 0.0 }
0x3281   :  { %6512 = vmatmul.mubr.f32.vlgmr.msra.gmra.mrb[54].mxu0 %v5351_v46 }
0x3354   :  { %v5441_v9 = vpop.f32.mrb[54].mxu0 }
0x3355   :  { %v5442_v22 = vadd.f32 %v5579_v37, %v5441_v9  ;;  %v6513_v47 = vpop.f32.mrb[55].mxu0 }
0x3357   :  { %5446 = vst.msk [vmem:[#allocation5] sm:$0xff] %vm5445_vm8, %v5442_v22 }
0x3358   :  { %7243 = shalt.err (!%p7240_p4)
}
0x3359   :  { %s7244_s24 = scalar_lea.hbm %s8596_s15, 128 }
0x335a   :  { %p7245_p5 = scmp.ne.s32.totalorder %s8596_s15, %s7244_s24  ;;  %p7248_p6 = scmp.lt.u32.totalorder %s7244_s24, %s8596_s15 }
0x335c   :  { %p7250_p7 = pnand %p7248_p6, %p7245_p5 }
0x335e   :  { %7253 = shalt.err (!%p7250_p7)
}
0x335f   :  { %5456 = dma.vmem_to_hbm [thread:$0]  %s5454_s23, 128, %s8596_s15, [#allocation6]  }
0x3360   :  { %7254 = dma.done.wait [#allocation6], 128  }
0x3361   :  { %7255 = vsyncadd [#allocation6], 4294967168 }
0x3362   :  { %5460 = vsyncpa [#allocation6], 1 }

</bundles_post_ra>
